<compile_context>
chip_gen: v5e
topology: v5e:2x2
jax: 0.10.0
libtpu: 0.0.40
codegen_flags: <defaults>
</compile_context>

<pallas_src>
import functools

import jax
import jax.numpy as jnp
from jax.experimental import pallas as pl
from jax.experimental.pallas import tpu as pltpu

LN_EPS = 1e-5  # PyTorch nn.LayerNorm default


def _round_up(n, m):
    return ((n + m - 1) // m) * m


def _usable_vmem_bytes():
    """Per-TensorCore VMEM budget with ~25% headroom for compiler scratch."""
    try:
        cap = int(pltpu.get_tpu_info().vmem_capacity_bytes)
    except Exception:
        cap = 64 * 1024 * 1024  # conservative (v7x physical per-TC)
    return int(cap * 0.75)


def _const_spec(shape):
    """BlockSpec for a grid-invariant operand; single-buffered when supported."""
    index_map = lambda i: (0,) * len(shape)
    try:
        return pl.BlockSpec(shape, index_map, pipeline_mode=pl.Buffered(1))
    except Exception:
        return pl.BlockSpec(shape, index_map)


def _prenorm_kernel(x_ref, g_ref, b_ref, w_ref, bias_ref, o_ref, *,
                    total_rows, tile_rows, mask_tail):
    # x_ref: (tm, D) row tile (native dtype); g/b/bias: (1, D) f32; w: (D, D) bf16.
    x = x_ref[...].astype(jnp.float32)

    if mask_tail:
        # Zero out rows past the real row count so the ragged last block's
        # undefined data can't produce inf/NaN (those rows are never stored
        # to valid output anyway).
        row = pl.program_id(0) * tile_rows + jax.lax.broadcasted_iota(
            jnp.int32, (tile_rows, 1), 0)
        x = jnp.where(row < total_rows, x, 0.0)

    # LayerNorm over the last (lane) axis, biased variance like nn.LayerNorm.
    mean = jnp.mean(x, axis=-1, keepdims=True)
    xc = x - mean
    var = jnp.mean(xc * xc, axis=-1, keepdims=True)
    inv = jax.lax.rsqrt(var + LN_EPS)

    # Fused normalize*gamma + beta, cast straight to bf16 feeding the MXU
    # (no live f32 y temp kept around the matmul).
    y_bf16 = (xc * (inv * g_ref[...]) + b_ref[...]).astype(jnp.bfloat16)

    # fn = Linear(D, D): bf16 x bf16 matmul, f32 accumulation, bias in f32.
    o_ref[...] = (
        jnp.dot(y_bf16, w_ref[...], preferred_element_type=jnp.float32)
        + bias_ref[...]
    ).astype(o_ref.dtype)


@functools.partial(jax.jit, static_argnames=("tm",))
def prenorm(x, gamma, beta, w, bias, *, tm=512):
    """PreNorm forward: fn(LayerNorm(x)) with fn = Linear(D, D) (y @ w + bias).

    x: (B, N, D), any float dtype (f32 or bf16). Output matches x.dtype.
    D should be a multiple of 128 (true for ViT dims 256/384/768/1024) so
    stores are lane-dense unmasked vst.
    """
    B, N, D = x.shape
    M = B * N

    # Clamp the row tile to the (8-aligned) real row count so small inputs
    # don't DMA/matmul a mostly-empty 512-row tile.
    tm_eff = max(8, min(tm, _round_up(M, 8)))
    grid_m = pl.cdiv(M, tm_eff)
    mask_tail = (grid_m * tm_eff) != M

    # No HBM pad / dtype-conversion pass: reshape only.
    x2 = x.reshape(M, D)

    gamma2 = gamma.astype(jnp.float32).reshape(1, D)
    beta2 = beta.astype(jnp.float32).reshape(1, D)
    bias2 = bias.astype(jnp.float32).reshape(1, D)
    w_bf16 = w.astype(jnp.bfloat16)  # resident bf16 MXU operand

    x_bytes = jnp.dtype(x.dtype).itemsize
    out_bytes = x_bytes  # output dtype follows x

    # VMEM: double-buffered x/out row tiles + single-buffered W/params.
    vmem_needed = (2 * tm_eff * D * x_bytes) + (2 * tm_eff * D * out_bytes) \
        + (D * D * 2) + (3 * D * 4)
    vmem_limit = int(min(max(int(1.5 * vmem_needed), 32 * 1024 * 1024),
                         _usable_vmem_bytes()))

    cost = pl.CostEstimate(
        flops=2 * M * D * D,
        transcendentals=M,  # one rsqrt per row
        bytes_accessed=M * D * (x_bytes + out_bytes) + (D * D * 2) + (3 * D * 4),
    )

    kernel = functools.partial(
        _prenorm_kernel,
        total_rows=M, tile_rows=tm_eff, mask_tail=mask_tail)

    out = pl.pallas_call(
        kernel,
        out_shape=jax.ShapeDtypeStruct((M, D), x.dtype),
        grid_spec=pltpu.PrefetchScalarGridSpec(
            num_scalar_prefetch=0,
            grid=(grid_m,),
            in_specs=[
                pl.BlockSpec((tm_eff, D), lambda i: (i, 0)),  # x rows
                _const_spec((1, D)),                          # gamma
                _const_spec((1, D)),                          # beta
                _const_spec((D, D)),                          # W (bf16, resident)
                _const_spec((1, D)),                          # fn bias
            ],
            out_specs=pl.BlockSpec((tm_eff, D), lambda i: (i, 0)),
        ),
        compiler_params=pltpu.CompilerParams(
            dimension_semantics=("parallel",),
            vmem_limit_bytes=vmem_limit,
        ),
        cost_estimate=cost,
    )(x2, gamma2, beta2, w_bf16, bias2)

    # TODO(synk): for D >= ~3072 on v7x add a second ("arbitrary") grid axis
    # over >=256-wide W column tiles with the LN result cached in VMEM scratch.

    return out.reshape(B, N, D)


def _reference(x, gamma, beta, w, bias):
    x = x.astype(jnp.float32)
    mean = jnp.mean(x, axis=-1, keepdims=True)
    var = jnp.mean((x - mean) ** 2, axis=-1, keepdims=True)
    y = (x - mean) * jax.lax.rsqrt(var + LN_EPS) * gamma + beta
    return jnp.einsum("bnd,de->bne", y, w.astype(jnp.float32)) + bias


if __name__ == "__main__":
    # ViT-like small config: 197 tokens (ragged vs. the row tile, exercises
    # in-kernel tail masking), D = 256 (multiple of 128 -> lane-dense stores).
    B, N, D = 2, 197, 256
    key = jax.random.PRNGKey(0)
    kx, kw, kb = jax.random.split(key, 3)

    x = jax.random.normal(kx, (B, N, D), dtype=jnp.float32)

    # LayerNorm params: PyTorch default init (ones / zeros).
    gamma = jnp.ones((D,), dtype=jnp.float32)
    beta = jnp.zeros((D,), dtype=jnp.float32)

    # fn = Linear(D, D) params, deterministic synthetic init.
    w = jax.random.normal(kw, (D, D), dtype=jnp.float32) * 0.02
    bias = jax.random.normal(kb, (D,), dtype=jnp.float32) * 0.02

    ref = _reference(x, gamma, beta, w, bias)

    # Default tile (clamped to the row count; single ragged block).
    out = jax.block_until_ready(prenorm(x, gamma, beta, w, bias))
    assert out.shape == (B, N, D)
    assert jnp.allclose(out, ref, atol=2e-2, rtol=2e-2), "mismatch (default tile)"

    # Smaller tile -> multi-step grid with a ragged last block.
    out2 = jax.block_until_ready(prenorm(x, gamma, beta, w, bias, tm=128))
    assert jnp.allclose(out2, ref, atol=2e-2, rtol=2e-2), "mismatch (tm=128)"

    print("KERNEL_OK")
</pallas_src>

<mosaic_0001>
module attributes {stable_mosaic.version = 11 : i64} {
  func.func @_prenorm_kernel(%arg0: i32, %arg1: memref<400x256xf32, #tpu.memory_space<vmem>>, %arg2: memref<1x256xf32, #tpu.memory_space<vmem>>, %arg3: memref<1x256xf32, #tpu.memory_space<vmem>>, %arg4: memref<256x256xbf16, #tpu.memory_space<vmem>>, %arg5: memref<1x256xf32, #tpu.memory_space<vmem>>, %arg6: memref<400x256xf32, #tpu.memory_space<vmem>>) attributes {dimension_semantics = [#tpu.dimension_semantics<parallel>], iteration_bounds = array<i64: 1>, scalar_prefetch = 0 : i64, scratch_operands = 0 : i64, tpu.core_type = #tpu.core_type<tc>, window_params = [{transform_indices = @transform_0, window_bounds = array<i64: 400, 256>}, {pipeline_mode = #tpu.pipeline_mode<synchronous>, transform_indices = @transform_1, window_bounds = array<i64: 1, 256>}, {pipeline_mode = #tpu.pipeline_mode<synchronous>, transform_indices = @transform_2, window_bounds = array<i64: 1, 256>}, {pipeline_mode = #tpu.pipeline_mode<synchronous>, transform_indices = @transform_3, window_bounds = array<i64: 256, 256>}, {pipeline_mode = #tpu.pipeline_mode<synchronous>, transform_indices = @transform_4, window_bounds = array<i64: 1, 256>}, {transform_indices = @transform_5, window_bounds = array<i64: 400, 256>}]} {
    %c0 = arith.constant 0 : index
    %c0_0 = arith.constant 0 : index
    %0 = vector.load %arg1[%c0, %c0_0] : memref<400x256xf32, #tpu.memory_space<vmem>>, vector<400x256xf32>
    %c400_i32 = arith.constant 400 : i32
    %1 = arith.muli %arg0, %c400_i32 : i32
    %2 = tpu.iota {dimensions = array<i32: 0>} : vector<400x1xi32>
    %3 = vector.broadcast %1 : i32 to vector<400x1xi32>
    %4 = arith.addi %3, %2 : vector<400x1xi32>
    %c394_i32 = arith.constant 394 : i32
    %5 = vector.broadcast %c394_i32 : i32 to vector<400x1xi32>
    %6 = arith.cmpi slt, %4, %5 : vector<400x1xi32>
    %cst = arith.constant 0.000000e+00 : f32
    %7 = vector.shape_cast %6 : vector<400x1xi1> to vector<400x1xi1>
    %8 = vector.broadcast %7 : vector<400x1xi1> to vector<400x256xi1>
    %9 = vector.broadcast %cst : f32 to vector<400x256xf32>
    %10 = arith.select %8, %0, %9 : vector<400x256xi1>, vector<400x256xf32>
    %cst_1 = arith.constant dense<0.000000e+00> : vector<400xf32>
    %11 = vector.multi_reduction <add>, %10, %cst_1 [1] : vector<400x256xf32> to vector<400xf32>
    %12 = vector.shape_cast %11 : vector<400xf32> to vector<400x1xf32>
    %cst_2 = arith.constant 2.560000e+02 : f32
    %13 = vector.broadcast %cst_2 : f32 to vector<400x1xf32>
    %14 = arith.divf %12, %13 : vector<400x1xf32>
    %15 = vector.broadcast %14 : vector<400x1xf32> to vector<400x256xf32>
    %16 = arith.subf %10, %15 : vector<400x256xf32>
    %17 = arith.mulf %16, %16 : vector<400x256xf32>
    %cst_3 = arith.constant dense<0.000000e+00> : vector<400xf32>
    %18 = vector.multi_reduction <add>, %17, %cst_3 [1] : vector<400x256xf32> to vector<400xf32>
    %19 = vector.shape_cast %18 : vector<400xf32> to vector<400x1xf32>
    %cst_4 = arith.constant 2.560000e+02 : f32
    %20 = vector.broadcast %cst_4 : f32 to vector<400x1xf32>
    %21 = arith.divf %19, %20 : vector<400x1xf32>
    %cst_5 = arith.constant 9.99999974E-6 : f32
    %22 = vector.broadcast %cst_5 : f32 to vector<400x1xf32>
    %23 = arith.addf %21, %22 : vector<400x1xf32>
    %24 = math.rsqrt %23 : vector<400x1xf32>
    %c0_6 = arith.constant 0 : index
    %c0_7 = arith.constant 0 : index
    %25 = vector.load %arg2[%c0_6, %c0_7] : memref<1x256xf32, #tpu.memory_space<vmem>>, vector<1x256xf32>
    %26 = vector.broadcast %24 : vector<400x1xf32> to vector<400x256xf32>
    %27 = vector.broadcast %25 : vector<1x256xf32> to vector<400x256xf32>
    %28 = arith.mulf %26, %27 : vector<400x256xf32>
    %29 = arith.mulf %16, %28 : vector<400x256xf32>
    %c0_8 = arith.constant 0 : index
    %c0_9 = arith.constant 0 : index
    %30 = vector.load %arg3[%c0_8, %c0_9] : memref<1x256xf32, #tpu.memory_space<vmem>>, vector<1x256xf32>
    %31 = vector.broadcast %30 : vector<1x256xf32> to vector<400x256xf32>
    %32 = arith.addf %29, %31 : vector<400x256xf32>
    %33 = arith.truncf %32 : vector<400x256xf32> to vector<400x256xbf16>
    %c0_10 = arith.constant 0 : index
    %c0_11 = arith.constant 0 : index
    %34 = vector.load %arg4[%c0_10, %c0_11] : memref<256x256xbf16, #tpu.memory_space<vmem>>, vector<256x256xbf16>
    %cst_12 = arith.constant dense<0.000000e+00> : vector<400x256xf32>
    %35 = tpu.matmul %33, %34, %cst_12 {dimension_numbers = #tpu.dot_dimension_numbers<[1], [0], [0], [1], [0, 0, 1, 1], [], []>} : vector<400x256xbf16>, vector<256x256xbf16>, vector<400x256xf32> -> vector<400x256xf32>
    %c0_13 = arith.constant 0 : index
    %c0_14 = arith.constant 0 : index
    %36 = vector.load %arg5[%c0_13, %c0_14] : memref<1x256xf32, #tpu.memory_space<vmem>>, vector<1x256xf32>
    %37 = vector.broadcast %36 : vector<1x256xf32> to vector<400x256xf32>
    %38 = arith.addf %35, %37 : vector<400x256xf32>
    %c0_15 = arith.constant 0 : index
    %c0_16 = arith.constant 0 : index
    %39 = vector.load %arg6[%c0_15, %c0_16] : memref<400x256xf32, #tpu.memory_space<vmem>>, vector<400x256xf32>
    tpu.vector_store %arg6[%c0_15, %c0_16], %38 {strides = array<i32>} : memref<400x256xf32, #tpu.memory_space<vmem>>, vector<400x256xf32>,
    return
  }
  func.func @transform_0(%arg0: i32) -> (i32, i32) {
    %c0_i32 = arith.constant 0 : i32
    %c0_i32_0 = arith.constant 0 : i32
    return %arg0, %c0_i32 : i32, i32
  }
  func.func @transform_1(%arg0: i32) -> (i32, i32) {
    %c0_i32 = arith.constant 0 : i32
    %c0_i32_0 = arith.constant 0 : i32
    %c0_i32_1 = arith.constant 0 : i32
    return %c0_i32, %c0_i32_0 : i32, i32
  }
  func.func @transform_2(%arg0: i32) -> (i32, i32) {
    %c0_i32 = arith.constant 0 : i32
    %c0_i32_0 = arith.constant 0 : i32
    %c0_i32_1 = arith.constant 0 : i32
    return %c0_i32, %c0_i32_0 : i32, i32
  }
  func.func @transform_3(%arg0: i32) -> (i32, i32) {
    %c0_i32 = arith.constant 0 : i32
    %c0_i32_0 = arith.constant 0 : i32
    %c0_i32_1 = arith.constant 0 : i32
    return %c0_i32, %c0_i32_0 : i32, i32
  }
  func.func @transform_4(%arg0: i32) -> (i32, i32) {
    %c0_i32 = arith.constant 0 : i32
    %c0_i32_0 = arith.constant 0 : i32
    %c0_i32_1 = arith.constant 0 : i32
    return %c0_i32, %c0_i32_0 : i32, i32
  }
  func.func @transform_5(%arg0: i32) -> (i32, i32) {
    %c0_i32 = arith.constant 0 : i32
    %c0_i32_0 = arith.constant 0 : i32
    return %arg0, %c0_i32 : i32, i32
  }
}

</mosaic_0001>

<bundles_post_ra>
// kernel: prenorm.1
= control target key start
LH: loop header
LB: loop body
LE: loop exit
PB: predicated region body
PF: predicated region fallthrough
CT: control target
= control target key end

     0   :  { %v3093_v27 = vmov 256.0   ;;  %s5850_s0 = inlined_call_operand.vmem [shape: f32[394,256], index: 0, kind: input, shape index: {}]   ;;  %s5851_s3 = inlined_call_operand.vmem [shape: bf16[256,256], index: 3, kind: input, shape index: {}]   ;;  %s5852_s1 = inlined_call_operand.vmem [shape: f32[1,256], index: 1, kind: input, shape index: {}]   ;;  %s5853_s2 = inlined_call_operand.vmem [shape: f32[1,256], index: 2, kind: input, shape index: {}]   ;;  %s5854_s4 = inlined_call_operand.vmem [shape: f32[1,256], index: 4, kind: input, shape index: {}]   ;;  %s5855_s5 = inlined_call_operand.vmem [shape: f32[394,256], index: 5, kind: output, shape index: {}]  }
   0x1   :  { %v3127_v0 = vld [vmem:[%s5850_s0 + $0x20] sm:$0xff]  ;;  %v3132_v1 = vld [vmem:[%s5850_s0 + $0x28] sm:$0xff]  ;;  %v26_v8 = vld [vmem:[%s5850_s0 + $0x30] sm:$0xff]  ;;  %2991 = vrcp.f32 %v3093_v27 }
   0x2   :  { %v20_v2 = vld [vmem:[%s5850_s0] sm:$0xff]  ;;  %v479_v3 = vadd.f32 %v3132_v1, %v3127_v0  ;;  %v21_v4 = vld [vmem:[%s5850_s0 + $0x8] sm:$0xff]  ;;  %v27_v9 = vld [vmem:[%s5850_s0 + $0x38] sm:$0xff] }
   0x3   :  { %v473_v5 = vadd.f32 %v21_v4, %v20_v2  ;;  %v28_v6 = vld [vmem:[%s5850_s0 + $0x40] sm:$0xff]  ;;  %v29_v7 = vld [vmem:[%s5850_s0 + $0x48] sm:$0xff]  ;;  %v22_v11 = vld [vmem:[%s5850_s0 + $0x10] sm:$0xff]  ;;  %v482_v13 = vadd.f32 %v27_v9, %v26_v8 }
   0x4   :  { %480 = vadd.xlane.f32.xlu1 %v479_v3  ;;  %v485_v10 = vadd.f32 %v29_v7, %v28_v6  ;;  %v23_v12 = vld [vmem:[%s5850_s0 + $0x18] sm:$0xff]  ;;  %v3163_v14 = vld [vmem:[%s5850_s0 + $0x50] sm:$0xff]  ;;  %v3185_v20 = vld [vmem:[%s5850_s0 + $0x60] sm:$0xff] }
   0x5   :  { %474 = vadd.xlane.f32.xlu0 %v473_v5  ;;  %v3168_v15 = vld [vmem:[%s5850_s0 + $0x58] sm:$0xff]  ;;  %v476_v16 = vadd.f32 %v23_v12, %v22_v11  ;;  %v3175_v18 = vld [vmem:[%s5850_s0 + $0x70] sm:$0xff]  ;;  %v3190_v21 = vld [vmem:[%s5850_s0 + $0x68] sm:$0xff] }
   0x6   :  { %486 = vadd.xlane.f32.xlu2 %v485_v10  ;;  %v488_v17 = vadd.f32 %v3168_v15, %v3163_v14  ;;  %v3180_v19 = vld [vmem:[%s5850_s0 + $0x78] sm:$0xff]  ;;  %v491_v23 = vadd.f32 %v3190_v21, %v3185_v20  ;;  %v3199_v24 = vld [vmem:[%s5850_s0 + $0x80] sm:$0xff]  ;;  %v3204_v25 = vld [vmem:[%s5850_s0 + $0x88] sm:$0xff] }
   0x7   :  { %v494_v22 = vadd.f32 %v3180_v19, %v3175_v18  ;;  %v497_v26 = vadd.f32 %v3204_v25, %v3199_v24  ;;  %v2992_v28 = vpop.eup %2991  ;;  %v3224_v47 = vld [vmem:[%s5850_s0 + $0x90] sm:$0xff]  ;;  %v3229_v48 = vld [vmem:[%s5850_s0 + $0x98] sm:$0xff] }
   0x8   :  { %v624_v29 = vmul.f32 256.0, %v2992_v28  ;;  %vm628_vm0 = vweird.f32 %v2992_v28  ;;  %v500_v55 = vadd.f32 %v3229_v48, %v3224_v47  ;;  %v3306_v27 = vld [vmem:[%s5850_s0 + $0xb0] sm:$0xff] }
   0xa   :  { %v625_v30 = vsub.f32 1.0, %v624_v29 }
   0xc   :  { %483 = vadd.xlane.f32.xlu1 %v482_v13  ;;  %v626_v31 = vmul.f32 %v2992_v28, %v625_v30 }
   0xd   :  { %477 = vadd.xlane.f32.xlu0 %v476_v16 }
   0xe   :  { %489 = vadd.xlane.f32.xlu2 %v488_v17  ;;  %v627_v32 = vadd.f32 %v2992_v28, %v626_v31 }
  0x10   :  { %v3208_v33 = vsel %vm628_vm0, %v2992_v28, %v627_v32  ;;  %v3311_v28 = vld [vmem:[%s5850_s0 + $0xb8] sm:$0xff] }
  0x14   :  { %495 = vadd.xlane.f32.xlu1 %v494_v22 }
  0x15   :  { %492 = vadd.xlane.f32.xlu0 %v491_v23  ;;  %v3292_v23 = vld [vmem:[%s5850_s0 + $0xd0] sm:$0xff] }
  0x1c   :  { %498 = vadd.xlane.f32.xlu1 %v497_v26 }
  0x77   :  { %v481_v34 = vpop.xlane.xlu1 %480 }
  0x78   :  { %v475_v35 = vpop.xlane.xlu0 %474  ;;  %v632_v49 = vmul.f32 %v3208_v33, %v481_v34 }
  0x79   :  { %v630_v36 = vmul.f32 %v3208_v33, %v475_v35  ;;  %v487_v39 = vpop.xlane.xlu2 %486  ;;  %v506_v35 = vadd.f32 %v3311_v28, %v3306_v27 }
  0x7a   :  { %v634_v46 = vmul.f32 %v3208_v33, %v487_v39  ;;  %v3252_v60 = vsub.f32 %v3127_v0, %v632_v49  ;;  %v3255_v61 = vsub.f32 %v3132_v1, %v632_v49  ;;  %v3327_v39 = vld [vmem:[%s5850_s0 + $0xe0] sm:$0xff] }
  0x7b   :  { %v3211_v37 = vsub.f32 %v20_v2, %v630_v36  ;;  %v3213_v38 = vsub.f32 %v21_v4, %v630_v36 }
  0x7c   :  { %v3243_v56 = vsub.f32 %v28_v6, %v634_v46  ;;  %v3245_v57 = vsub.f32 %v29_v7, %v634_v46  ;;  %v784_v6 = vmul.f32 %v3252_v60, %v3252_v60  ;;  %v785_v7 = vmul.f32 %v3255_v61, %v3255_v61 }
  0x7d   :  { %v780_v40 = vmul.f32 %v3211_v37, %v3211_v37  ;;  %v781_v41 = vmul.f32 %v3213_v38, %v3213_v38 }
  0x7e   :  { %v788_v5 = vmul.f32 %v3243_v56, %v3243_v56  ;;  %v789_v0 = vmul.f32 %v3245_v57, %v3245_v57  ;;  %v886_v16 = vadd.f32 %v785_v7, %v784_v6  ;;  %v3400_v6 = vld [vmem:[%s5850_s0 + $0x110] sm:$0xff]  ;;  %v3405_v7 = vld [vmem:[%s5850_s0 + $0x118] sm:$0xff] }
  0x7f   :  { %v484_v42 = vpop.xlane.xlu1 %483  ;;  %v880_v43 = vadd.f32 %v781_v41, %v780_v40  ;;  %v3341_v41 = vld [vmem:[%s5850_s0 + $0xc0] sm:$0xff] }
  0x80   :  { %v633_v44 = vmul.f32 %v3208_v33, %v484_v42  ;;  %v478_v45 = vpop.xlane.xlu0 %477  ;;  %v892_v10 = vadd.f32 %v789_v0, %v788_v5  ;;  %v3346_v42 = vld [vmem:[%s5850_s0 + $0xc8] sm:$0xff] }
  0x81   :  { %v631_v50 = vmul.f32 %v3208_v33, %v478_v45  ;;  %881 = vadd.xlane.f32.xlu2 %v880_v43  ;;  %v490_v3 = vpop.xlane.xlu2 %489  ;;  %v509_v46 = vadd.f32 %v3346_v42, %v3341_v41 }
  0x82   :  { %v3233_v51 = vsub.f32 %v26_v8, %v633_v44  ;;  %v3235_v52 = vsub.f32 %v27_v9, %v633_v44  ;;  %v635_v1 = vmul.f32 %v3208_v33, %v490_v3  ;;  %v3273_v8 = vld [vmem:[%s5850_s0 + $0xa0] sm:$0xff]  ;;  %v3278_v9 = vld [vmem:[%s5850_s0 + $0xa8] sm:$0xff] }
  0x83   :  { %v3237_v53 = vsub.f32 %v22_v11, %v631_v50  ;;  %v3239_v54 = vsub.f32 %v23_v12, %v631_v50  ;;  %v503_v13 = vadd.f32 %v3278_v9, %v3273_v8 }
  0x84   :  { %v786_v58 = vmul.f32 %v3233_v51, %v3233_v51  ;;  %v787_v59 = vmul.f32 %v3235_v52, %v3235_v52  ;;  %v3281_v11 = vsub.f32 %v3163_v14, %v635_v1  ;;  %v3284_v12 = vsub.f32 %v3168_v15, %v635_v1  ;;  %v3297_v14 = vld [vmem:[%s5850_s0 + $0xd8] sm:$0xff] }
  0x85   :  { %v782_v62 = vmul.f32 %v3237_v53, %v3237_v53  ;;  %v783_v63 = vmul.f32 %v3239_v54, %v3239_v54  ;;  %v512_v29 = vadd.f32 %v3297_v14, %v3292_v23 }
  0x86   :  { %v889_v2 = vadd.f32 %v787_v59, %v786_v58  ;;  %v790_v15 = vmul.f32 %v3281_v11, %v3281_v11  ;;  %v791_v26 = vmul.f32 %v3284_v12, %v3284_v12  ;;  %v3371_v59 = vld [vmem:[%s5850_s0 + $0xf8] sm:$0xff] }
  0x87   :  { %v883_v4 = vadd.f32 %v783_v63, %v782_v62  ;;  %v496_v30 = vpop.xlane.xlu1 %495 }
  0x88   :  { %890 = vadd.xlane.f32.xlu1 %v889_v2  ;;  %v493_v17 = vpop.xlane.xlu0 %492  ;;  %v895_v34 = vadd.f32 %v791_v26, %v790_v15  ;;  %v637_v36 = vmul.f32 %v3208_v33, %v496_v30  ;;  %v2973_v15 = vld [vmem:[%s5851_s3 + $0x74] sm:$0xf0]  ;;  %v2952_v26 = vld [vmem:[%s5851_s3 + $0xf0] sm:$0xf] }
  0x89   :  { %501 = vadd.xlane.f32.xlu2 %v500_v55  ;;  %884 = vadd.xlane.f32.xlu0 %v883_v4  ;;  %v636_v22 = vmul.f32 %v3208_v33, %v493_v17  ;;  %v2989_v30 = vld [vmem:[%s5851_s3 + $0xf4] sm:$0xf0] }
  0x8a   :  { %v3351_v44 = vsub.f32 %v3175_v18, %v637_v36  ;;  %v3354_v45 = vsub.f32 %v3180_v19, %v637_v36  ;;  %v3366_v19 = vld [vmem:[%s5850_s0 + $0xf0] sm:$0xff]  ;;  %v2953_v36 = vor.u32 %v2989_v30, %v2952_v26 }
  0x8b   :  { %v3316_v31 = vsub.f32 %v3185_v20, %v636_v22  ;;  %v3319_v32 = vsub.f32 %v3190_v21, %v636_v22  ;;  %v3332_v20 = vld [vmem:[%s5850_s0 + $0xe8] sm:$0xff]  ;;  %v518_v3 = vadd.f32 %v3371_v59, %v3366_v19  ;;  %v2888_v22 = vld [vmem:[%s5851_s3 + $0x70] sm:$0xf]  ;;  %v2968_v30 = vld [vmem:[%s5851_s3 + $0x54] sm:$0xf] }
  0x8c   :  { %v515_v43 = vadd.f32 %v3332_v20, %v3327_v39  ;;  %v794_v58 = vmul.f32 %v3351_v44, %v3351_v44  ;;  %v795_v18 = vmul.f32 %v3354_v45, %v3354_v45  ;;  %2324 = vmatpush.bf16.msra.mxu1 %v2953_v36 }
  0x8d   :  { %v792_v21 = vmul.f32 %v3316_v31, %v3316_v31  ;;  %v793_v40 = vmul.f32 %v3319_v32, %v3319_v32 }
  0x8e   :  { %v901_v2 = vadd.f32 %v795_v18, %v794_v58  ;;  %v2987_v18 = vld [vmem:[%s5851_s3 + $0xe4] sm:$0xf0] }
  0x8f   :  { %v898_v49 = vadd.f32 %v793_v40, %v792_v21  ;;  %v499_v50 = vpop.xlane.xlu1 %498  ;;  %v2988_v40 = vld [vmem:[%s5851_s3 + $0xf4] sm:$0xf] }
  0x90   :  { %893 = vadd.xlane.f32.xlu1 %v892_v10  ;;  %v638_v55 = vmul.f32 %v3208_v33, %v499_v50  ;;  %v524_v10 = vadd.f32 %v3405_v7, %v3400_v6  ;;  %v2971_v50 = vld [vmem:[%s5851_s3 + $0x64] sm:$0xf0] }
  0x91   :  { %504 = vadd.xlane.f32.xlu2 %v503_v13  ;;  %887 = vadd.xlane.f32.xlu0 %v886_v16  ;;  %v3412_v13 = vld [vmem:[%s5850_s0 + $0x120] sm:$0xff]  ;;  %v3417_v16 = vld [vmem:[%s5850_s0 + $0x128] sm:$0xff] }
  0x92   :  { %v3374_v62 = vsub.f32 %v3199_v24, %v638_v55  ;;  %v3377_v63 = vsub.f32 %v3204_v25, %v638_v55  ;;  %v3388_v24 = vld [vmem:[%s5850_s0 + $0x100] sm:$0xff]  ;;  %v3393_v25 = vld [vmem:[%s5850_s0 + $0x108] sm:$0xff]  ;;  %v527_v17 = vadd.f32 %v3417_v16, %v3412_v13 }
  0x93   :  { %v521_v1 = vadd.f32 %v3393_v25, %v3388_v24  ;;  %v2944_v55 = vld [vmem:[%s5851_s3 + $0xe0] sm:$0xf] }
  0x94   :  { %5911 = vst [vmem:[#allocation2_spill] sm:$0xff] %v3374_v62  ;;  %v796_v4 = vmul.f32 %v3374_v62, %v3374_v62  ;;  %v797_v5 = vmul.f32 %v3377_v63, %v3377_v63 }
  0x95   :  { %5912 = vst [vmem:[#allocation3_spill] sm:$0xff] %v3377_v63 }
  0x96   :  { %v904_v0 = vadd.f32 %v797_v5, %v796_v4  ;;  %v2945_v4 = vor.u32 %v2987_v18, %v2944_v55  ;;  %v2966_v18 = vld [vmem:[%s5851_s3 + $0x44] sm:$0xf] }
  0x98   :  { %513 = vadd.xlane.f32.xlu1 %v512_v29  ;;  %v2889_v29 = vor.u32 %v2973_v15, %v2888_v22  ;;  %2325 = vmatpush.bf16.msra.mxu1 %v2945_v4  ;;  %v2969_v22 = vld [vmem:[%s5851_s3 + $0x54] sm:$0xf0]  ;;  %v2936_v15 = vld [vmem:[%s5851_s3 + $0xd0] sm:$0xf] }
  0x99   :  { %896 = vadd.xlane.f32.xlu2 %v895_v34  ;;  %507 = vadd.xlane.f32.xlu0 %v506_v35  ;;  %v2972_v34 = vld [vmem:[%s5851_s3 + $0x74] sm:$0xf]  ;;  %v2890_v35 = vld [vmem:[%s5851_s3 + $0x78] sm:$0xf0] }
  0x9a   :  { %v2893_v21 = vor.u32 %v2972_v34, %v2890_v35  ;;  %2190 = vmatpush.bf16.msra.mxu0 %v2889_v29  ;;  %v2985_v29 = vld [vmem:[%s5851_s3 + $0xd4] sm:$0xf0]  ;;  %v2874_v34 = vld [vmem:[%s5851_s3 + $0x58] sm:$0xf0] }
  0x9b   :  { %v2937_v35 = vor.u32 %v2985_v29, %v2936_v15  ;;  %v2877_v36 = vor.u32 %v2968_v30, %v2874_v34  ;;  %v2964_v29 = vld [vmem:[%s5851_s3 + $0x34] sm:$0xf]  ;;  %v2858_v30 = vld [vmem:[%s5851_s3 + $0x38] sm:$0xf0] }
  0x9c   :  { %2458 = vmatpush.bf16.msra.mxu2 %v2893_v21  ;;  %v2984_v21 = vld [vmem:[%s5851_s3 + $0xd4] sm:$0xf] }
  0x9d   :  { %2326 = vmatpush.bf16.msra.mxu1 %v2937_v35  ;;  %v2861_v35 = vor.u32 %v2964_v29, %v2858_v30  ;;  %v2960_v29 = vld [vmem:[%s5851_s3 + $0x14] sm:$0xf]  ;;  %v2842_v30 = vld [vmem:[%s5851_s3 + $0x18] sm:$0xf0] }
  0xa0   :  { %516 = vadd.xlane.f32.xlu1 %v515_v43  ;;  %v2954_v43 = vld [vmem:[%s5851_s3 + $0xf8] sm:$0xf0] }
  0xa1   :  { %510 = vadd.xlane.f32.xlu0 %v509_v46  ;;  %899 = vadd.xlane.f32.xlu2 %v898_v49  ;;  %v2957_v46 = vor.u32 %v2988_v40, %v2954_v43  ;;  %v2880_v49 = vld [vmem:[%s5851_s3 + $0x60] sm:$0xf]  ;;  %v2938_v40 = vld [vmem:[%s5851_s3 + $0xd8] sm:$0xf0] }
  0xa2   :  { %v2881_v58 = vor.u32 %v2971_v50, %v2880_v49  ;;  %v2941_v43 = vor.u32 %v2984_v21, %v2938_v40  ;;  %v2967_v49 = vld [vmem:[%s5851_s3 + $0x44] sm:$0xf0]  ;;  %v2928_v50 = vld [vmem:[%s5851_s3 + $0xc0] sm:$0xf]  ;;  %v2922_v21 = vld [vmem:[%s5851_s3 + $0xb8] sm:$0xf0] }
  0xa3   :  { %2592 = vmatpush.bf16.msra.mxu3 %v2957_v46  ;;  %v2864_v46 = vld [vmem:[%s5851_s3 + $0x40] sm:$0xf] }
  0xa4   :  { %2191 = vmatpush.bf16.msra.mxu0 %v2881_v58  ;;  %v2865_v55 = vor.u32 %v2967_v49, %v2864_v46  ;;  %v2983_v58 = vld [vmem:[%s5851_s3 + $0xc4] sm:$0xf0]  ;;  %v2912_v49 = vld [vmem:[%s5851_s3 + $0xa0] sm:$0xf] }
  0xa5   :  { %v2963_v46 = vld [vmem:[%s5851_s3 + $0x24] sm:$0xf0] }
  0xa9   :  { %902 = vadd.xlane.f32.xlu0 %v901_v2  ;;  %519 = vadd.xlane.f32.xlu2 %v518_v3  ;;  %v2970_v2 = vld [vmem:[%s5851_s3 + $0x64] sm:$0xf]  ;;  %v2882_v3 = vld [vmem:[%s5851_s3 + $0x68] sm:$0xf0] }
  0xaa   :  { %v2885_v5 = vor.u32 %v2970_v2, %v2882_v3  ;;  %v2866_v2 = vld [vmem:[%s5851_s3 + $0x48] sm:$0xf0]  ;;  %v2929_v3 = vor.u32 %v2983_v58, %v2928_v50  ;;  %v2962_v58 = vld [vmem:[%s5851_s3 + $0x24] sm:$0xf] }
  0xab   :  { %v2869_v4 = vor.u32 %v2966_v18, %v2866_v2  ;;  %v2850_v18 = vld [vmem:[%s5851_s3 + $0x28] sm:$0xf0] }
  0xac   :  { %2459 = vmatpush.bf16.msra.mxu2 %v2885_v5  ;;  %v2982_v5 = vld [vmem:[%s5851_s3 + $0xc4] sm:$0xf]  ;;  %2327 = vmatpush.bf16.msra.mxu1 %v2929_v3  ;;  %v2853_v3 = vor.u32 %v2962_v58, %v2850_v18  ;;  %v2896_v58 = vld [vmem:[%s5851_s3 + $0x80] sm:$0xf]  ;;  %v2975_v18 = vld [vmem:[%s5851_s3 + $0x84] sm:$0xf0] }
  0xb0   :  { %2460 = vmatpush.bf16.msra.mxu2 %v2877_v36  ;;  %v2980_v36 = vld [vmem:[%s5851_s3 + $0xb4] sm:$0xf] }
  0xb1   :  { %905 = vadd.xlane.f32.xlu0 %v904_v0  ;;  %522 = vadd.xlane.f32.xlu2 %v521_v1  ;;  %v2986_v0 = vld [vmem:[%s5851_s3 + $0xe4] sm:$0xf]  ;;  %v2946_v1 = vld [vmem:[%s5851_s3 + $0xe8] sm:$0xf0]  ;;  %v2925_v40 = vor.u32 %v2980_v36, %v2922_v21  ;;  %v2845_v36 = vor.u32 %v2960_v29, %v2842_v30  ;;  %v2976_v21 = vld [vmem:[%s5851_s3 + $0x94] sm:$0xf] }
  0xb4   :  { %2461 = vmatpush.bf16.msra.mxu2 %v2869_v4  ;;  %v2978_v4 = vld [vmem:[%s5851_s3 + $0xa4] sm:$0xf] }
  0xb8   :  { %2462 = vmatpush.bf16.msra.mxu2 %v2861_v35 }
  0xb9   :  { %525 = vadd.xlane.f32.xlu0 %v524_v10  ;;  %v2949_v10 = vor.u32 %v2986_v0, %v2946_v1  ;;  %v2930_v0 = vld [vmem:[%s5851_s3 + $0xc8] sm:$0xf0] }
  0xba   :  { %v2933_v1 = vor.u32 %v2982_v5, %v2930_v0  ;;  %v2914_v5 = vld [vmem:[%s5851_s3 + $0xa8] sm:$0xf0] }
  0xbb   :  { %2593 = vmatpush.bf16.msra.mxu3 %v2949_v10  ;;  %v2856_v10 = vld [vmem:[%s5851_s3 + $0x30] sm:$0xf]  ;;  %v2917_v0 = vor.u32 %v2978_v4, %v2914_v5  ;;  %v2834_v4 = vld [vmem:[%s5851_s3 + $0x8] sm:$0xf0]  ;;  %v2974_v5 = vld [vmem:[%s5851_s3 + $0x84] sm:$0xf] }
  0xbc   :  { %2463 = vmatpush.bf16.msra.mxu2 %v2853_v3  ;;  %v2897_v3 = vor.u32 %v2975_v18, %v2896_v58 }
  0xbf   :  { %2594 = vmatpush.bf16.msra.mxu3 %v2941_v43  ;;  %v2848_v43 = vld [vmem:[%s5851_s3 + $0x20] sm:$0xf] }
  0xc0   :  { %v2849_v50 = vor.u32 %v2963_v46, %v2848_v43  ;;  %2464 = vmatpush.bf16.msra.mxu2 %v2845_v36 }
  0xc1   :  { %528 = vadd.xlane.f32.xlu0 %v527_v17  ;;  %v2872_v17 = vld [vmem:[%s5851_s3 + $0x50] sm:$0xf] }
  0xc2   :  { %v2873_v26 = vor.u32 %v2969_v22, %v2872_v17  ;;  %v2965_v17 = vld [vmem:[%s5851_s3 + $0x34] sm:$0xf0]  ;;  %v2920_v22 = vld [vmem:[%s5851_s3 + $0xb0] sm:$0xf] }
  0xc3   :  { %2595 = vmatpush.bf16.msra.mxu3 %v2933_v1  ;;  %v2857_v15 = vor.u32 %v2965_v17, %v2856_v10  ;;  %v2840_v1 = vld [vmem:[%s5851_s3 + $0x10] sm:$0xf]  ;;  %v2961_v10 = vld [vmem:[%s5851_s3 + $0x14] sm:$0xf0] }
  0xc4   :  { %2192 = vmatpush.bf16.msra.mxu0 %v2873_v26  ;;  %v2981_v26 = vld [vmem:[%s5851_s3 + $0xb4] sm:$0xf0]  ;;  %v2904_v17 = vld [vmem:[%s5851_s3 + $0x90] sm:$0xf] }
  0xc5   :  { %v2921_v34 = vor.u32 %v2981_v26, %v2920_v22  ;;  %v2977_v26 = vld [vmem:[%s5851_s3 + $0x94] sm:$0xf0] }
  0xc6   :  { %v2905_v35 = vor.u32 %v2977_v26, %v2904_v17 }
  0xc7   :  { %2328 = vmatpush.bf16.msra.mxu1 %v2921_v34  ;;  %2596 = vmatpush.bf16.msra.mxu3 %v2925_v40  ;;  %v2906_v40 = vld [vmem:[%s5851_s3 + $0x98] sm:$0xf0] }
  0xc8   :  { %2193 = vmatpush.bf16.msra.mxu0 %v2865_v55  ;;  %v2979_v55 = vld [vmem:[%s5851_s3 + $0xa4] sm:$0xf0]  ;;  %v2909_v43 = vor.u32 %v2976_v21, %v2906_v40 }
  0xc9   :  { %v2913_v2 = vor.u32 %v2979_v55, %v2912_v49  ;;  %v2832_v49 = vld [vmem:[%s5851_s3] sm:$0xf] }
  0xcb   :  { %2329 = vmatpush.bf16.msra.mxu1 %v2913_v2  ;;  %2597 = vmatpush.bf16.msra.mxu3 %v2917_v0  ;;  %v2958_v2 = vld [vmem:[%s5851_s3 + $0x4] sm:$0xf]  ;;  %v2898_v0 = vld [vmem:[%s5851_s3 + $0x88] sm:$0xf0] }
  0xcc   :  { %2194 = vmatpush.bf16.msra.mxu0 %v2857_v15  ;;  %v2841_v15 = vor.u32 %v2961_v10, %v2840_v1  ;;  %v2837_v1 = vor.u32 %v2958_v2, %v2834_v4  ;;  %v2901_v10 = vor.u32 %v2974_v5, %v2898_v0 }
  0xce   :  { %2465 = vmatpush.bf16.msra.mxu2 %v2837_v1 }
  0xcf   :  { %2330 = vmatpush.bf16.msra.mxu1 %v2905_v35  ;;  %2598 = vmatpush.bf16.msra.mxu3 %v2909_v43 }
  0xd0   :  { %2195 = vmatpush.bf16.msra.mxu0 %v2849_v50  ;;  %v2959_v50 = vld [vmem:[%s5851_s3 + $0x4] sm:$0xf0] }
  0xd1   :  { %v2833_v55 = vor.u32 %v2959_v50, %v2832_v49 }
  0xd3   :  { %2331 = vmatpush.bf16.msra.mxu1 %v2897_v3  ;;  %2599 = vmatpush.bf16.msra.mxu3 %v2901_v10 }
  0xd4   :  { %2196 = vmatpush.bf16.msra.mxu0 %v2841_v15 }
  0xd8   :  { %2197 = vmatpush.bf16.msra.mxu0 %v2833_v55 }
  0xf4   :  { %v882_v22 = vpop.xlane.xlu2 %881 }
  0xf5   :  { %v1030_v34 = vmul.f32 %v882_v22, %v3208_v33 }
  0xf7   :  { %v3590_v46 = vadd.f32 1e-05, %v1030_v34 }
  0xf9   :  { %2993 = vrsqrt.f32 %v3590_v46  ;;  %vm1136_vm2 = vweird.f32 %v3590_v46 }
  0xfb   :  { %v891_v17 = vpop.xlane.xlu1 %890 }
  0xfc   :  { %v1033_v22 = vmul.f32 %v891_v17, %v3208_v33  ;;  %v502_v15 = vpop.xlane.xlu2 %501  ;;  %v885_v26 = vpop.xlane.xlu0 %884  ;;  %v1630_v17 = vld [vmem:[%s5852_s1] sm:$0x3] }
  0xfd   :  { %v639_v29 = vmul.f32 %v3208_v33, %v502_v15  ;;  %v1031_v30 = vmul.f32 %v885_v26, %v3208_v33 }
  0xfe   :  { %v3620_v34 = vadd.f32 1e-05, %v1033_v22 }
  0xff   :  { %v2994_v35 = vpop.eup %2993  ;;  %v3623_v36 = vsub.f32 %v3224_v47, %v639_v29  ;;  %v3626_v21 = vsub.f32 %v3229_v48, %v639_v29  ;;  %v3628_v40 = vadd.f32 1e-05, %v1031_v30 }
 0x100   :  { %v1131_v43 = vmul.f32 %v2994_v35, %v3590_v46  ;;  %2995 = vrsqrt.f32 %v3620_v34  ;;  %vm1137_vm1 = vweird.f32 %v2994_v35  ;;  %vm1166_vm6 = vweird.f32 %v3620_v34 }
 0x101   :  { %5913 = vst [vmem:[#allocation4_spill] sm:$0xff] %v3623_v36  ;;  %2997 = vrsqrt.f32 %v3628_v40  ;;  %v798_v49 = vmul.f32 %v3623_v36, %v3623_v36  ;;  %v799_v50 = vmul.f32 %v3626_v21, %v3626_v21  ;;  %vm1138_vm3 = vmor %vm1136_vm2, %vm1137_vm1  ;;  %vm1146_vm4 = vweird.f32 %v3628_v40 }
 0x102   :  { %5914 = vst [vmem:[#allocation5_spill] sm:$0xff] %v3626_v21  ;;  %v1132_v55 = vmul.f32 %v2994_v35, %v1131_v43 }
 0x103   :  { %v894_v47 = vpop.xlane.xlu1 %893  ;;  %v907_v58 = vadd.f32 %v799_v50, %v798_v49  ;;  %v1836_v49 = vld [vmem:[%s5853_s2] sm:$0x3] }
 0x104   :  { %v1133_v18 = vmul.f32 0.5, %v1132_v55  ;;  %v1034_v48 = vmul.f32 %v894_v47, %v3208_v33  ;;  %v505_v2 = vpop.xlane.xlu2 %504  ;;  %v888_v3 = vpop.xlane.xlu0 %887  ;;  %v3663_v47 = vperm.slane %v1630_v17, 0 }
 0x105   :  { %v640_v4 = vmul.f32 %v3208_v33, %v505_v2  ;;  %v1032_v5 = vmul.f32 %v888_v3, %v3208_v33  ;;  %908 = vadd.xlane.f32.xlu1 %v907_v58  ;;  %v3673_v2 = vperm.slane %v1630_v17, 1 }
 0x106   :  { %v3640_v0 = vpop.eup %2995  ;;  %v1134_v1 = vsub.f32 1.5, %v1133_v18  ;;  %v3642_v10 = vadd.f32 1e-05, %v1034_v48  ;;  %v3671_v48 = vperm.slane %v1836_v49, 0 }
 0x107   :  { %v2998_v22 = vpop.eup %2997  ;;  %v1161_v15 = vmul.f32 %v3640_v0, %v3620_v34  ;;  %v3650_v26 = vsub.f32 %v3273_v8, %v640_v4  ;;  %v3653_v29 = vsub.f32 %v3278_v9, %v640_v4  ;;  %v3659_v50 = vadd.f32 1e-05, %v1032_v5 }
 0x108   :  { %v1135_v30 = vmul.f32 %v2994_v35, %v1134_v1  ;;  %v1141_v43 = vmul.f32 %v2998_v22, %v3628_v40  ;;  %2999 = vrsqrt.f32 %v3642_v10  ;;  %vm1147_vm5 = vweird.f32 %v2998_v22 }
 0x109   :  { %5915 = vst [vmem:[#allocation6_spill] sm:$0xff] %v3650_v26  ;;  %v800_v55 = vmul.f32 %v3650_v26, %v3650_v26  ;;  %v801_v9 = vmul.f32 %v3653_v29, %v3653_v29  ;;  %v1162_v58 = vmul.f32 %v3640_v0, %v1161_v15  ;;  %3001 = vrsqrt.f32 %v3659_v50  ;;  %v3684_v15 = vld [vmem:[%s5850_s0 + $0x138] sm:$0xff]  ;;  %vm3708_vm7 = vmor %vm1146_vm4, %vm1147_vm5 }
 0x10a   :  { %5916 = vst [vmem:[#allocation7_spill] sm:$0xff] %v3653_v29  ;;  %v1142_v8 = vmul.f32 %v2998_v22, %v1141_v43  ;;  %v3679_v43 = vld [vmem:[%s5850_s0 + $0x130] sm:$0xff]  ;;  %v1139_v29 = vsel %vm1138_vm3, %v2994_v35, %v1135_v30  ;;  %v3695_v26 = vperm.slane %v1836_v49, 1  ;;  %vm1167_vm8 = vweird.f32 %v3640_v0 }
 0x10b   :  { %v514_v18 = vpop.xlane.xlu1 %513  ;;  %v910_v1 = vadd.f32 %v801_v9, %v800_v55  ;;  %5917 = vst [vmem:[#allocation8_spill] sm:$0xff] %v3679_v43  ;;  %v1163_v21 = vmul.f32 0.5, %v1162_v58  ;;  %v530_v35 = vadd.f32 %v3684_v15, %v3679_v43  ;;  %v1636_v30 = vmul.f32 %v3663_v47, %v1139_v29  ;;  %vm3797_vm12 = vmor %vm1166_vm6, %vm1167_vm8 }
 0x10c   :  { %v1143_v3 = vmul.f32 0.5, %v1142_v8  ;;  %v643_v4 = vmul.f32 %v3208_v33, %v514_v18  ;;  %v897_v46 = vpop.xlane.xlu2 %896  ;;  %v508_v5 = vpop.xlane.xlu0 %507  ;;  %5918 = vst [vmem:[#allocation9_spill] sm:$0xff] %v3684_v15  ;;  %vm1156_vm9 = vweird.f32 %v3659_v50  ;;  %vm1176_vm15 = vweird.f32 %v3642_v10 }
 0x10d   :  { %v1035_v17 = vmul.f32 %v897_v46, %v3208_v33  ;;  %v641_v8 = vmul.f32 %v3208_v33, %v508_v5  ;;  %911 = vadd.xlane.f32.xlu1 %v910_v1  ;;  %v1637_v5 = vmul.f32 %v3673_v2, %v1139_v29 }
 0x10e   :  { %v1144_v18 = vsub.f32 1.5, %v1143_v3  ;;  %v3690_v55 = vsub.f32 %v3292_v23, %v643_v4  ;;  %v3693_v9 = vsub.f32 %v3297_v14, %v643_v4  ;;  %v3702_v46 = vpop.eup %2999 }
 0x10f   :  { %v3697_v36 = vadd.f32 1e-05, %v1035_v17  ;;  %v3713_v49 = vsub.f32 %v3306_v27, %v641_v8  ;;  %v3716_v58 = vsub.f32 %v3311_v28, %v641_v8  ;;  %v3720_v4 = vpop.eup %3001  ;;  %v1164_v17 = vsub.f32 1.5, %v1163_v21 }
 0x110   :  { %5919 = vst [vmem:[#allocation10_spill] sm:$0xff] %v3690_v55  ;;  %v1145_v23 = vmul.f32 %v2998_v22, %v1144_v18  ;;  %v806_v3 = vmul.f32 %v3690_v55, %v3690_v55  ;;  %v807_v40 = vmul.f32 %v3693_v9, %v3693_v9  ;;  %v1151_v27 = vmul.f32 %v3720_v4, %v3659_v50 }
 0x111   :  { %5920 = vst [vmem:[#allocation11_spill] sm:$0xff] %v3693_v9  ;;  %3003 = vrsqrt.f32 %v3697_v36  ;;  %v802_v28 = vmul.f32 %v3713_v49, %v3713_v49  ;;  %v803_v1 = vmul.f32 %v3716_v58, %v3716_v58  ;;  %v1736_v9 = vmul.f32 %v1636_v30, %v3211_v37 }
 0x112   :  { %5923 = vst [vmem:[#allocation12_spill] sm:$0xff] %v3713_v49  ;;  %v919_v18 = vadd.f32 %v807_v40, %v806_v3  ;;  %v1149_v55 = vsel %vm3708_vm7, %v2998_v22, %v1145_v23  ;;  %v1152_v29 = vmul.f32 %v3720_v4, %v1151_v27  ;;  %v1737_v22 = vmul.f32 %v1637_v5, %v3213_v38  ;;  %v3753_v3 = vld [vmem:[%s5850_s0 + $0x140] sm:$0xff] }
 0x113   :  { %5924 = vst [vmem:[#allocation13_spill] sm:$0xff] %v3716_v58  ;;  %v517_v8 = vpop.xlane.xlu1 %516  ;;  %v913_v43 = vadd.f32 %v803_v1, %v802_v28  ;;  %v1638_v49 = vmul.f32 %v3663_v47, %v1149_v55  ;;  %v1171_v58 = vmul.f32 %v3702_v46, %v3642_v10  ;;  %v1639_v14 = vmul.f32 %v3673_v2, %v1149_v55 }
 0x114   :  { %v644_v63 = vmul.f32 %v3208_v33, %v517_v8  ;;  %v900_v62 = vpop.xlane.xlu2 %899  ;;  %v511_v15 = vpop.xlane.xlu0 %510  ;;  %920 = vadd.xlane.f32.xlu0 %v919_v18  ;;  %v1153_v37 = vmul.f32 0.5, %v1152_v29  ;;  %vm1157_vm10 = vweird.f32 %v3720_v4  ;;  %v1165_v27 = vmul.f32 %v3640_v0, %v1164_v17 }
 0x115   :  { %v642_v21 = vmul.f32 %v3208_v33, %v511_v15  ;;  %531 = vadd.xlane.f32.xlu1 %v530_v35  ;;  %914 = vadd.xlane.f32.xlu2 %v913_v43  ;;  %v1738_v23 = vmul.f32 %v1638_v49, %v3237_v53  ;;  %v3758_v15 = vld [vmem:[%s5850_s0 + $0x148] sm:$0xff]  ;;  %v1842_v43 = vadd.f32 %v3671_v48, %v1736_v9  ;;  %vm3781_vm11 = vmor %vm1156_vm9, %vm1157_vm10  ;;  %vm1186_vm13 = vweird.f32 %v3697_v36 }
 0x116   :  { %v3747_v30 = vsub.f32 %v3327_v39, %v644_v63  ;;  %v3763_v55 = vsub.f32 %v3332_v20, %v644_v63  ;;  %v1154_v35 = vsub.f32 1.5, %v1153_v37  ;;  %v1036_v40 = vmul.f32 %v900_v62, %v3208_v33 }
 0x117   :  { %v3760_v38 = vpop.eup %3003  ;;  %v3766_v39 = vsub.f32 %v3341_v41, %v642_v21  ;;  %v3769_v53 = vsub.f32 %v3346_v42, %v642_v21  ;;  %v1844_v5 = vadd.f32 %v3671_v48, %v1738_v23  ;;  %v1739_v41 = vmul.f32 %v1639_v14, %v3239_v54 }
 0x118   :  { %v1181_v49 = vmul.f32 %v3760_v38, %v3697_v36  ;;  %v1843_v42 = vadd.f32 %v3695_v26, %v1737_v22  ;;  %v533_v63 = vadd.f32 %v3758_v15, %v3753_v3  ;;  %v1155_v62 = vmul.f32 %v3720_v4, %v1154_v35 }
 0x119   :  { %v1942_v28 = vpack.c.bf16 %v1844_v5, %v1842_v43  ;;  %v808_v1 = vmul.f32 %v3747_v30, %v3747_v30  ;;  %v1845_v54 = vadd.f32 %v3695_v26, %v1739_v41  ;;  %v809_v17 = vmul.f32 %v3763_v55, %v3763_v55 }
 0x11a   :  { %v1182_v9 = vmul.f32 %v3760_v38, %v1181_v49  ;;  %v804_v8 = vmul.f32 %v3766_v39, %v3766_v39  ;;  %v805_v18 = vmul.f32 %v3769_v53, %v3769_v53  ;;  %v1172_v29 = vmul.f32 %v3702_v46, %v1171_v58 }
 0x11b   :  { %v3809_v21 = vadd.f32 1e-05, %v1036_v40  ;;  %2198 = vmatmul.bf16.vlgmr.msra.gmra.mxu0 %v1942_v28  ;;  %2466 = vmatmul.bf16.vlgmr.msra.gmra.mxu2 %v1942_v28  ;;  %v1159_v22 = vsel %vm3781_vm11, %v3720_v4, %v1155_v62  ;;  %v1943_v37 = vpack.c.bf16 %v1845_v54, %v1843_v42  ;;  %v922_v35 = vadd.f32 %v809_v17, %v808_v1  ;;  %v3848_v62 = vld [vmem:[%s5850_s0 + $0x150] sm:$0xff] }
 0x11c   :  { %v520_v34 = vpop.xlane.xlu2 %519  ;;  %v903_v14 = vpop.xlane.xlu0 %902  ;;  %v916_v49 = vadd.f32 %v805_v18, %v804_v8  ;;  %v1169_v58 = vsel %vm3797_vm12, %v3640_v0, %v1165_v27  ;;  %v1640_v40 = vmul.f32 %v3663_v47, %v1159_v22  ;;  %v1183_v5 = vmul.f32 0.5, %v1182_v9  ;;  %v3832_v0 = vld [vmem:[%s5850_s0 + $0x170] sm:$0xff]  ;;  %v3853_v9 = vld [vmem:[%s5850_s0 + $0x158] sm:$0xff] }
 0x11d   :  { %v645_v23 = vmul.f32 %v3208_v33, %v520_v34  ;;  %v1037_v43 = vmul.f32 %v903_v14, %v3208_v33  ;;  %534 = vadd.xlane.f32.xlu1 %v533_v63  ;;  %2332 = vmatmul.bf16.vlgmr.msra.gmra.mxu1 %v1943_v37  ;;  %3005 = vrsqrt.f32 %v3809_v21  ;;  %v1642_v27 = vmul.f32 %v3663_v47, %v1169_v58 }
 0x11e   :  { %2600 = vmatmul.bf16.vlgmr.msra.gmra.mxu3 %v1943_v37  ;;  %923 = vadd.xlane.f32.xlu0 %v922_v35  ;;  %v1173_v42 = vmul.f32 0.5, %v1172_v29  ;;  %v1740_v28 = vmul.f32 %v1640_v40, %v3252_v60  ;;  %v1641_v1 = vmul.f32 %v3673_v2, %v1159_v22  ;;  %v1184_v50 = vsub.f32 1.5, %v1183_v5 }
 0x11f   :  { %v3821_v20 = vsub.f32 %v3366_v19, %v645_v23  ;;  %v3824_v4 = vsub.f32 %v3371_v59, %v645_v23  ;;  %v3826_v41 = vadd.f32 1e-05, %v1037_v43  ;;  %917 = vadd.xlane.f32.xlu2 %v916_v49  ;;  %v3839_v19 = vld [vmem:[%s5850_s0 + $0x178] sm:$0xff]  ;;  %v1643_v17 = vmul.f32 %v3673_v2, %v1169_v58 }
 0x120   :  { %v542_v29 = vadd.f32 %v3839_v19, %v3832_v0  ;;  %v536_v34 = vadd.f32 %v3853_v9, %v3848_v62  ;;  %v1742_v14 = vmul.f32 %v1642_v27, %v3233_v51  ;;  %v1174_v60 = vsub.f32 1.5, %v1173_v42  ;;  %v3905_v42 = vld [vmem:[%s5850_s0 + $0x188] sm:$0xff] }
 0x121   :  { %3007 = vrsqrt.f32 %v3826_v41  ;;  %v810_v59 = vmul.f32 %v3821_v20, %v3821_v20  ;;  %v811_v63 = vmul.f32 %v3824_v4, %v3824_v4  ;;  %vm1187_vm14 = vweird.f32 %v3760_v38 }
 0x122   :  { %v1741_v37 = vmul.f32 %v1641_v1, %v3255_v61  ;;  %vm1177_vm0 = vweird.f32 %v3702_v46  ;;  %v1846_v43 = vadd.f32 %v3671_v48, %v1740_v28  ;;  %v1185_v51 = vmul.f32 %v3760_v38, %v1184_v50  ;;  %vm3886_vm1 = vmor %vm1186_vm13, %vm1187_vm14  ;;  %v3917_v28 = vld [vmem:[%s5850_s0 + $0x168] sm:$0xff] }
 0x123   :  { %v925_v54 = vadd.f32 %v811_v63, %v810_v59  ;;  %v3869_v23 = vpop.eup %3005  ;;  %v1743_v61 = vmul.f32 %v1643_v17, %v3235_v52  ;;  %v1848_v27 = vadd.f32 %v3671_v48, %v1742_v14  ;;  %v1175_v52 = vmul.f32 %v3702_v46, %v1174_v60  ;;  %v3912_v63 = vld [vmem:[%s5850_s0 + $0x160] sm:$0xff]  ;;  %vm1178_vm2 = vmor %vm1176_vm15, %vm1177_vm0 }
 0x124   :  { %v523_v8 = vpop.xlane.xlu2 %522  ;;  %v3859_v18 = vpop.xlane.xlu0 %905  ;;  %v1847_v36 = vadd.f32 %v3695_v26, %v1741_v37  ;;  %v539_v14 = vadd.f32 %v3917_v28, %v3912_v63  ;;  %vm1206_vm3 = vweird.f32 %v3826_v41  ;;  %vm1196_vm5 = vweird.f32 %v3809_v21 }
 0x125   :  { %v646_v22 = vmul.f32 %v3208_v33, %v523_v8  ;;  %926 = vadd.xlane.f32.xlu1 %v925_v54  ;;  %v1944_v1 = vpack.c.bf16 %v1848_v27, %v1846_v43  ;;  %v1849_v17 = vadd.f32 %v3695_v26, %v1743_v61  ;;  %v1189_v8 = vsel %vm3886_vm1, %v3760_v38, %v1185_v51 }
 0x126   :  { %543 = vadd.xlane.f32.xlu0 %v542_v29  ;;  %v1179_v43 = vsel %vm1178_vm2, %v3702_v46, %v1175_v52  ;;  %v1646_v38 = vmul.f32 %v3663_v47, %v1189_v8  ;;  %v3952_v46 = vld [vmem:[%s5850_s0 + $0x198] sm:$0xff]  ;;  %vm1197_vm6 = vweird.f32 %v3869_v23 }
 0x127   :  { %v3874_v35 = vpop.eup %3007  ;;  %v3878_v49 = vsub.f32 %v3388_v24, %v646_v22  ;;  %v3881_v58 = vsub.f32 %v3393_v25, %v646_v22  ;;  %537 = vadd.xlane.f32.xlu2 %v536_v34  ;;  %v3896_v24 = vld [vmem:[%s5850_s0 + $0x180] sm:$0xff]  ;;  %v1191_v25 = vmul.f32 %v3869_v23, %v3809_v21  ;;  %v1945_v22 = vpack.c.bf16 %v1849_v17, %v1847_v36  ;;  %vm1198_vm8 = vmor %vm1196_vm5, %vm1197_vm6 }
 0x128   :  { %v1201_v5 = vmul.f32 %v3874_v35, %v3826_v41  ;;  %v545_v34 = vadd.f32 %v3905_v42, %v3896_v24  ;;  %v1644_v27 = vmul.f32 %v3663_v47, %v1179_v43  ;;  %vm1207_vm4 = vweird.f32 %v3874_v35 }
 0x129   :  { %5929 = vst [vmem:[#allocation14_spill] sm:$0xff] %v3881_v58  ;;  %v812_v59 = vmul.f32 %v3878_v49, %v3878_v49  ;;  %v813_v50 = vmul.f32 %v3881_v58, %v3881_v58  ;;  %v1192_v60 = vmul.f32 %v3869_v23, %v1191_v25  ;;  %v1647_v25 = vmul.f32 %v3673_v2, %v1189_v8  ;;  %vm1208_vm7 = vmor %vm1206_vm3, %vm1207_vm4  ;;  %v5958_v58 = vld [vmem:[#allocation13_spill] sm:$0xff] }
 0x12a   :  { %v1202_v54 = vmul.f32 %v3874_v35, %v1201_v5  ;;  %v3947_v5 = vld [vmem:[%s5850_s0 + $0x190] sm:$0xff] }
 0x12b   :  { %2203 = vmatmul.bf16.gmra.mxu0 %v1944_v1  ;;  %2471 = vmatmul.bf16.gmra.mxu2 %v1944_v1  ;;  %v928_v10 = vadd.f32 %v813_v50, %v812_v59  ;;  %v1193_v52 = vmul.f32 0.5, %v1192_v60  ;;  %v548_v36 = vadd.f32 %v3952_v46, %v3947_v5  ;;  %v1746_v59 = vmul.f32 %v1646_v38, %v3281_v11 }
 0x12c   :  { %v526_v29 = vpop.xlane.xlu0 %525  ;;  %v1203_v51 = vmul.f32 0.5, %v1202_v54  ;;  %v1645_v50 = vmul.f32 %v3673_v2, %v1179_v43  ;;  %v1747_v8 = vmul.f32 %v1647_v25, %v3284_v12  ;;  %v3983_v12 = vld [vmem:[%s5850_s0 + $0x1a0] sm:$0xff] }
 0x12d   :  { %v647_v37 = vmul.f32 %v3208_v33, %v526_v29  ;;  %929 = vadd.xlane.f32.xlu1 %v928_v10  ;;  %2337 = vmatmul.bf16.gmra.mxu1 %v1945_v22  ;;  %v1744_v29 = vmul.f32 %v1644_v27, %v3243_v56  ;;  %v1852_v11 = vadd.f32 %v3671_v48, %v1746_v59  ;;  %v4013_v59 = vld [vmem:[%s5850_s0 + $0x1b0] sm:$0xff] }
 0x12e   :  { %2605 = vmatmul.bf16.gmra.mxu3 %v1945_v22  ;;  %546 = vadd.xlane.f32.xlu0 %v545_v34  ;;  %v1204_v1 = vsub.f32 1.5, %v1203_v51  ;;  %v1194_v34 = vsub.f32 1.5, %v1193_v52  ;;  %v1745_v22 = vmul.f32 %v1645_v50, %v3245_v57  ;;  %v1853_v57 = vadd.f32 %v3695_v26, %v1747_v8 }
 0x12f   :  { %v3939_v61 = vsub.f32 %v3400_v6, %v647_v37  ;;  %v3942_v40 = vsub.f32 %v3405_v7, %v647_v37  ;;  %540 = vadd.xlane.f32.xlu2 %v539_v14  ;;  %v3988_v37 = vld [vmem:[%s5850_s0 + $0x1a8] sm:$0xff] }
 0x130   :  { %v1205_v14 = vmul.f32 %v3874_v35, %v1204_v1  ;;  %v551_v51 = vadd.f32 %v3988_v37, %v3983_v12  ;;  %v1851_v27 = vadd.f32 %v3695_v26, %v1745_v22 }
 0x131   :  { %5932 = vst [vmem:[#allocation15_spill] sm:$0xff] %v3942_v40  ;;  %v814_v6 = vmul.f32 %v3939_v61, %v3939_v61  ;;  %v815_v7 = vmul.f32 %v3942_v40, %v3942_v40 }
 0x132   :  { %v1209_v52 = vsel %vm1208_vm7, %v3874_v35, %v1205_v14  ;;  %v4018_v35 = vld [vmem:[%s5850_s0 + $0x1b8] sm:$0xff] }
 0x133   :  { %v931_v17 = vadd.f32 %v815_v7, %v814_v6  ;;  %v1947_v7 = vpack.c.bf16 %v1853_v57, %v1851_v27 }
 0x134   :  { %v529_v54 = vpop.xlane.xlu0 %528 }
 0x135   :  { %v648_v10 = vmul.f32 %v3208_v33, %v529_v54  ;;  %549 = vadd.xlane.f32.xlu1 %v548_v36  ;;  %v1650_v36 = vmul.f32 %v3663_v47, %v1209_v52  ;;  %v554_v54 = vadd.f32 %v4018_v35, %v4013_v59 }
 0x137   :  { %v3974_v60 = vsub.f32 %v3412_v13, %v648_v10  ;;  %v3977_v56 = vsub.f32 %v3417_v16, %v648_v10  ;;  %932 = vadd.xlane.f32.xlu2 %v931_v17  ;;  %v1850_v13 = vadd.f32 %v3671_v48, %v1744_v29  ;;  %v1195_v16 = vmul.f32 %v3869_v23, %v1194_v34 }
 0x138   :  { %v1750_v1 = vmul.f32 %v1650_v36, %v3351_v44  ;;  %v4034_v44 = vld [vmem:[%s5850_s0 + $0x1c0] sm:$0xff] }
 0x139   :  { %5933 = vst [vmem:[#allocation16_spill] sm:$0xff] %v3974_v60  ;;  %v816_v43 = vmul.f32 %v3974_v60, %v3974_v60  ;;  %v817_v38 = vmul.f32 %v3977_v56, %v3977_v56  ;;  %v1946_v41 = vpack.c.bf16 %v1852_v11, %v1850_v13  ;;  %v1199_v25 = vsel %vm1198_vm8, %v3869_v23, %v1195_v16 }
 0x13a   :  { %5934 = vst [vmem:[#allocation17_spill] sm:$0xff] %v3977_v56  ;;  %v1648_v21 = vmul.f32 %v3663_v47, %v1199_v25  ;;  %v1651_v23 = vmul.f32 %v3673_v2, %v1209_v52  ;;  %v1649_v50 = vmul.f32 %v3673_v2, %v1199_v25  ;;  %v1856_v34 = vadd.f32 %v3671_v48, %v1750_v1 }
 0x13b   :  { %2208 = vmatmul.bf16.gmra.mxu0 %v1946_v41  ;;  %2476 = vmatmul.bf16.gmra.mxu2 %v1946_v41  ;;  %v934_v6 = vadd.f32 %v817_v38, %v816_v43  ;;  %v1038_v13 = vmul.f32 %v3859_v18, %v3208_v33 }
 0x13c   :  { %v1748_v17 = vmul.f32 %v1648_v21, %v3316_v31  ;;  %v1751_v29 = vmul.f32 %v1651_v23, %v3354_v45  ;;  %v1749_v10 = vmul.f32 %v1649_v50, %v3319_v32  ;;  %v4039_v31 = vld [vmem:[%s5850_s0 + $0x1c8] sm:$0xff] }
 0x13d   :  { %552 = vadd.xlane.f32.xlu1 %v551_v51  ;;  %2342 = vmatmul.bf16.gmra.mxu1 %v1947_v7  ;;  %v557_v32 = vadd.f32 %v4039_v31, %v4034_v44  ;;  %v1088_v16 = vadd.f32 1e-05, %v1038_v13 }
 0x13e   :  { %2610 = vmatmul.bf16.gmra.mxu3 %v1947_v7  ;;  %v1854_v8 = vadd.f32 %v3671_v48, %v1748_v17  ;;  %v1857_v11 = vadd.f32 %v3695_v26, %v1751_v29  ;;  %v1855_v14 = vadd.f32 %v3695_v26, %v1749_v10 }
 0x13f   :  { %935 = vadd.xlane.f32.xlu2 %v934_v6  ;;  %3009 = vrsqrt.f32 %v1088_v16  ;;  %vm1216_vm9 = vweird.f32 %v1088_v16 }
 0x140   :  { %v1948_v45 = vpack.c.bf16 %v1856_v34, %v1854_v8  ;;  %v1949_v22 = vpack.c.bf16 %v1857_v11, %v1855_v14 }
 0x145   :  { %v3010_v57 = vpop.eup %3009 }
 0x146   :  { %v1211_v43 = vmul.f32 %v3010_v57, %v1088_v16  ;;  %vm1217_vm10 = vweird.f32 %v3010_v57  ;;  %v5935_v16 = vld [vmem:[#allocation8_spill] sm:$0xff] }
 0x147   :  { %555 = vadd.xlane.f32.xlu2 %v554_v54  ;;  %vm1218_vm11 = vmor %vm1216_vm9, %vm1217_vm10 }
 0x148   :  { %v1212_v38 = vmul.f32 %v3010_v57, %v1211_v43 }
 0x14a   :  { %v1213_v52 = vmul.f32 0.5, %v1212_v38 }
 0x14b   :  { %2213 = vmatmul.bf16.gmra.mxu0 %v1948_v45  ;;  %2481 = vmatmul.bf16.gmra.mxu2 %v1948_v45 }
 0x14c   :  { %v1214_v6 = vsub.f32 1.5, %v1213_v52 }
 0x14d   :  { %2347 = vmatmul.bf16.gmra.mxu1 %v1949_v22 }
 0x14e   :  { %2615 = vmatmul.bf16.gmra.mxu3 %v1949_v22  ;;  %v1215_v21 = vmul.f32 %v3010_v57, %v1214_v6 }
 0x14f   :  { %558 = vadd.xlane.f32.xlu2 %v557_v32 }
 0x150   :  { %v1219_v17 = vsel %vm1218_vm11, %v3010_v57, %v1215_v21  ;;  %v5937_v57 = vld [vmem:[#allocation9_spill] sm:$0xff] }
 0x151   :  { %v1652_v32 = vmul.f32 %v3663_v47, %v1219_v17  ;;  %v1653_v52 = vmul.f32 %v3673_v2, %v1219_v17 }
 0x178   :  { %v909_v41 = vpop.xlane.xlu1 %908 }
 0x179   :  { %v1039_v51 = vmul.f32 %v909_v41, %v3208_v33 }
 0x17b   :  { %v1089_v27 = vadd.f32 1e-05, %v1039_v51 }
 0x17d   :  { %3011 = vrsqrt.f32 %v1089_v27  ;;  %vm1226_vm13 = vweird.f32 %v1089_v27 }
 0x180   :  { %v912_v7 = vpop.xlane.xlu1 %911 }
 0x181   :  { %v1040_v25 = vmul.f32 %v912_v7, %v3208_v33 }
 0x183   :  { %v3012_v36 = vpop.eup %3011  ;;  %v4048_v23 = vadd.f32 1e-05, %v1040_v25 }
 0x184   :  { %v1221_v18 = vmul.f32 %v3012_v36, %v1089_v27  ;;  %vm1227_vm12 = vweird.f32 %v3012_v36 }
 0x185   :  { %3013 = vrsqrt.f32 %v4048_v23  ;;  %vm1228_vm14 = vmor %vm1226_vm13, %vm1227_vm12  ;;  %vm1236_vm2 = vweird.f32 %v4048_v23 }
 0x186   :  { %v1222_v1 = vmul.f32 %v3012_v36, %v1221_v18  ;;  %v5939_v18 = vld [vmem:[#allocation2_spill] sm:$0xff] }
 0x187   :  { %v921_v54 = vpop.xlane.xlu0 %920 }
 0x188   :  { %v1223_v50 = vmul.f32 0.5, %v1222_v1  ;;  %v532_v29 = vpop.xlane.xlu1 %531  ;;  %v915_v34 = vpop.xlane.xlu2 %914  ;;  %v1043_v10 = vmul.f32 %v921_v54, %v3208_v33  ;;  %v1752_v1 = vmul.f32 %v1652_v32, %v5939_v18  ;;  %v2024_v32 = vld [vmem:[%s5854_s4] sm:$0x3] }
 0x189   :  { %v649_v11 = vmul.f32 %v3208_v33, %v532_v29  ;;  %v1041_v45 = vmul.f32 %v915_v34, %v3208_v33  ;;  %v5940_v29 = vld [vmem:[#allocation3_spill] sm:$0xff] }
 0x18a   :  { %v1224_v8 = vsub.f32 1.5, %v1223_v50  ;;  %v4054_v14 = vadd.f32 1e-05, %v1043_v10  ;;  %v1753_v34 = vmul.f32 %v1653_v52, %v5940_v29 }
 0x18b   :  { %v4057_v22 = vpop.eup %3013  ;;  %v4060_v43 = vsub.f32 %v5935_v16, %v649_v11  ;;  %v4063_v38 = vsub.f32 %v5937_v57, %v649_v11  ;;  %v4065_v41 = vadd.f32 1e-05, %v1041_v45  ;;  %v5941_v11 = vld [vmem:[#allocation4_spill] sm:$0xff]  ;;  %v5942_v16 = vld [vmem:[#allocation5_spill] sm:$0xff] }
 0x18c   :  { %v1225_v13 = vmul.f32 %v3012_v36, %v1224_v8  ;;  %v1231_v51 = vmul.f32 %v4057_v22, %v4048_v23  ;;  %v1859_v18 = vadd.f32 %v3695_v26, %v1753_v34  ;;  %vm1237_vm15 = vweird.f32 %v4057_v22 }
 0x18d   :  { %5936 = vst [vmem:[#allocation8_spill] sm:$0xff] %v4060_v43  ;;  %3015 = vrsqrt.f32 %v4065_v41  ;;  %v818_v6 = vmul.f32 %v4060_v43, %v4060_v43  ;;  %v819_v7 = vmul.f32 %v4063_v38, %v4063_v38  ;;  %vm1246_vm0 = vweird.f32 %v4065_v41  ;;  %vm1238_vm3 = vmor %vm1236_vm2, %vm1237_vm15 }
 0x18e   :  { %5938 = vst [vmem:[#allocation9_spill] sm:$0xff] %v4063_v38  ;;  %v1232_v25 = vmul.f32 %v4057_v22, %v1231_v51  ;;  %v1229_v21 = vsel %vm1228_vm14, %v3012_v36, %v1225_v13  ;;  %3017 = vrsqrt.f32 %v4054_v14  ;;  %vm1266_vm7 = vweird.f32 %v4054_v14 }
 0x18f   :  { %v937_v27 = vadd.f32 %v819_v7, %v818_v6  ;;  %v1654_v50 = vmul.f32 %v3663_v47, %v1229_v21  ;;  %v1655_v54 = vmul.f32 %v3673_v2, %v1229_v21  ;;  %v1858_v7 = vadd.f32 %v3671_v48, %v1752_v1 }
 0x190   :  { %v535_v17 = vpop.xlane.xlu1 %534  ;;  %v1233_v10 = vmul.f32 0.5, %v1232_v25 }
 0x191   :  { %v650_v8 = vmul.f32 %v3208_v33, %v535_v17  ;;  %938 = vadd.xlane.f32.xlu0 %v937_v27  ;;  %v1754_v45 = vmul.f32 %v1654_v50, %v5941_v11  ;;  %v1755_v36 = vmul.f32 %v1655_v54, %v5942_v16  ;;  %v924_v57 = vpop.xlane.xlu0 %923  ;;  %v4100_v27 = vperm.slane %v2024_v32, 0 }
 0x192   :  { %v918_v13 = vpop.xlane.xlu2 %917  ;;  %v1234_v54 = vsub.f32 1.5, %v1233_v10 }
 0x193   :  { %v4087_v51 = vpop.eup %3015  ;;  %v4090_v6 = vsub.f32 %v3753_v3, %v650_v8  ;;  %v4093_v52 = vsub.f32 %v3758_v15, %v650_v8  ;;  %v1042_v21 = vmul.f32 %v918_v13, %v3208_v33  ;;  %v1044_v3 = vmul.f32 %v924_v57, %v3208_v33 }
 0x194   :  { %v1241_v25 = vmul.f32 %v4087_v51, %v4065_v41  ;;  %v4102_v50 = vpop.eup %3017  ;;  %v1860_v17 = vadd.f32 %v3671_v48, %v1754_v45  ;;  %v1861_v15 = vadd.f32 %v3695_v26, %v1755_v36  ;;  %vm1247_vm1 = vweird.f32 %v4087_v51 }
 0x195   :  { %5943 = vst [vmem:[#allocation2_spill] sm:$0xff] %v4090_v6  ;;  %v4108_v29 = vadd.f32 1e-05, %v1042_v21  ;;  %v820_v8 = vmul.f32 %v4090_v6, %v4090_v6  ;;  %v821_v34 = vmul.f32 %v4093_v52, %v4093_v52  ;;  %v1261_v10 = vmul.f32 %v4102_v50, %v4054_v14  ;;  %vm4159_vm4 = vmor %vm1246_vm0, %vm1247_vm1  ;;  %v4334_v14 = vld [vmem:[%s5850_s0 + $0x218] sm:$0xff] }
 0x196   :  { %5944 = vst [vmem:[#allocation3_spill] sm:$0xff] %v4093_v52  ;;  %v1242_v1 = vmul.f32 %v4087_v51, %v1241_v25  ;;  %v1950_v11 = vpack.c.bf16 %v1860_v17, %v1858_v7  ;;  %v1951_v16 = vpack.c.bf16 %v1861_v15, %v1859_v18  ;;  %v4119_v25 = vadd.f32 1e-05, %v1044_v3 }
 0x197   :  { %3019 = vrsqrt.f32 %v4108_v29  ;;  %v940_v57 = vadd.f32 %v821_v34, %v820_v8  ;;  %v1235_v21 = vmul.f32 %v4057_v22, %v1234_v54  ;;  %v4124_v8 = vperm.slane %v2024_v32, 1  ;;  %v4134_v54 = vld [vmem:[%s5850_s0 + $0x1d0] sm:$0xff]  ;;  %v4139_v32 = vld [vmem:[%s5850_s0 + $0x1d8] sm:$0xff] }
 0x198   :  { %v1243_v13 = vmul.f32 0.5, %v1242_v1  ;;  %v927_v45 = vpop.xlane.xlu1 %926  ;;  %v2199_v36 = vpop.f32.mrf.mxu0  ;;  %2218 = vmatmul.bf16.gmra.mxu0 %v1950_v11  ;;  %2352 = vmatmul.bf16.gmra.mxu1 %v1951_v16  ;;  %5945 = vst [vmem:[#allocation4_spill] sm:$0xff] %v4134_v54  ;;  %3021 = vrsqrt.f32 %v4119_v25  ;;  %vm1256_vm5 = vweird.f32 %v4108_v29  ;;  %vm1267_vm8 = vweird.f32 %v4102_v50 }
 0x199   :  { %v1045_v7 = vmul.f32 %v927_v45, %v3208_v33  ;;  %2486 = vmatmul.bf16.gmra.mxu2 %v1950_v11  ;;  %2620 = vmatmul.bf16.gmra.mxu3 %v1951_v16  ;;  %v2200_v17 = vadd.f32 %v2199_v36, %v4100_v27  ;;  %v544_v1 = vpop.xlane.xlu0 %543  ;;  %5946 = vst [vmem:[#allocation5_spill] sm:$0xff] %v4139_v32  ;;  %vm1276_vm9 = vweird.f32 %v4119_v25  ;;  %vm4318_vm11 = vmor %vm1266_vm7, %vm1267_vm8 }
 0x19a   :  { %v1244_v18 = vsub.f32 1.5, %v1243_v13  ;;  %v538_v15 = vpop.xlane.xlu2 %537  ;;  %v2333_v3 = vpop.f32.mrf.mxu1  ;;  %v653_v45 = vmul.f32 %v3208_v33, %v544_v1  ;;  %941 = vadd.xlane.f32.xlu0 %v940_v57  ;;  %v1262_v11 = vmul.f32 %v4102_v50, %v1261_v10  ;;  %v1239_v10 = vsel %vm1238_vm3, %v4057_v22, %v1235_v21 }
 0x19b   :  { %v4127_v34 = vadd.f32 1e-05, %v1045_v7  ;;  %v651_v52 = vmul.f32 %v3208_v33, %v538_v15  ;;  %v2334_v16 = vadd.f32 %v2333_v3, %v2200_v17  ;;  %v1656_v43 = vmul.f32 %v3663_v47, %v1239_v10 }
 0x19c   :  { %v1245_v13 = vmul.f32 %v4087_v51, %v1244_v18  ;;  %v4176_v18 = vsub.f32 %v3839_v19, %v653_v45 }
 0x19d   :  { %v4148_v36 = vsub.f32 %v3848_v62, %v651_v52  ;;  %v4151_v57 = vsub.f32 %v3853_v9, %v651_v52  ;;  %v4153_v7 = vpop.eup %3019  ;;  %3023 = vrsqrt.f32 %v4127_v34  ;;  %2726 = vst [vmem:[%s5855_s5] sm:$0xff] %v2334_v16  ;;  %v4168_v62 = vsub.f32 %v3832_v0, %v653_v45 }
 0x19e   :  { %v2467_v9 = vpop.f32.mrf.mxu2  ;;  %v560_v52 = vadd.f32 %v4139_v32, %v4134_v54  ;;  %v1251_v41 = vmul.f32 %v4153_v7, %v4108_v29  ;;  %5952 = vst [vmem:[#allocation21_spill] sm:$0xff] %v4176_v18  ;;  %v4183_v16 = vmul.f32 0.5, %v1262_v11  ;;  %v1249_v19 = vsel %vm4159_vm4, %v4087_v51, %v1245_v13  ;;  %v4194_v11 = vld [vmem:[%s5850_s0 + $0x1e0] sm:$0xff]  ;;  %v4201_v23 = vpop.eup %3021  ;;  %v4312_v29 = vld [vmem:[%s5850_s0 + $0x1f8] sm:$0xff] }
 0x19f   :  { %5947 = vst [vmem:[#allocation18_spill] sm:$0xff] %v4148_v36  ;;  %v2468_v17 = vadd.f32 %v2467_v9, %v4124_v8  ;;  %v822_v15 = vmul.f32 %v4148_v36, %v4148_v36  ;;  %v823_v3 = vmul.f32 %v4151_v57, %v4151_v57  ;;  %vm1257_vm6 = vweird.f32 %v4153_v7 }
 0x1a0   :  { %5948 = vst [vmem:[#allocation19_spill] sm:$0xff] %v4151_v57  ;;  %v930_v1 = vpop.xlane.xlu1 %929  ;;  %v2201_v0 = vpop.f32.mrf.mxu0  ;;  %v1252_v21 = vmul.f32 %v4153_v7, %v1251_v41  ;;  %v826_v41 = vmul.f32 %v4168_v62, %v4168_v62  ;;  %vm4297_vm10 = vmor %vm1256_vm5, %vm1257_vm6  ;;  %vm1277_vm12 = vweird.f32 %v4201_v23  ;;  %vm1286_vm13 = vweird.f32 %v4127_v34 }
 0x1a1   :  { %5951 = vst [vmem:[#allocation20_spill] sm:$0xff] %v4168_v62  ;;  %v2601_v6 = vpop.f32.mrf.mxu3  ;;  %v2202_v22 = vadd.f32 %v2201_v0, %v4100_v27  ;;  %v547_v38 = vpop.xlane.xlu0 %546  ;;  %v943_v36 = vadd.f32 %v823_v3, %v822_v15  ;;  %v4199_v0 = vld [vmem:[%s5850_s0 + $0x1e8] sm:$0xff]  ;;  %v1046_v51 = vmul.f32 %v930_v1, %v3208_v33  ;;  %v1658_v1 = vmul.f32 %v3663_v47, %v1249_v19  ;;  %vm4386_vm15 = vmor %vm1276_vm9, %vm1277_vm12 }
 0x1a2   :  { %v2602_v45 = vadd.f32 %v2601_v6, %v2468_v17  ;;  %v541_v9 = vpop.xlane.xlu2 %540  ;;  %5953 = vst [vmem:[#allocation22_spill] sm:$0xff] %v4194_v11  ;;  %v2335_v6 = vpop.f32.mrf.mxu1  ;;  %561 = vadd.xlane.f32.xlu0 %v560_v52  ;;  %v827_v17 = vmul.f32 %v4176_v18, %v4176_v18  ;;  %v654_v57 = vmul.f32 %v3208_v33, %v547_v38  ;;  %v1253_v18 = vmul.f32 0.5, %v1252_v21 }
 0x1a3   :  { %5954 = vst [vmem:[#allocation23_spill] sm:$0xff] %v4199_v0  ;;  %v652_v13 = vmul.f32 %v3208_v33, %v541_v9  ;;  %v4209_v15 = vpop.eup %3023  ;;  %v2336_v3 = vadd.f32 %v2335_v6, %v2202_v22  ;;  %944 = vadd.xlane.f32.xlu1 %v943_v36  ;;  %v1657_v9 = vmul.f32 %v3673_v2, %v1239_v10  ;;  %v5955_v36 = vld [vmem:[#allocation6_spill] sm:$0xff]  ;;  %v4230_v10 = vadd.f32 1e-05, %v1046_v51 }
 0x1a4   :  { %2727 = vst [vmem:[%s5855_s5 + $0x8] sm:$0xff] %v2602_v45  ;;  %v563_v62 = vadd.f32 %v4199_v0, %v4194_v11  ;;  %v1271_v22 = vmul.f32 %v4201_v23, %v4119_v25  ;;  %v1756_v45 = vmul.f32 %v1656_v43, %v5955_v36  ;;  %v949_v6 = vadd.f32 %v827_v17, %v826_v41  ;;  %v5956_v36 = vld [vmem:[#allocation12_spill] sm:$0xff]  ;;  %v5957_v41 = vld [vmem:[#allocation7_spill] sm:$0xff] }
 0x1a5   :  { %2728 = vst [vmem:[%s5855_s5 + $0x10] sm:$0xff] %v2336_v3  ;;  %v4233_v21 = vsub.f32 %v3912_v63, %v652_v13  ;;  %v1281_v0 = vmul.f32 %v4209_v15, %v4127_v34  ;;  %v4239_v3 = vsub.f32 %v3917_v28, %v652_v13  ;;  %v4242_v43 = vsub.f32 %v3896_v24, %v654_v57  ;;  %v4435_v34 = vld [vmem:[%s5850_s0 + $0x230] sm:$0xff] }
 0x1a6   :  { %v2469_v38 = vpop.f32.mrf.mxu2  ;;  %v1758_v11 = vmul.f32 %v1658_v1, %v5956_v36  ;;  %950 = vadd.xlane.f32.xlu2 %v949_v6  ;;  %v1659_v63 = vmul.f32 %v3673_v2, %v1249_v19  ;;  %v1757_v17 = vmul.f32 %v1657_v9, %v5957_v41  ;;  %v4250_v28 = vsub.f32 %v3905_v42, %v654_v57 }
 0x1a7   :  { %v2470_v52 = vadd.f32 %v2469_v38, %v4124_v8  ;;  %v1862_v24 = vadd.f32 %v3671_v48, %v1756_v45  ;;  %v1254_v54 = vsub.f32 1.5, %v1253_v18  ;;  %v1272_v6 = vmul.f32 %v4201_v23, %v1271_v22 }
 0x1a8   :  { %v550_v56 = vpop.xlane.xlu1 %549  ;;  %v2204_v51 = vpop.f32.mrf.mxu0  ;;  %v1864_v1 = vadd.f32 %v3671_v48, %v1758_v11  ;;  %v1759_v19 = vmul.f32 %v1659_v63, %v5958_v58  ;;  %v1282_v9 = vmul.f32 %v4209_v15, %v1281_v0  ;;  %3025 = vrsqrt.f32 %v4230_v10 }
 0x1a9   :  { %v2603_v60 = vpop.f32.mrf.mxu3  ;;  %v655_v38 = vmul.f32 %v3208_v33, %v550_v56  ;;  %v2205_v32 = vadd.f32 %v2204_v51, %v4100_v27  ;;  %v824_v56 = vmul.f32 %v4233_v21, %v4233_v21  ;;  %v1255_v51 = vmul.f32 %v4153_v7, %v1254_v54 }
 0x1aa   :  { %v2604_v13 = vadd.f32 %v2603_v60, %v2470_v52  ;;  %v933_v36 = vpop.xlane.xlu2 %932  ;;  %v2338_v40 = vpop.f32.mrf.mxu1  ;;  %564 = vadd.xlane.f32.xlu0 %v563_v62  ;;  %v1952_v42 = vpack.c.bf16 %v1864_v1, %v1862_v24  ;;  %v1863_v60 = vadd.f32 %v3695_v26, %v1757_v17  ;;  %v1865_v58 = vadd.f32 %v3695_v26, %v1759_v19 }
 0x1ab   :  { %v4263_v57 = vsub.f32 %v3947_v5, %v655_v38  ;;  %v4266_v18 = vsub.f32 %v3952_v46, %v655_v38  ;;  %v2339_v11 = vadd.f32 %v2338_v40, %v2205_v32  ;;  %v1047_v62 = vmul.f32 %v933_v36, %v3208_v33 }
 0x1ac   :  { %2729 = vst [vmem:[%s5855_s5 + $0x18] sm:$0xff] %v2604_v13  ;;  %v825_v52 = vmul.f32 %v4239_v3, %v4239_v3  ;;  %2223 = vmatmul.bf16.gmra.mxu0 %v1952_v42  ;;  %2491 = vmatmul.bf16.gmra.mxu2 %v1952_v42  ;;  %v828_v5 = vmul.f32 %v4242_v43, %v4242_v43  ;;  %v5959_v24 = vsub.f32 1.5, %v4183_v16  ;;  %v4307_v16 = vld [vmem:[%s5850_s0 + $0x1f0] sm:$0xff]  ;;  %vm1287_vm14 = vweird.f32 %v4209_v15  ;;  %v5965_v42 = vld [vmem:[#allocation10_spill] sm:$0xff] }
 0x1ad   :  { %v829_v46 = vmul.f32 %v4250_v28, %v4250_v28  ;;  %v1953_v40 = vpack.c.bf16 %v1865_v58, %v1863_v60  ;;  %2730 = vst [vmem:[%s5855_s5 + $0x20] sm:$0xff] %v2339_v11  ;;  %v4282_v32 = vadd.f32 1e-05, %v1047_v62  ;;  %v830_v38 = vmul.f32 %v4263_v57, %v4263_v57  ;;  %v4329_v62 = vld [vmem:[%s5850_s0 + $0x210] sm:$0xff]  ;;  %vm4419_vm0 = vmor %vm1286_vm13, %vm1287_vm14 }
 0x1ae   :  { %v2472_v22 = vpop.f32.mrf.mxu2  ;;  %v946_v0 = vadd.f32 %v825_v52, %v824_v56  ;;  %v831_v13 = vmul.f32 %v4266_v18, %v4266_v18  ;;  %v1265_v1 = vmul.f32 %v4102_v50, %v5959_v24  ;;  %v1273_v52 = vmul.f32 0.5, %v1272_v6 }
 0x1af   :  { %v2473_v45 = vadd.f32 %v2472_v22, %v4124_v8  ;;  %v952_v63 = vadd.f32 %v829_v46, %v828_v5  ;;  %2357 = vmatmul.bf16.gmra.mxu1 %v1953_v40  ;;  %2625 = vmatmul.bf16.gmra.mxu3 %v1953_v40  ;;  %3027 = vrsqrt.f32 %v4282_v32  ;;  %v1283_v5 = vmul.f32 0.5, %v1282_v9 }
 0x1b0   :  { %v553_v41 = vpop.xlane.xlu1 %552  ;;  %v2206_v17 = vpop.f32.mrf.mxu0  ;;  %947 = vadd.xlane.f32.xlu1 %v946_v0  ;;  %v955_v11 = vadd.f32 %v831_v13, %v830_v38  ;;  %v566_v6 = vadd.f32 %v4312_v29, %v4307_v16  ;;  %v1269_v9 = vsel %vm4318_vm11, %v4102_v50, %v1265_v1  ;;  %v1274_v24 = vsub.f32 1.5, %v1273_v52  ;;  %v5966_v52 = vld [vmem:[#allocation11_spill] sm:$0xff] }
 0x1b1   :  { %v2606_v54 = vpop.f32.mrf.mxu3  ;;  %v656_v19 = vmul.f32 %v3208_v33, %v553_v41  ;;  %v2207_v56 = vadd.f32 %v2206_v17, %v4100_v27  ;;  %953 = vadd.xlane.f32.xlu2 %v952_v63  ;;  %v4342_v0 = vpop.eup %3025  ;;  %v1662_v38 = vmul.f32 %v3663_v47, %v1269_v9  ;;  %v1284_v1 = vsub.f32 1.5, %v1283_v5 }
 0x1b2   :  { %v2607_v60 = vadd.f32 %v2606_v54, %v2473_v45  ;;  %v4324_v58 = vpop.xlane.xlu2 %935  ;;  %v2340_v40 = vpop.f32.mrf.mxu1  ;;  %956 = vadd.xlane.f32.xlu0 %v955_v11  ;;  %vm1306_vm1 = vweird.f32 %v4282_v32  ;;  %vm1296_vm3 = vweird.f32 %v4230_v10  ;;  %vm1297_vm4 = vweird.f32 %v4342_v0 }
 0x1b3   :  { %v4337_v46 = vsub.f32 %v3983_v12, %v656_v19  ;;  %v4340_v22 = vsub.f32 %v3988_v37, %v656_v19  ;;  %v2341_v45 = vadd.f32 %v2340_v40, %v2207_v56  ;;  %v1259_v12 = vsel %vm4297_vm10, %v4153_v7, %v1255_v51  ;;  %vm1298_vm6 = vmor %vm1296_vm3, %vm1297_vm4 }
 0x1b4   :  { %2731 = vst [vmem:[%s5855_s5 + $0x28] sm:$0xff] %v2607_v60  ;;  %v572_v37 = vadd.f32 %v4334_v14, %v4329_v62  ;;  %v1660_v63 = vmul.f32 %v3663_v47, %v1259_v12  ;;  %v1661_v41 = vmul.f32 %v3673_v2, %v1259_v12  ;;  %v1663_v7 = vmul.f32 %v3673_v2, %v1269_v9 }
 0x1b5   :  { %5964 = vst [vmem:[#allocation6_spill] sm:$0xff] %v4340_v22  ;;  %v832_v51 = vmul.f32 %v4337_v46, %v4337_v46  ;;  %v833_v13 = vmul.f32 %v4340_v22, %v4340_v22  ;;  %v4369_v50 = vpop.eup %3027  ;;  %v1291_v19 = vmul.f32 %v4342_v0, %v4230_v10  ;;  %v1762_v60 = vmul.f32 %v1662_v38, %v5965_v42  ;;  %v4394_v38 = vld [vmem:[%s5850_s0 + $0x200] sm:$0xff] }
 0x1b6   :  { %2732 = vst [vmem:[%s5855_s5 + $0x30] sm:$0xff] %v2341_v45  ;;  %v2474_v17 = vpop.f32.mrf.mxu2  ;;  %v1760_v54 = vmul.f32 %v1660_v63, %v3766_v39  ;;  %v1301_v56 = vmul.f32 %v4369_v50, %v4282_v32  ;;  %v1761_v11 = vmul.f32 %v1661_v41, %v3769_v53  ;;  %v1763_v5 = vmul.f32 %v1663_v7, %v5966_v52 }
 0x1b7   :  { %v2475_v36 = vadd.f32 %v2474_v17, %v4124_v8  ;;  %v958_v17 = vadd.f32 %v833_v13, %v832_v51  ;;  %v1868_v63 = vadd.f32 %v3671_v48, %v1762_v60  ;;  %v1275_v7 = vmul.f32 %v4201_v23, %v1274_v24  ;;  %v4413_v24 = vld [vmem:[%s5850_s0 + $0x228] sm:$0xff] }
 0x1b8   :  { %v2209_v40 = vpop.f32.mrf.mxu0  ;;  %v1866_v12 = vadd.f32 %v3671_v48, %v1760_v54  ;;  %567 = vadd.xlane.f32.xlu1 %v566_v6  ;;  %v1285_v51 = vmul.f32 %v4209_v15, %v1284_v1  ;;  %v1867_v25 = vadd.f32 %v3695_v26, %v1761_v11  ;;  %v4403_v6 = vld [vmem:[%s5850_s0 + $0x208] sm:$0xff]  ;;  %v1292_v60 = vmul.f32 %v4342_v0, %v1291_v19 }
 0x1b9   :  { %v2608_v45 = vpop.f32.mrf.mxu3  ;;  %v2210_v9 = vadd.f32 %v2209_v40, %v4100_v27  ;;  %573 = vadd.xlane.f32.xlu2 %v572_v37  ;;  %v4408_v37 = vld [vmem:[%s5850_s0 + $0x220] sm:$0xff]  ;;  %v1302_v11 = vmul.f32 %v4369_v50, %v1301_v56  ;;  %v1869_v40 = vadd.f32 %v3695_v26, %v1763_v5  ;;  %vm1307_vm2 = vweird.f32 %v4369_v50 }
 0x1ba   :  { %v2609_v53 = vadd.f32 %v2608_v45, %v2475_v36  ;;  %v556_v41 = vpop.xlane.xlu2 %555  ;;  %v2343_v13 = vpop.f32.mrf.mxu1  ;;  %v1954_v36 = vpack.c.bf16 %v1868_v63, %v1866_v12  ;;  %959 = vadd.xlane.f32.xlu0 %v958_v17  ;;  %v4440_v12 = vld [vmem:[%s5850_s0 + $0x238] sm:$0xff]  ;;  %v575_v56 = vadd.f32 %v4413_v24, %v4408_v37  ;;  %v1279_v17 = vsel %vm4386_vm15, %v4201_v23, %v1275_v7  ;;  %vm1308_vm5 = vmor %vm1306_vm1, %vm1307_vm2 }
 0x1bb   :  { %v657_v54 = vmul.f32 %v3208_v33, %v556_v41  ;;  %v2344_v42 = vadd.f32 %v2343_v13, %v2210_v9  ;;  %v1955_v5 = vpack.c.bf16 %v1869_v40, %v1867_v25  ;;  %v578_v63 = vadd.f32 %v4440_v12, %v4435_v34 }
 0x1bc   :  { %2733 = vst [vmem:[%s5855_s5 + $0x38] sm:$0xff] %v2609_v53  ;;  %2228 = vmatmul.bf16.gmra.mxu0 %v1954_v36  ;;  %2496 = vmatmul.bf16.gmra.mxu2 %v1954_v36  ;;  %v1289_v53 = vsel %vm4419_vm0, %v4209_v15, %v1285_v51  ;;  %v1303_v13 = vmul.f32 0.5, %v1302_v11  ;;  %v1664_v51 = vmul.f32 %v3663_v47, %v1279_v17  ;;  %v1293_v1 = vmul.f32 0.5, %v1292_v60  ;;  %v4479_v60 = vld [vmem:[%s5850_s0 + $0x240] sm:$0xff] }
 0x1bd   :  { %v4430_v45 = vsub.f32 %v4013_v59, %v657_v54  ;;  %2734 = vst [vmem:[%s5855_s5 + $0x40] sm:$0xff] %v2344_v42  ;;  %v4446_v19 = vsub.f32 %v4018_v35, %v657_v54  ;;  %v569_v59 = vadd.f32 %v4403_v6, %v4394_v38  ;;  %v1666_v41 = vmul.f32 %v3663_v47, %v1289_v53 }
 0x1be   :  { %v2477_v52 = vpop.f32.mrf.mxu2  ;;  %v1667_v11 = vmul.f32 %v3673_v2, %v1289_v53 }
 0x1bf   :  { %5971 = vst [vmem:[#allocation12_spill] sm:$0xff] %v4446_v19  ;;  %v2478_v9 = vadd.f32 %v2477_v52, %v4124_v8  ;;  %2362 = vmatmul.bf16.gmra.mxu1 %v1955_v5  ;;  %2630 = vmatmul.bf16.gmra.mxu3 %v1955_v5  ;;  %v834_v39 = vmul.f32 %v4430_v45, %v4430_v45  ;;  %v4484_v5 = vld [vmem:[%s5850_s0 + $0x248] sm:$0xff] }
 0x1c0   :  { %v2211_v35 = vpop.f32.mrf.mxu0  ;;  %570 = vadd.xlane.f32.xlu1 %v569_v59  ;;  %v835_v15 = vmul.f32 %v4446_v19, %v4446_v19  ;;  %v1766_v59 = vmul.f32 %v1666_v41, %v3821_v20  ;;  %v1665_v52 = vmul.f32 %v3673_v2, %v1279_v17 }
 0x1c1   :  { %v2611_v25 = vpop.f32.mrf.mxu3  ;;  %v2212_v54 = vadd.f32 %v2211_v35, %v4100_v27  ;;  %576 = vadd.xlane.f32.xlu2 %v575_v56  ;;  %v1304_v56 = vsub.f32 1.5, %v1303_v13  ;;  %v1764_v35 = vmul.f32 %v1664_v51, %v3747_v30  ;;  %v1767_v13 = vmul.f32 %v1667_v11, %v3824_v4 }
 0x1c2   :  { %v2612_v23 = vadd.f32 %v2611_v25, %v2478_v9  ;;  %v559_v7 = vpop.xlane.xlu2 %558  ;;  %v2345_v36 = vpop.f32.mrf.mxu1  ;;  %579 = vadd.xlane.f32.xlu0 %v578_v63  ;;  %v961_v17 = vadd.f32 %v835_v15, %v834_v39  ;;  %v1294_v63 = vsub.f32 1.5, %v1293_v1  ;;  %v1872_v25 = vadd.f32 %v3671_v48, %v1766_v59 }
 0x1c3   :  { %v658_v42 = vmul.f32 %v3208_v33, %v559_v7  ;;  %v2346_v40 = vadd.f32 %v2345_v36, %v2212_v54  ;;  %v1305_v54 = vmul.f32 %v4369_v50, %v1304_v56  ;;  %v1765_v39 = vmul.f32 %v1665_v52, %v3763_v55 }
 0x1c4   :  { %2735 = vst [vmem:[%s5855_s5 + $0x48] sm:$0xff] %v2612_v23  ;;  %v1870_v7 = vadd.f32 %v3671_v48, %v1764_v35  ;;  %v1295_v1 = vmul.f32 %v4342_v0, %v1294_v63  ;;  %v1873_v36 = vadd.f32 %v3695_v26, %v1767_v13 }
 0x1c5   :  { %2736 = vst [vmem:[%s5855_s5 + $0x50] sm:$0xff] %v2346_v40  ;;  %v4490_v20 = vsub.f32 %v4034_v44, %v658_v42  ;;  %v4493_v9 = vsub.f32 %v4039_v31, %v658_v42  ;;  %v581_v31 = vadd.f32 %v4484_v5, %v4479_v60  ;;  %v1871_v11 = vadd.f32 %v3695_v26, %v1765_v39 }
 0x1c6   :  { %v2479_v53 = vpop.f32.mrf.mxu2  ;;  %v1956_v32 = vpack.c.bf16 %v1872_v25, %v1870_v7  ;;  %v1309_v40 = vsel %vm1308_vm5, %v4369_v50, %v1305_v54 }
 0x1c7   :  { %5972 = vst [vmem:[#allocation7_spill] sm:$0xff] %v4490_v20  ;;  %v2480_v41 = vadd.f32 %v2479_v53, %v4124_v8  ;;  %v836_v15 = vmul.f32 %v4490_v20, %v4490_v20  ;;  %v837_v51 = vmul.f32 %v4493_v9, %v4493_v9  ;;  %v1957_v56 = vpack.c.bf16 %v1873_v36, %v1871_v11 }
 0x1c8   :  { %5973 = vst [vmem:[#allocation13_spill] sm:$0xff] %v4493_v9  ;;  %v2214_v44 = vpop.f32.mrf.mxu0  ;;  %962 = vadd.xlane.f32.xlu1 %v961_v17  ;;  %v1299_v17 = vsel %vm1298_vm6, %v4342_v0, %v1295_v1  ;;  %v1670_v35 = vmul.f32 %v3663_v47, %v1309_v40  ;;  %v4539_v0 = vld [vmem:[%s5850_s0 + $0x258] sm:$0xff] }
 0x1c9   :  { %v2613_v30 = vpop.f32.mrf.mxu3  ;;  %v2215_v23 = vadd.f32 %v2214_v44, %v4100_v27  ;;  %v964_v59 = vadd.f32 %v837_v51, %v836_v15  ;;  %v1668_v13 = vmul.f32 %v3663_v47, %v1299_v17  ;;  %v4534_v44 = vld [vmem:[%s5850_s0 + $0x250] sm:$0xff]  ;;  %v1669_v39 = vmul.f32 %v3673_v2, %v1299_v17  ;;  %v5974_v51 = vld [vmem:[#allocation15_spill] sm:$0xff] }
 0x1ca   :  { %v2614_v4 = vadd.f32 %v2613_v30, %v2480_v41  ;;  %v2348_v55 = vpop.f32.mrf.mxu1  ;;  %582 = vadd.xlane.f32.xlu0 %v581_v31  ;;  %v1671_v31 = vmul.f32 %v3673_v2, %v1309_v40  ;;  %v1770_v30 = vmul.f32 %v1670_v35, %v3939_v61  ;;  %v5975_v61 = vld [vmem:[#allocation14_spill] sm:$0xff] }
 0x1cb   :  { %v2349_v42 = vadd.f32 %v2348_v55, %v2215_v23  ;;  %v584_v23 = vadd.f32 %v4539_v0, %v4534_v44  ;;  %v1768_v7 = vmul.f32 %v1668_v13, %v3878_v49  ;;  %v4567_v49 = vld [vmem:[%s5850_s0 + $0x268] sm:$0xff] }
 0x1cc   :  { %2737 = vst [vmem:[%s5855_s5 + $0x58] sm:$0xff] %v2614_v4  ;;  %2233 = vmatmul.bf16.gmra.mxu0 %v1956_v32  ;;  %2501 = vmatmul.bf16.gmra.mxu2 %v1956_v32  ;;  %v1771_v1 = vmul.f32 %v1671_v31, %v5974_v51  ;;  %v1876_v36 = vadd.f32 %v3671_v48, %v1770_v30 }
 0x1cd   :  { %2738 = vst [vmem:[%s5855_s5 + $0x60] sm:$0xff] %v2349_v42  ;;  %v1769_v32 = vmul.f32 %v1669_v39, %v5975_v61  ;;  %v1874_v11 = vadd.f32 %v3671_v48, %v1768_v7 }
 0x1ce   :  { %v2482_v10 = vpop.f32.mrf.mxu2  ;;  %v1877_v40 = vadd.f32 %v3695_v26, %v1771_v1 }
 0x1cf   :  { %v2483_v52 = vadd.f32 %v2482_v10, %v4124_v8  ;;  %2367 = vmatmul.bf16.gmra.mxu1 %v1957_v56  ;;  %2635 = vmatmul.bf16.gmra.mxu3 %v1957_v56  ;;  %v1958_v10 = vpack.c.bf16 %v1876_v36, %v1874_v11  ;;  %v1875_v56 = vadd.f32 %v3695_v26, %v1769_v32 }
 0x1d0   :  { %v2216_v53 = vpop.f32.mrf.mxu0  ;;  %965 = vadd.xlane.f32.xlu1 %v964_v59  ;;  %v4562_v59 = vld [vmem:[%s5850_s0 + $0x260] sm:$0xff] }
 0x1d1   :  { %v2616_v63 = vpop.f32.mrf.mxu3  ;;  %v2217_v50 = vadd.f32 %v2216_v53, %v4100_v27  ;;  %v1959_v17 = vpack.c.bf16 %v1877_v40, %v1875_v56  ;;  %v1048_v53 = vmul.f32 %v4324_v58, %v3208_v33 }
 0x1d2   :  { %v2617_v41 = vadd.f32 %v2616_v63, %v2483_v52  ;;  %v2350_v25 = vpop.f32.mrf.mxu1  ;;  %v587_v52 = vadd.f32 %v4567_v49, %v4562_v59 }
 0x1d3   :  { %v2351_v54 = vadd.f32 %v2350_v25, %v2217_v50  ;;  %v1098_v35 = vadd.f32 1e-05, %v1048_v53 }
 0x1d4   :  { %2739 = vst [vmem:[%s5855_s5 + $0x68] sm:$0xff] %v2617_v41 }
 0x1d5   :  { %2740 = vst [vmem:[%s5855_s5 + $0x70] sm:$0xff] %v2351_v54  ;;  %3029 = vrsqrt.f32 %v1098_v35  ;;  %vm1316_vm7 = vweird.f32 %v1098_v35 }
 0x1d6   :  { %v2484_v4 = vpop.f32.mrf.mxu2 }
 0x1d7   :  { %v2485_v15 = vadd.f32 %v2484_v4, %v4124_v8 }
 0x1d8   :  { %585 = vadd.xlane.f32.xlu1 %v584_v23 }
 0x1d9   :  { %v2618_v55 = vpop.f32.mrf.mxu3 }
 0x1da   :  { %v2619_v42 = vadd.f32 %v2618_v55, %v2485_v15 }
 0x1db   :  { %v3030_v63 = vpop.eup %3029 }
 0x1dc   :  { %2741 = vst [vmem:[%s5855_s5 + $0x78] sm:$0xff] %v2619_v42  ;;  %2238 = vmatmul.bf16.gmra.mxu0 %v1958_v10  ;;  %2506 = vmatmul.bf16.gmra.mxu2 %v1958_v10  ;;  %v1311_v50 = vmul.f32 %v3030_v63, %v1098_v35  ;;  %vm1317_vm8 = vweird.f32 %v3030_v63 }
 0x1dd   :  { %vm1318_vm9 = vmor %vm1316_vm7, %vm1317_vm8 }
 0x1de   :  { %v1312_v13 = vmul.f32 %v3030_v63, %v1311_v50 }
 0x1df   :  { %2372 = vmatmul.bf16.gmra.mxu1 %v1959_v17  ;;  %2640 = vmatmul.bf16.gmra.mxu3 %v1959_v17 }
 0x1e0   :  { %588 = vadd.xlane.f32.xlu1 %v587_v52  ;;  %v1313_v54 = vmul.f32 0.5, %v1312_v13  ;;  %v5976_v13 = vld [vmem:[#allocation4_spill] sm:$0xff] }
 0x1e2   :  { %v1314_v30 = vsub.f32 1.5, %v1313_v54  ;;  %v5978_v54 = vld [vmem:[#allocation5_spill] sm:$0xff] }
 0x1e4   :  { %v1315_v58 = vmul.f32 %v3030_v63, %v1314_v30 }
 0x1e6   :  { %v1319_v36 = vsel %vm1318_vm9, %v3030_v63, %v1315_v58 }
 0x1e7   :  { %v1672_v17 = vmul.f32 %v3663_v47, %v1319_v36  ;;  %v1673_v63 = vmul.f32 %v3673_v2, %v1319_v36 }
 0x204   :  { %v939_v41 = vpop.xlane.xlu0 %938 }
 0x205   :  { %v1049_v25 = vmul.f32 %v939_v41, %v3208_v33 }
 0x207   :  { %v1099_v31 = vadd.f32 1e-05, %v1049_v25 }
 0x209   :  { %3031 = vrsqrt.f32 %v1099_v31  ;;  %vm1326_vm11 = vweird.f32 %v1099_v31 }
 0x20d   :  { %v942_v39 = vpop.xlane.xlu0 %941 }
 0x20e   :  { %v1050_v4 = vmul.f32 %v942_v39, %v3208_v33 }
 0x20f   :  { %v3032_v23 = vpop.eup %3031 }
 0x210   :  { %v1321_v7 = vmul.f32 %v3032_v23, %v1099_v31  ;;  %v4579_v15 = vadd.f32 1e-05, %v1050_v4  ;;  %vm1327_vm10 = vweird.f32 %v3032_v23 }
 0x211   :  { %vm1328_vm12 = vmor %vm1326_vm11, %vm1327_vm10 }
 0x212   :  { %v1322_v51 = vmul.f32 %v3032_v23, %v1321_v7  ;;  %3033 = vrsqrt.f32 %v4579_v15  ;;  %v5980_v7 = vld [vmem:[#allocation16_spill] sm:$0xff]  ;;  %vm1336_vm14 = vweird.f32 %v4579_v15 }
 0x213   :  { %v1772_v58 = vmul.f32 %v1672_v17, %v5980_v7 }
 0x214   :  { %v1323_v1 = vmul.f32 0.5, %v1322_v51 }
 0x215   :  { %v2219_v61 = vpop.f32.mrf.mxu0  ;;  %v2353_v32 = vpop.f32.mrf.mxu1 }
 0x216   :  { %v1324_v55 = vsub.f32 1.5, %v1323_v1  ;;  %v945_v42 = vpop.xlane.xlu1 %944  ;;  %v2220_v11 = vadd.f32 %v2219_v61, %v4100_v27  ;;  %v562_v40 = vpop.xlane.xlu0 %561  ;;  %v5981_v61 = vld [vmem:[#allocation17_spill] sm:$0xff] }
 0x217   :  { %v1051_v56 = vmul.f32 %v945_v42, %v3208_v33  ;;  %v659_v52 = vmul.f32 %v3208_v33, %v562_v40 }
 0x218   :  { %v1325_v10 = vmul.f32 %v3032_v23, %v1324_v55  ;;  %v4586_v53 = vpop.eup %3033  ;;  %v2354_v35 = vadd.f32 %v2353_v32, %v2220_v11  ;;  %v1773_v32 = vmul.f32 %v1673_v63, %v5981_v61 }
 0x219   :  { %v1331_v50 = vmul.f32 %v4586_v53, %v4579_v15  ;;  %v4591_v41 = vadd.f32 1e-05, %v1051_v56  ;;  %v4594_v25 = vsub.f32 %v5976_v13, %v659_v52  ;;  %v4600_v30 = vsub.f32 %v5978_v54, %v659_v52  ;;  %v951_v39 = vpop.xlane.xlu2 %950 }
 0x21a   :  { %2742 = vst [vmem:[%s5855_s5 + $0x80] sm:$0xff] %v2354_v35  ;;  %v1329_v31 = vsel %vm1328_vm12, %v3032_v23, %v1325_v10  ;;  %v1053_v10 = vmul.f32 %v951_v39, %v3208_v33  ;;  %v5982_v35 = vld [vmem:[#allocation8_spill] sm:$0xff]  ;;  %v1879_v39 = vadd.f32 %v3695_v26, %v1773_v32  ;;  %vm1337_vm13 = vweird.f32 %v4586_v53 }
 0x21b   :  { %5977 = vst [vmem:[#allocation10_spill] sm:$0xff] %v4594_v25  ;;  %3035 = vrsqrt.f32 %v4591_v41  ;;  %v838_v4 = vmul.f32 %v4594_v25, %v4594_v25  ;;  %v839_v1 = vmul.f32 %v4600_v30, %v4600_v30  ;;  %v1674_v36 = vmul.f32 %v3663_v47, %v1329_v31  ;;  %vm1338_vm15 = vmor %vm1336_vm14, %vm1337_vm13 }
 0x21c   :  { %5979 = vst [vmem:[#allocation11_spill] sm:$0xff] %v4600_v30  ;;  %v2487_v51 = vpop.f32.mrf.mxu2  ;;  %v1675_v55 = vmul.f32 %v3673_v2, %v1329_v31  ;;  %v1332_v23 = vmul.f32 %v4586_v53, %v1331_v50  ;;  %v2621_v11 = vpop.f32.mrf.mxu3  ;;  %v5983_v30 = vld [vmem:[#allocation9_spill] sm:$0xff]  ;;  %v1878_v50 = vadd.f32 %v3671_v48, %v1772_v58  ;;  %vm1346_vm0 = vweird.f32 %v4591_v41 }
 0x21d   :  { %v2488_v42 = vadd.f32 %v2487_v51, %v4124_v8  ;;  %v2221_v40 = vpop.f32.mrf.mxu0  ;;  %v967_v17 = vadd.f32 %v839_v1, %v838_v4  ;;  %v1774_v13 = vmul.f32 %v1674_v36, %v5982_v35  ;;  %v2355_v7 = vpop.f32.mrf.mxu1  ;;  %v5984_v4 = vld [vmem:[#allocation22_spill] sm:$0xff]  ;;  %v5986_v36 = vld [vmem:[#allocation23_spill] sm:$0xff] }
 0x21e   :  { %v2222_v56 = vadd.f32 %v2221_v40, %v4100_v27  ;;  %v565_v52 = vpop.xlane.xlu0 %564  ;;  %v1775_v63 = vmul.f32 %v1675_v55, %v5983_v30  ;;  %v1333_v40 = vmul.f32 0.5, %v1332_v23 }
 0x21f   :  { %v2622_v54 = vadd.f32 %v2621_v11, %v2488_v42  ;;  %v660_v31 = vmul.f32 %v3208_v33, %v565_v52  ;;  %968 = vadd.xlane.f32.xlu2 %v967_v17  ;;  %v1880_v51 = vadd.f32 %v3671_v48, %v1774_v13  ;;  %v4635_v42 = vadd.f32 1e-05, %v1053_v10 }
 0x220   :  { %v2356_v61 = vadd.f32 %v2355_v7, %v2222_v56  ;;  %v1881_v55 = vadd.f32 %v3695_v26, %v1775_v63  ;;  %v1334_v10 = vsub.f32 1.5, %v1333_v40 }
 0x221   :  { %v4621_v25 = vpop.eup %3035  ;;  %2743 = vst [vmem:[%s5855_s5 + $0x88] sm:$0xff] %v2622_v54  ;;  %v4627_v1 = vsub.f32 %v5984_v4, %v660_v31  ;;  %v4630_v30 = vsub.f32 %v5986_v36, %v660_v31  ;;  %v1960_v32 = vpack.c.bf16 %v1880_v51, %v1878_v50  ;;  %3037 = vrsqrt.f32 %v4635_v42 }
 0x222   :  { %v1341_v58 = vmul.f32 %v4621_v25, %v4591_v41  ;;  %2744 = vst [vmem:[%s5855_s5 + $0x90] sm:$0xff] %v2356_v61  ;;  %v1961_v23 = vpack.c.bf16 %v1881_v55, %v1879_v39  ;;  %v1335_v36 = vmul.f32 %v4586_v53, %v1334_v10  ;;  %v4657_v55 = vld [vmem:[%s5850_s0 + $0x270] sm:$0xff]  ;;  %vm1347_vm1 = vweird.f32 %v4621_v25 }
 0x223   :  { %5985 = vst [vmem:[#allocation15_spill] sm:$0xff] %v4627_v1  ;;  %v840_v11 = vmul.f32 %v4627_v1, %v4627_v1  ;;  %v841_v56 = vmul.f32 %v4630_v30, %v4630_v30  ;;  %v948_v17 = vpop.xlane.xlu1 %947  ;;  %2243 = vmatmul.bf16.gmra.mxu0 %v1960_v32  ;;  %2511 = vmatmul.bf16.gmra.mxu2 %v1960_v32  ;;  %vm4685_vm2 = vmor %vm1346_vm0, %vm1347_vm1  ;;  %vm1366_vm3 = vweird.f32 %v4635_v42 }
 0x224   :  { %5987 = vst [vmem:[#allocation14_spill] sm:$0xff] %v4630_v30  ;;  %v1342_v52 = vmul.f32 %v4621_v25, %v1341_v58  ;;  %v954_v35 = vpop.xlane.xlu2 %953  ;;  %v1052_v13 = vmul.f32 %v948_v17, %v3208_v33  ;;  %v2489_v54 = vpop.f32.mrf.mxu2  ;;  %2377 = vmatmul.bf16.gmra.mxu1 %v1961_v23  ;;  %2645 = vmatmul.bf16.gmra.mxu3 %v1961_v23  ;;  %v4662_v58 = vld [vmem:[%s5850_s0 + $0x278] sm:$0xff] }
 0x225   :  { %v970_v7 = vadd.f32 %v841_v56, %v840_v11  ;;  %v1054_v63 = vmul.f32 %v954_v35, %v3208_v33  ;;  %v2490_v61 = vadd.f32 %v2489_v54, %v4124_v8  ;;  %v2623_v39 = vpop.f32.mrf.mxu3  ;;  %5988 = vst [vmem:[#allocation4_spill] sm:$0xff] %v4657_v55 }
 0x226   :  { %v1343_v31 = vmul.f32 0.5, %v1342_v52  ;;  %v957_v50 = vpop.xlane.xlu0 %956  ;;  %v4649_v51 = vadd.f32 1e-05, %v1052_v13  ;;  %5989 = vst [vmem:[#allocation5_spill] sm:$0xff] %v4662_v58  ;;  %v590_v13 = vadd.f32 %v4662_v58, %v4657_v55 }
 0x227   :  { %v2624_v4 = vadd.f32 %v2623_v39, %v2490_v61  ;;  %v1055_v40 = vmul.f32 %v957_v50, %v3208_v33  ;;  %971 = vadd.xlane.f32.xlu2 %v970_v7  ;;  %v4665_v23 = vadd.f32 1e-05, %v1054_v63  ;;  %v4674_v17 = vpop.eup %3037 }
 0x228   :  { %v1344_v32 = vsub.f32 1.5, %v1343_v31  ;;  %3039 = vrsqrt.f32 %v4649_v51  ;;  %v1339_v31 = vsel %vm1338_vm15, %v4586_v53, %v1335_v36  ;;  %v1361_v39 = vmul.f32 %v4674_v17, %v4635_v42 }
 0x229   :  { %2745 = vst [vmem:[%s5855_s5 + $0x98] sm:$0xff] %v2624_v4  ;;  %v2224_v11 = vpop.f32.mrf.mxu0  ;;  %v4672_v52 = vadd.f32 1e-05, %v1055_v40  ;;  %3041 = vrsqrt.f32 %v4665_v23  ;;  %vm1367_vm4 = vweird.f32 %v4674_v17  ;;  %vm1356_vm5 = vweird.f32 %v4649_v51 }
 0x22a   :  { %v2225_v56 = vadd.f32 %v2224_v11, %v4100_v27  ;;  %v1345_v63 = vmul.f32 %v4621_v25, %v1344_v32  ;;  %v1676_v32 = vmul.f32 %v3663_v47, %v1339_v31  ;;  %vm4824_vm7 = vmor %vm1366_vm3, %vm1367_vm4  ;;  %vm1376_vm9 = vweird.f32 %v4665_v23 }
 0x22b   :  { %v568_v35 = vpop.xlane.xlu1 %567  ;;  %3043 = vrsqrt.f32 %v4672_v52  ;;  %vm1386_vm11 = vweird.f32 %v4672_v52 }
 0x22c   :  { %v574_v10 = vpop.xlane.xlu2 %573  ;;  %v661_v54 = vmul.f32 %v3208_v33, %v568_v35  ;;  %v2358_v7 = vpop.f32.mrf.mxu1  ;;  %v4717_v35 = vld [vmem:[%s5850_s0 + $0x288] sm:$0xff] }
 0x22d   :  { %v663_v15 = vmul.f32 %v3208_v33, %v574_v10  ;;  %v2359_v61 = vadd.f32 %v2358_v7, %v2225_v56  ;;  %v4712_v56 = vld [vmem:[%s5850_s0 + $0x280] sm:$0xff]  ;;  %5996 = vst [vmem:[#allocation22_spill] sm:$0xff] %v4717_v35  ;;  %v1349_v7 = vsel %vm4685_vm2, %v4621_v25, %v1345_v63 }
 0x22e   :  { %v960_v41 = vpop.xlane.xlu0 %959  ;;  %v4692_v4 = vsub.f32 %v4307_v16, %v661_v54  ;;  %v4695_v40 = vsub.f32 %v4312_v29, %v661_v54  ;;  %v4698_v53 = vpop.eup %3039  ;;  %v1677_v29 = vmul.f32 %v3673_v2, %v1339_v31  ;;  %5995 = vst [vmem:[#allocation9_spill] sm:$0xff] %v4712_v56  ;;  %v1362_v31 = vmul.f32 %v4674_v17, %v1361_v39 }
 0x22f   :  { %2746 = vst [vmem:[%s5855_s5 + $0xa0] sm:$0xff] %v2359_v61  ;;  %v2492_v36 = vpop.f32.mrf.mxu2  ;;  %591 = vadd.xlane.f32.xlu2 %v590_v13  ;;  %v4705_v11 = vsub.f32 %v4329_v62, %v663_v15  ;;  %v4720_v10 = vsub.f32 %v4334_v14, %v663_v15  ;;  %v1351_v61 = vmul.f32 %v4698_v53, %v4649_v51  ;;  %v4733_v15 = vpop.eup %3041  ;;  %vm1357_vm6 = vweird.f32 %v4698_v53  ;;  %v4850_v51 = vld [vmem:[%s5850_s0 + $0x298] sm:$0xff] }
 0x230   :  { %5992 = vst [vmem:[#allocation16_spill] sm:$0xff] %v4692_v4  ;;  %v2493_v16 = vadd.f32 %v2492_v36, %v4124_v8  ;;  %v842_v62 = vmul.f32 %v4692_v4, %v4692_v4  ;;  %v843_v54 = vmul.f32 %v4695_v40, %v4695_v40  ;;  %v5998_v4 = vld [vmem:[#allocation2_spill] sm:$0xff]  ;;  %v1678_v50 = vmul.f32 %v3663_v47, %v1349_v7  ;;  %vm4834_vm8 = vmor %vm1356_vm5, %vm1357_vm6 }
 0x231   :  { %5993 = vst [vmem:[#allocation17_spill] sm:$0xff] %v4695_v40  ;;  %v2226_v13 = vpop.f32.mrf.mxu0  ;;  %v1776_v9 = vmul.f32 %v1676_v32, %v5998_v4  ;;  %v593_v40 = vadd.f32 %v4717_v35, %v4712_v56  ;;  %v4738_v20 = vpop.eup %3043  ;;  %v846_v63 = vmul.f32 %v4705_v11, %v4705_v11  ;;  %v1679_v39 = vmul.f32 %v3673_v2, %v1349_v7 }
 0x232   :  { %5994 = vst [vmem:[#allocation8_spill] sm:$0xff] %v4705_v11  ;;  %v2626_v36 = vpop.f32.mrf.mxu3  ;;  %v2227_v14 = vadd.f32 %v2226_v13, %v4100_v27  ;;  %v5999_v13 = vld [vmem:[#allocation3_spill] sm:$0xff]  ;;  %v847_v35 = vmul.f32 %v4720_v10, %v4720_v10  ;;  %v4751_v56 = vmul.f32 0.5, %v1362_v31  ;;  %v1352_v11 = vmul.f32 %v4698_v53, %v1351_v61 }
 0x233   :  { %5997 = vst [vmem:[#allocation23_spill] sm:$0xff] %v4720_v10  ;;  %v2627_v30 = vadd.f32 %v2626_v36, %v2493_v16  ;;  %v571_v1 = vpop.xlane.xlu1 %570  ;;  %v1777_v58 = vmul.f32 %v1677_v29, %v5999_v13  ;;  %v973_v36 = vadd.f32 %v843_v54, %v842_v62  ;;  %v1371_v7 = vmul.f32 %v4733_v15, %v4665_v23  ;;  %v6001_v10 = vld [vmem:[#allocation19_spill] sm:$0xff] }
 0x234   :  { %v2360_v25 = vpop.f32.mrf.mxu1  ;;  %v662_v4 = vmul.f32 %v3208_v33, %v571_v1  ;;  %v577_v16 = vpop.xlane.xlu2 %576  ;;  %v1056_v29 = vmul.f32 %v960_v41, %v3208_v33  ;;  %v1381_v1 = vmul.f32 %v4738_v20, %v4672_v52  ;;  %v1882_v62 = vadd.f32 %v3671_v48, %v1776_v9  ;;  %v4937_v52 = vld [vmem:[%s5850_s0 + $0x2a0] sm:$0xff] }
 0x235   :  { %2747 = vst [vmem:[%s5855_s5 + $0xa8] sm:$0xff] %v2627_v30  ;;  %v2361_v32 = vadd.f32 %v2360_v25, %v2227_v14  ;;  %974 = vadd.xlane.f32.xlu0 %v973_v36  ;;  %v664_v41 = vmul.f32 %v3208_v33, %v577_v16  ;;  %v979_v31 = vadd.f32 %v847_v35, %v846_v63  ;;  %v6000_v25 = vld [vmem:[#allocation18_spill] sm:$0xff]  ;;  %v1364_v9 = vsub.f32 1.5, %v4751_v56 }
 0x236   :  { %v580_v54 = vpop.xlane.xlu0 %579  ;;  %v4769_v14 = vsub.f32 %v4394_v38, %v662_v4  ;;  %v1778_v13 = vmul.f32 %v1678_v50, %v6000_v25  ;;  %v1883_v36 = vadd.f32 %v3695_v26, %v1777_v58  ;;  %v1372_v22 = vmul.f32 %v4733_v15, %v1371_v7 }
 0x237   :  { %2748 = vst [vmem:[%s5855_s5 + $0xb0] sm:$0xff] %v2361_v32  ;;  %v2494_v30 = vpop.f32.mrf.mxu2  ;;  %594 = vadd.xlane.f32.xlu2 %v593_v40  ;;  %v1779_v32 = vmul.f32 %v1679_v39, %v6001_v10  ;;  %v1353_v40 = vmul.f32 0.5, %v1352_v11  ;;  %v4776_v19 = vadd.f32 1e-05, %v1056_v29  ;;  %980 = vadd.xlane.f32.xlu1 %v979_v31  ;;  %v1382_v63 = vmul.f32 %v4738_v20, %v1381_v1 }
 0x238   :  { %v2495_v61 = vadd.f32 %v2494_v30, %v4124_v8  ;;  %v4780_v38 = vsub.f32 %v4403_v6, %v662_v4  ;;  %v1884_v10 = vadd.f32 %v3671_v48, %v1778_v13  ;;  %v4784_v58 = vsub.f32 %v4408_v37, %v664_v41 }
 0x239   :  { %v2229_v55 = vpop.f32.mrf.mxu0  ;;  %v1885_v11 = vadd.f32 %v3695_v26, %v1779_v32  ;;  %v665_v7 = vmul.f32 %v3208_v33, %v580_v54  ;;  %v4790_v29 = vsub.f32 %v4413_v24, %v664_v41  ;;  %v844_v37 = vmul.f32 %v4769_v14, %v4769_v14 }
 0x23a   :  { %v2628_v35 = vpop.f32.mrf.mxu3  ;;  %v1962_v6 = vpack.c.bf16 %v1884_v10, %v1882_v62  ;;  %v2230_v4 = vadd.f32 %v2229_v55, %v4100_v27  ;;  %v1354_v1 = vsub.f32 1.5, %v1353_v40  ;;  %v1373_v30 = vmul.f32 0.5, %v1372_v22 }
 0x23b   :  { %v2629_v50 = vadd.f32 %v2628_v35, %v2495_v61  ;;  %v963_v39 = vpop.xlane.xlu1 %962  ;;  %v1963_v31 = vpack.c.bf16 %v1885_v11, %v1883_v36  ;;  %v1383_v54 = vmul.f32 0.5, %v1382_v63  ;;  %v845_v41 = vmul.f32 %v4780_v38, %v4780_v38 }
 0x23c   :  { %v1057_v56 = vmul.f32 %v963_v39, %v3208_v33  ;;  %v2363_v16 = vpop.f32.mrf.mxu1  ;;  %2248 = vmatmul.bf16.gmra.mxu0 %v1962_v6  ;;  %2516 = vmatmul.bf16.gmra.mxu2 %v1962_v6  ;;  %3045 = vrsqrt.f32 %v4776_v19  ;;  %v4805_v55 = vsub.f32 %v4435_v34, %v665_v7  ;;  %v4808_v22 = vsub.f32 %v4440_v12, %v665_v7 }
 0x23d   :  { %2749 = vst [vmem:[%s5855_s5 + $0xb8] sm:$0xff] %v2629_v50  ;;  %v2364_v24 = vadd.f32 %v2363_v16, %v2230_v4  ;;  %2382 = vmatmul.bf16.gmra.mxu1 %v1963_v31  ;;  %2650 = vmatmul.bf16.gmra.mxu3 %v1963_v31  ;;  %v848_v25 = vmul.f32 %v4784_v58, %v4784_v58  ;;  %v1374_v50 = vsub.f32 1.5, %v1373_v30  ;;  %v1384_v11 = vsub.f32 1.5, %v1383_v54  ;;  %v4845_v4 = vld [vmem:[%s5850_s0 + $0x290] sm:$0xff]  ;;  %v4870_v54 = vld [vmem:[%s5850_s0 + $0x2b8] sm:$0xff] }
 0x23e   :  { %v4798_v61 = vadd.f32 1e-05, %v1057_v56  ;;  %v976_v13 = vadd.f32 %v845_v41, %v844_v37  ;;  %v849_v32 = vmul.f32 %v4790_v29, %v4790_v29  ;;  %v583_v40 = vpop.xlane.xlu0 %582  ;;  %v1365_v12 = vmul.f32 %v4674_v17, %v1364_v9  ;;  %v4865_v31 = vld [vmem:[%s5850_s0 + $0x2b0] sm:$0xff] }
 0x23f   :  { %v2497_v62 = vpop.f32.mrf.mxu2  ;;  %2750 = vst [vmem:[%s5855_s5 + $0xc0] sm:$0xff] %v2364_v24  ;;  %v1355_v63 = vmul.f32 %v4698_v53, %v1354_v1  ;;  %v666_v6 = vmul.f32 %v3208_v33, %v583_v40  ;;  %v850_v37 = vmul.f32 %v4805_v55, %v4805_v55  ;;  %v851_v1 = vmul.f32 %v4808_v22, %v4808_v22  ;;  %v6008_v9 = vld [vmem:[#allocation20_spill] sm:$0xff] }
 0x240   :  { %3047 = vrsqrt.f32 %v4798_v61  ;;  %v2498_v36 = vadd.f32 %v2497_v62, %v4124_v8  ;;  %977 = vadd.xlane.f32.xlu0 %v976_v13  ;;  %v982_v42 = vadd.f32 %v849_v32, %v848_v25  ;;  %vm1377_vm10 = vweird.f32 %v4733_v15 }
 0x241   :  { %v2231_v34 = vpop.f32.mrf.mxu0  ;;  %vm1387_vm12 = vweird.f32 %v4738_v20  ;;  %v1375_v41 = vmul.f32 %v4733_v15, %v1374_v50  ;;  %v985_v62 = vadd.f32 %v851_v1, %v850_v37  ;;  %v1359_v25 = vsel %vm4834_vm8, %v4698_v53, %v1355_v63  ;;  %vm4895_vm13 = vmor %vm1376_vm9, %vm1377_vm10 }
 0x242   :  { %v2631_v10 = vpop.f32.mrf.mxu3  ;;  %v2232_v39 = vadd.f32 %v2231_v34, %v4100_v27  ;;  %983 = vadd.xlane.f32.xlu1 %v982_v42  ;;  %v4872_v24 = vpop.eup %3045  ;;  %v1369_v13 = vsel %vm4824_vm7, %v4674_v17, %v1365_v12  ;;  %v596_v34 = vadd.f32 %v4850_v51, %v4845_v4  ;;  %v1680_v50 = vmul.f32 %v3663_v47, %v1359_v25  ;;  %vm4925_vm14 = vmor %vm1386_vm11, %vm1387_vm12 }
 0x243   :  { %v2632_v56 = vadd.f32 %v2631_v10, %v2498_v36  ;;  %v4838_v16 = vpop.xlane.xlu1 %965  ;;  %v1385_v36 = vmul.f32 %v4738_v20, %v1384_v11  ;;  %v1682_v53 = vmul.f32 %v3663_v47, %v1369_v13  ;;  %v4900_v12 = vsub.f32 %v4479_v60, %v666_v6  ;;  %986 = vadd.xlane.f32.xlu2 %v985_v62 }
 0x244   :  { %v2365_v7 = vpop.f32.mrf.mxu1  ;;  %v602_v35 = vadd.f32 %v4870_v54, %v4865_v31  ;;  %v1681_v10 = vmul.f32 %v3673_v2, %v1359_v25  ;;  %v1780_v23 = vmul.f32 %v1680_v50, %v4233_v21  ;;  %v1683_v42 = vmul.f32 %v3673_v2, %v1369_v13  ;;  %v6011_v13 = vld [vmem:[#allocation21_spill] sm:$0xff] }
 0x245   :  { %2751 = vst [vmem:[%s5855_s5 + $0xc8] sm:$0xff] %v2632_v56  ;;  %v2366_v30 = vadd.f32 %v2365_v7, %v2232_v39  ;;  %v4907_v39 = vsub.f32 %v4484_v5, %v666_v6  ;;  %v1782_v11 = vmul.f32 %v1682_v53, %v6008_v9  ;;  %v1391_v60 = vmul.f32 %v4872_v24, %v4776_v19 }
 0x246   :  { %v4881_v32 = vpop.eup %3047  ;;  %v1781_v1 = vmul.f32 %v1681_v10, %v4239_v3  ;;  %v1379_v21 = vsel %vm4895_vm13, %v4733_v15, %v1375_v41  ;;  %v1886_v62 = vadd.f32 %v3671_v48, %v1780_v23  ;;  %v852_v53 = vmul.f32 %v4900_v12, %v4900_v12 }
 0x247   :  { %2752 = vst [vmem:[%s5855_s5 + $0xd0] sm:$0xff] %v2366_v30  ;;  %v2499_v40 = vpop.f32.mrf.mxu2  ;;  %v1401_v7 = vmul.f32 %v4881_v32, %v4798_v61  ;;  %v1888_v3 = vadd.f32 %v3671_v48, %v1782_v11  ;;  %v853_v10 = vmul.f32 %v4907_v39, %v4907_v39  ;;  %v1389_v23 = vsel %vm4925_vm14, %v4738_v20, %v1385_v36 }
 0x248   :  { %v2500_v63 = vadd.f32 %v2499_v40, %v4124_v8  ;;  %597 = vadd.xlane.f32.xlu0 %v596_v34  ;;  %v1783_v40 = vmul.f32 %v1683_v42, %v6011_v13  ;;  %v1887_v50 = vadd.f32 %v3695_v26, %v1781_v1  ;;  %v4942_v34 = vld [vmem:[%s5850_s0 + $0x2a8] sm:$0xff]  ;;  %v1392_v9 = vmul.f32 %v4872_v24, %v1391_v60 }
 0x249   :  { %v2234_v56 = vpop.f32.mrf.mxu0  ;;  %v1964_v17 = vpack.c.bf16 %v1888_v3, %v1886_v62  ;;  %v1402_v11 = vmul.f32 %v4881_v32, %v1401_v7  ;;  %v599_v60 = vadd.f32 %v4942_v34, %v4937_v52  ;;  %v988_v1 = vadd.f32 %v853_v10, %v852_v53  ;;  %v4993_v10 = vld [vmem:[%s5850_s0 + $0x2d0] sm:$0xff] }
 0x24a   :  { %v2633_v37 = vpop.f32.mrf.mxu3  ;;  %v2235_v30 = vadd.f32 %v2234_v56, %v4100_v27  ;;  %603 = vadd.xlane.f32.xlu1 %v602_v35  ;;  %v1889_v42 = vadd.f32 %v3695_v26, %v1783_v40  ;;  %v4960_v35 = vld [vmem:[%s5850_s0 + $0x2c0] sm:$0xff]  ;;  %v4965_v56 = vld [vmem:[%s5850_s0 + $0x2c8] sm:$0xff]  ;;  %v1686_v5 = vmul.f32 %v3663_v47, %v1389_v23  ;;  %v1393_v62 = vmul.f32 0.5, %v1392_v9  ;;  %v4998_v9 = vld [vmem:[%s5850_s0 + $0x2d8] sm:$0xff] }
 0x24b   :  { %v2634_v6 = vadd.f32 %v2633_v37, %v2500_v63  ;;  %v586_v25 = vpop.xlane.xlu1 %585  ;;  %v1403_v3 = vmul.f32 0.5, %v1402_v11  ;;  %989 = vadd.xlane.f32.xlu2 %v988_v1  ;;  %v1687_v53 = vmul.f32 %v3673_v2, %v1389_v23  ;;  %vm1406_vm15 = vweird.f32 %v4798_v61 }
 0x24c   :  { %v667_v15 = vmul.f32 %v3208_v33, %v586_v25  ;;  %v2368_v41 = vpop.f32.mrf.mxu1  ;;  %2253 = vmatmul.bf16.gmra.mxu0 %v1964_v17  ;;  %2521 = vmatmul.bf16.gmra.mxu2 %v1964_v17  ;;  %v1965_v37 = vpack.c.bf16 %v1889_v42, %v1887_v50  ;;  %v1786_v23 = vmul.f32 %v1686_v5, %v4263_v57  ;;  %vm1407_vm0 = vweird.f32 %v4881_v32 }
 0x24d   :  { %2753 = vst [vmem:[%s5855_s5 + $0xd8] sm:$0xff] %v2634_v6  ;;  %v2369_v63 = vadd.f32 %v2368_v41, %v2235_v30  ;;  %v1685_v42 = vmul.f32 %v3673_v2, %v1379_v21  ;;  %v608_v57 = vadd.f32 %v4998_v9, %v4993_v10  ;;  %vm1396_vm1 = vweird.f32 %v4776_v19  ;;  %vm1408_vm3 = vmor %vm1406_vm15, %vm1407_vm0 }
 0x24e   :  { %v4968_v20 = vsub.f32 %v4534_v44, %v667_v15  ;;  %v4971_v36 = vsub.f32 %v4539_v0, %v667_v15  ;;  %v605_v44 = vadd.f32 %v4965_v56, %v4960_v35  ;;  %v1684_v0 = vmul.f32 %v3663_v47, %v1379_v21  ;;  %2387 = vmatmul.bf16.gmra.mxu1 %v1965_v37 }
 0x24f   :  { %2754 = vst [vmem:[%s5855_s5 + $0xe0] sm:$0xff] %v2369_v63  ;;  %v2502_v7 = vpop.f32.mrf.mxu2  ;;  %2655 = vmatmul.bf16.gmra.mxu3 %v1965_v37  ;;  %vm1397_vm2 = vweird.f32 %v4872_v24  ;;  %v1785_v61 = vmul.f32 %v1685_v42, %v4250_v28  ;;  %v5037_v28 = vld [vmem:[%s5850_s0 + $0x2e0] sm:$0xff] }
 0x250   :  { %v2503_v30 = vadd.f32 %v2502_v7, %v4124_v8  ;;  %600 = vadd.xlane.f32.xlu0 %v599_v60  ;;  %v854_v15 = vmul.f32 %v4968_v20, %v4968_v20  ;;  %v855_v41 = vmul.f32 %v4971_v36, %v4971_v36  ;;  %v1394_v60 = vsub.f32 1.5, %v1393_v62  ;;  %vm1398_vm4 = vmor %vm1396_vm1, %vm1397_vm2 }
 0x251   :  { %v2236_v6 = vpop.f32.mrf.mxu0  ;;  %v1404_v7 = vsub.f32 1.5, %v1403_v3  ;;  %v1784_v37 = vmul.f32 %v1684_v0, %v4242_v43 }
 0x252   :  { %v2636_v25 = vpop.f32.mrf.mxu3  ;;  %v2237_v13 = vadd.f32 %v2236_v6, %v4100_v27  ;;  %606 = vadd.xlane.f32.xlu1 %v605_v44  ;;  %v991_v44 = vadd.f32 %v855_v41, %v854_v15  ;;  %v5042_v41 = vld [vmem:[%s5850_s0 + $0x2e8] sm:$0xff] }
 0x253   :  { %v2637_v40 = vadd.f32 %v2636_v25, %v2503_v30  ;;  %v589_v50 = vpop.xlane.xlu1 %588  ;;  %v1405_v6 = vmul.f32 %v4881_v32, %v1404_v7  ;;  %v1890_v62 = vadd.f32 %v3671_v48, %v1784_v37  ;;  %609 = vadd.xlane.f32.xlu2 %v608_v57  ;;  %v611_v19 = vadd.f32 %v5042_v41, %v5037_v28 }
 0x254   :  { %v668_v17 = vmul.f32 %v3208_v33, %v589_v50  ;;  %v2370_v63 = vpop.f32.mrf.mxu1 }
 0x255   :  { %2755 = vst [vmem:[%s5855_s5 + $0xe8] sm:$0xff] %v2637_v40  ;;  %v2371_v11 = vadd.f32 %v2370_v63, %v2237_v13  ;;  %v1395_v40 = vmul.f32 %v4872_v24, %v1394_v60  ;;  %v1409_v63 = vsel %vm1408_vm3, %v4881_v32, %v1405_v6  ;;  %v5072_v6 = vld [vmem:[%s5850_s0 + $0x2f8] sm:$0xff] }
 0x256   :  { %v5007_v1 = vsub.f32 %v4562_v59, %v668_v17  ;;  %v5010_v30 = vsub.f32 %v4567_v49, %v668_v17  ;;  %v1787_v59 = vmul.f32 %v1687_v53, %v4266_v18  ;;  %v1892_v49 = vadd.f32 %v3671_v48, %v1786_v23 }
 0x257   :  { %2756 = vst [vmem:[%s5855_s5 + $0xf0] sm:$0xff] %v2371_v11  ;;  %v2504_v5 = vpop.f32.mrf.mxu2  ;;  %v1891_v11 = vadd.f32 %v3695_v26, %v1785_v61  ;;  %v1399_v60 = vsel %vm1398_vm4, %v4872_v24, %v1395_v40  ;;  %v1690_v32 = vmul.f32 %v3663_v47, %v1409_v63  ;;  %v5067_v24 = vld [vmem:[%s5850_s0 + $0x2f0] sm:$0xff] }
 0x258   :  { %6012 = vst [vmem:[#allocation2_spill] sm:$0xff] %v5007_v1  ;;  %v2505_v43 = vadd.f32 %v2504_v5, %v4124_v8  ;;  %992 = vadd.xlane.f32.xlu0 %v991_v44  ;;  %v856_v25 = vmul.f32 %v5007_v1, %v5007_v1  ;;  %v857_v13 = vmul.f32 %v5010_v30, %v5010_v30  ;;  %v6014_v40 = vld [vmem:[#allocation12_spill] sm:$0xff] }
 0x259   :  { %6013 = vst [vmem:[#allocation3_spill] sm:$0xff] %v5010_v30  ;;  %v2239_v21 = vpop.f32.mrf.mxu0  ;;  %v1893_v50 = vadd.f32 %v3695_v26, %v1787_v59  ;;  %v1966_v53 = vpack.c.bf16 %v1892_v49, %v1890_v62  ;;  %v1691_v49 = vmul.f32 %v3673_v2, %v1409_v63  ;;  %v1790_v62 = vmul.f32 %v1690_v32, %v4430_v45  ;;  %v6015_v45 = vld [vmem:[#allocation6_spill] sm:$0xff] }
 0x25a   :  { %v2638_v0 = vpop.f32.mrf.mxu3  ;;  %v2240_v3 = vadd.f32 %v2239_v21, %v4100_v27  ;;  %v994_v23 = vadd.f32 %v857_v13, %v856_v25  ;;  %v1689_v61 = vmul.f32 %v3673_v2, %v1399_v60  ;;  %v1058_v32 = vmul.f32 %v4838_v16, %v3208_v33 }
 0x25b   :  { %v2639_v18 = vadd.f32 %v2638_v0, %v2505_v43  ;;  %v1967_v7 = vpack.c.bf16 %v1893_v50, %v1891_v11  ;;  %v1688_v43 = vmul.f32 %v3663_v47, %v1399_v60  ;;  %612 = vadd.xlane.f32.xlu2 %v611_v19  ;;  %v1791_v50 = vmul.f32 %v1691_v49, %v6014_v40  ;;  %v5094_v19 = vld [vmem:[%s5850_s0 + $0x300] sm:$0xff] }
 0x25c   :  { %v2373_v15 = vpop.f32.mrf.mxu1  ;;  %2258 = vmatmul.bf16.gmra.mxu0 %v1966_v53  ;;  %2526 = vmatmul.bf16.gmra.mxu2 %v1966_v53 }
 0x25d   :  { %2757 = vst [vmem:[%s5855_s5 + $0xf8] sm:$0xff] %v2639_v18  ;;  %v2374_v17 = vadd.f32 %v2373_v15, %v2240_v3  ;;  %v614_v3 = vadd.f32 %v5072_v6, %v5067_v24  ;;  %v1788_v25 = vmul.f32 %v1688_v43, %v4337_v46  ;;  %v1896_v15 = vadd.f32 %v3671_v48, %v1790_v62  ;;  %v5099_v46 = vld [vmem:[%s5850_s0 + $0x308] sm:$0xff] }
 0x25e   :  { %2392 = vmatmul.bf16.gmra.mxu1 %v1967_v7 }
 0x25f   :  { %2758 = vst [vmem:[%s5855_s5 + $0x100] sm:$0xff] %v2374_v17  ;;  %v2507_v42 = vpop.f32.mrf.mxu2  ;;  %2660 = vmatmul.bf16.gmra.mxu3 %v1967_v7  ;;  %v1789_v17 = vmul.f32 %v1689_v61, %v6015_v45  ;;  %v1894_v11 = vadd.f32 %v3671_v48, %v1788_v25  ;;  %v617_v7 = vadd.f32 %v5099_v46, %v5094_v19 }
 0x260   :  { %v2508_v37 = vadd.f32 %v2507_v42, %v4124_v8  ;;  %995 = vadd.xlane.f32.xlu0 %v994_v23  ;;  %v1897_v23 = vadd.f32 %v3695_v26, %v1791_v50 }
 0x261   :  { %v2241_v44 = vpop.f32.mrf.mxu0  ;;  %v1968_v42 = vpack.c.bf16 %v1896_v15, %v1894_v11  ;;  %v1895_v60 = vadd.f32 %v3695_v26, %v1789_v17 }
 0x262   :  { %v2641_v57 = vpop.f32.mrf.mxu3  ;;  %v2242_v5 = vadd.f32 %v2241_v44, %v4100_v27  ;;  %v1108_v44 = vadd.f32 1e-05, %v1058_v32  ;;  %v6016_v32 = vld [vmem:[#allocation4_spill] sm:$0xff] }
 0x263   :  { %v2642_v59 = vadd.f32 %v2641_v57, %v2508_v37  ;;  %v1969_v37 = vpack.c.bf16 %v1897_v23, %v1895_v60 }
 0x264   :  { %v2375_v21 = vpop.f32.mrf.mxu1  ;;  %3049 = vrsqrt.f32 %v1108_v44  ;;  %vm1416_vm5 = vweird.f32 %v1108_v44 }
 0x265   :  { %2759 = vst [vmem:[%s5855_s5 + $0x108] sm:$0xff] %v2642_v59  ;;  %v2376_v0 = vadd.f32 %v2375_v21, %v2242_v5 }
 0x267   :  { %2760 = vst [vmem:[%s5855_s5 + $0x110] sm:$0xff] %v2376_v0  ;;  %v2509_v18 = vpop.f32.mrf.mxu2 }
 0x268   :  { %v2510_v13 = vadd.f32 %v2509_v18, %v4124_v8  ;;  %615 = vadd.xlane.f32.xlu0 %v614_v3 }
 0x26a   :  { %v2643_v53 = vpop.f32.mrf.mxu3  ;;  %v3050_v57 = vpop.eup %3049 }
 0x26b   :  { %v2644_v63 = vadd.f32 %v2643_v53, %v2510_v13  ;;  %v1411_v5 = vmul.f32 %v3050_v57, %v1108_v44  ;;  %vm1417_vm6 = vweird.f32 %v3050_v57 }
 0x26c   :  { %2263 = vmatmul.bf16.gmra.mxu0 %v1968_v42  ;;  %2531 = vmatmul.bf16.gmra.mxu2 %v1968_v42  ;;  %vm1418_vm7 = vmor %vm1416_vm5, %vm1417_vm6 }
 0x26d   :  { %2761 = vst [vmem:[%s5855_s5 + $0x118] sm:$0xff] %v2644_v63  ;;  %v1412_v43 = vmul.f32 %v3050_v57, %v1411_v5 }
 0x26e   :  { %2397 = vmatmul.bf16.gmra.mxu1 %v1969_v37 }
 0x26f   :  { %2665 = vmatmul.bf16.gmra.mxu3 %v1969_v37  ;;  %v1413_v21 = vmul.f32 0.5, %v1412_v43 }
 0x270   :  { %618 = vadd.xlane.f32.xlu0 %v617_v7 }
 0x271   :  { %v1414_v62 = vsub.f32 1.5, %v1413_v21 }
 0x273   :  { %v1415_v25 = vmul.f32 %v3050_v57, %v1414_v62 }
 0x275   :  { %v1419_v15 = vsel %vm1418_vm7, %v3050_v57, %v1415_v25  ;;  %v6018_v57 = vld [vmem:[#allocation5_spill] sm:$0xff] }
 0x276   :  { %v1692_v42 = vmul.f32 %v3663_v47, %v1419_v15  ;;  %v1693_v60 = vmul.f32 %v3673_v2, %v1419_v15  ;;  %v6021_v15 = vld [vmem:[#allocation13_spill] sm:$0xff] }
 0x292   :  { %v969_v59 = vpop.xlane.xlu2 %968 }
 0x293   :  { %v1059_v49 = vmul.f32 %v969_v59, %v3208_v33 }
 0x295   :  { %v1109_v0 = vadd.f32 1e-05, %v1059_v49 }
 0x297   :  { %3051 = vrsqrt.f32 %v1109_v0  ;;  %vm1426_vm9 = vweird.f32 %v1109_v0 }
 0x29a   :  { %v972_v61 = vpop.xlane.xlu2 %971 }
 0x29b   :  { %v1060_v3 = vmul.f32 %v972_v61, %v3208_v33 }
 0x29d   :  { %v3052_v18 = vpop.eup %3051  ;;  %v5111_v16 = vadd.f32 1e-05, %v1060_v3 }
 0x29e   :  { %v1421_v13 = vmul.f32 %v3052_v18, %v1109_v0  ;;  %vm1427_vm8 = vweird.f32 %v3052_v18  ;;  %v1793_v0 = vmul.f32 %v1693_v60, %v6021_v15 }
 0x29f   :  { %3053 = vrsqrt.f32 %v5111_v16  ;;  %vm1428_vm10 = vmor %vm1426_vm9, %vm1427_vm8  ;;  %vm1436_vm13 = vweird.f32 %v5111_v16 }
 0x2a0   :  { %v1422_v40 = vmul.f32 %v3052_v18, %v1421_v13  ;;  %v2244_v50 = vpop.f32.mrf.mxu0 }
 0x2a1   :  { %v2245_v53 = vadd.f32 %v2244_v50, %v4100_v27  ;;  %v2378_v45 = vpop.f32.mrf.mxu1 }
 0x2a2   :  { %v1423_v17 = vmul.f32 0.5, %v1422_v40  ;;  %v592_v63 = vpop.xlane.xlu2 %591  ;;  %v6020_v40 = vld [vmem:[#allocation7_spill] sm:$0xff] }
 0x2a3   :  { %v2379_v11 = vadd.f32 %v2378_v45, %v2245_v53  ;;  %v669_v23 = vmul.f32 %v3208_v33, %v592_v63  ;;  %v1792_v50 = vmul.f32 %v1692_v42, %v6020_v40  ;;  %v6024_v40 = vld [vmem:[#allocation9_spill] sm:$0xff] }
 0x2a4   :  { %v1424_v7 = vsub.f32 1.5, %v1423_v17 }
 0x2a5   :  { %v5118_v37 = vpop.eup %3053  ;;  %2762 = vst [vmem:[%s5855_s5 + $0x120] sm:$0xff] %v2379_v11  ;;  %v5124_v44 = vsub.f32 %v6016_v32, %v669_v23  ;;  %v5127_v5 = vsub.f32 %v6018_v57, %v669_v23  ;;  %v6022_v57 = vld [vmem:[#allocation10_spill] sm:$0xff] }
 0x2a6   :  { %v1425_v43 = vmul.f32 %v3052_v18, %v1424_v7  ;;  %v2512_v59 = vpop.f32.mrf.mxu2  ;;  %v1431_v25 = vmul.f32 %v5118_v37, %v5111_v16  ;;  %vm1437_vm12 = vweird.f32 %v5118_v37 }
 0x2a7   :  { %6017 = vst [vmem:[#allocation18_spill] sm:$0xff] %v5124_v44  ;;  %v2513_v49 = vadd.f32 %v2512_v59, %v4124_v8  ;;  %v2646_v21 = vpop.f32.mrf.mxu3  ;;  %v858_v62 = vmul.f32 %v5124_v44, %v5124_v44  ;;  %v859_v61 = vmul.f32 %v5127_v5, %v5127_v5  ;;  %v1898_v59 = vadd.f32 %v3671_v48, %v1792_v50  ;;  %vm1438_vm14 = vmor %vm1436_vm13, %vm1437_vm12 }
 0x2a8   :  { %6019 = vst [vmem:[#allocation19_spill] sm:$0xff] %v5127_v5  ;;  %v1429_v3 = vsel %vm1428_vm10, %v3052_v18, %v1425_v43  ;;  %v2246_v13 = vpop.f32.mrf.mxu0  ;;  %v975_v23 = vpop.xlane.xlu0 %974 }
 0x2a9   :  { %v1694_v53 = vmul.f32 %v3663_v47, %v1429_v3  ;;  %v1695_v45 = vmul.f32 %v3673_v2, %v1429_v3  ;;  %v2647_v17 = vadd.f32 %v2646_v21, %v2513_v49  ;;  %v2247_v63 = vadd.f32 %v2246_v13, %v4100_v27  ;;  %v2380_v11 = vpop.f32.mrf.mxu1  ;;  %v6023_v49 = vld [vmem:[#allocation11_spill] sm:$0xff] }
 0x2aa   :  { %v595_v7 = vpop.xlane.xlu2 %594  ;;  %v997_v32 = vadd.f32 %v859_v61, %v858_v62  ;;  %v1061_v18 = vmul.f32 %v975_v23, %v3208_v33  ;;  %v1899_v3 = vadd.f32 %v3695_v26, %v1793_v0  ;;  %v1432_v62 = vmul.f32 %v5118_v37, %v1431_v25  ;;  %v981_v61 = vpop.xlane.xlu1 %980 }
 0x2ab   :  { %2763 = vst [vmem:[%s5855_s5 + $0x128] sm:$0xff] %v2647_v17  ;;  %v2381_v42 = vadd.f32 %v2380_v11, %v2247_v63  ;;  %v670_v60 = vmul.f32 %v3208_v33, %v595_v7  ;;  %v1794_v43 = vmul.f32 %v1694_v53, %v6022_v57  ;;  %v1795_v21 = vmul.f32 %v1695_v45, %v6023_v49  ;;  %v6026_v17 = vld [vmem:[#allocation22_spill] sm:$0xff] }
 0x2ac   :  { %998 = vadd.xlane.f32.xlu1 %v997_v32  ;;  %v5151_v13 = vadd.f32 1e-05, %v1061_v18  ;;  %v1063_v50 = vmul.f32 %v981_v61, %v3208_v33  ;;  %v121_v63 = vlaneseq }
 0x2ad   :  { %2764 = vst [vmem:[%s5855_s5 + $0x130] sm:$0xff] %v2381_v42  ;;  %v5157_v15 = vsub.f32 %v6024_v40, %v670_v60  ;;  %v1900_v53 = vadd.f32 %v3671_v48, %v1794_v43  ;;  %v5162_v45 = vsub.f32 %v6026_v17, %v670_v60  ;;  %v1901_v25 = vadd.f32 %v3695_v26, %v1795_v21 }
 0x2ae   :  { %v2514_v0 = vpop.f32.mrf.mxu2  ;;  %3055 = vrsqrt.f32 %v5151_v13  ;;  %v5167_v7 = vadd.f32 1e-05, %v1063_v50  ;;  %v122_v60 = vshrl.u32 %v121_v63, 7  ;;  %v1433_v43 = vmul.f32 0.5, %v1432_v62  ;;  %v119_v62 = vld [vmem:[%s5850_s0 + $0x318] sm:$0xff] }
 0x2af   :  { %6025 = vst [vmem:[#allocation20_spill] sm:$0xff] %v5157_v15  ;;  %v2515_v11 = vadd.f32 %v2514_v0, %v4124_v8  ;;  %v1970_v23 = vpack.c.bf16 %v1900_v53, %v1898_v59  ;;  %v2648_v32 = vpop.f32.mrf.mxu3  ;;  %v1971_v18 = vpack.c.bf16 %v1901_v25, %v1899_v3  ;;  %v860_v42 = vmul.f32 %v5157_v15, %v5157_v15  ;;  %v118_v3 = vld [vmem:[%s5850_s0 + $0x310] sm:$0xff] }
 0x2b0   :  { %6027 = vst [vmem:[#allocation21_spill] sm:$0xff] %v5162_v45  ;;  %v861_v49 = vmul.f32 %v5162_v45, %v5162_v45  ;;  %v171_v59 = vadd.s32 392, %v122_v60  ;;  %3057 = vrsqrt.f32 %v5167_v7  ;;  %v1434_v40 = vsub.f32 1.5, %v1433_v43 }
 0x2b1   :  { %v2649_v57 = vadd.f32 %v2648_v32, %v2515_v11  ;;  %2268 = vmatmul.bf16.gmra.mxu0 %v1970_v23  ;;  %2536 = vmatmul.bf16.gmra.mxu2 %v1970_v23  ;;  %vm1446_vm15 = vweird.f32 %v5151_v13  ;;  %vm1466_vm4 = vweird.f32 %v5167_v7 }
 0x2b2   :  { %2402 = vmatmul.bf16.gmra.mxu1 %v1971_v18  ;;  %2670 = vmatmul.bf16.gmra.mxu3 %v1971_v18  ;;  %v1000_v21 = vadd.f32 %v861_v49, %v860_v42  ;;  %vm272_vm11 = vcmp.lt.s32.totalorder %v171_v59, 394  ;;  %v1435_v42 = vmul.f32 %v5118_v37, %v1434_v40 }
 0x2b3   :  { %2765 = vst [vmem:[%s5855_s5 + $0x138] sm:$0xff] %v2649_v57  ;;  %v978_v50 = vpop.xlane.xlu0 %977  ;;  %v5185_v0 = vsel %vm272_vm11, %v118_v3, 0.0  ;;  %v5187_v25 = vsel %vm272_vm11, %v119_v62, 0.0 }
 0x2b4   :  { %v3056_v61 = vpop.eup %3055  ;;  %1001 = vadd.xlane.f32.xlu1 %v1000_v21  ;;  %v1062_v17 = vmul.f32 %v978_v50, %v3208_v33  ;;  %6028 = vst [vmem:[#allocation12_spill] sm:$0xff] %v5187_v25  ;;  %v620_v60 = vadd.f32 %v5187_v25, %v5185_v0  ;;  %v1439_v50 = vsel %vm1438_vm14, %v5118_v37, %v1435_v42 }
 0x2b5   :  { %v1441_v53 = vmul.f32 %v3056_v61, %v5151_v13  ;;  %v984_v11 = vpop.xlane.xlu1 %983  ;;  %vm1447_vm0 = vweird.f32 %v3056_v61 }
 0x2b6   :  { %v1064_v23 = vmul.f32 %v984_v11, %v3208_v33  ;;  %v5190_v32 = vadd.f32 1e-05, %v1062_v17  ;;  %v5192_v18 = vpop.eup %3057  ;;  %v987_v43 = vpop.xlane.xlu2 %986  ;;  %vm1448_vm1 = vmor %vm1446_vm15, %vm1447_vm0 }
 0x2b7   :  { %v1442_v63 = vmul.f32 %v3056_v61, %v1441_v53  ;;  %v1065_v21 = vmul.f32 %v987_v43, %v3208_v33  ;;  %v1461_v3 = vmul.f32 %v5192_v18, %v5167_v7  ;;  %vm1467_vm5 = vweird.f32 %v5192_v18 }
 0x2b8   :  { %3059 = vrsqrt.f32 %v5190_v32  ;;  %v5203_v62 = vadd.f32 1e-05, %v1064_v23  ;;  %v1696_v23 = vmul.f32 %v3663_v47, %v1439_v50  ;;  %vm1456_vm2 = vweird.f32 %v5190_v32  ;;  %vm1468_vm7 = vmor %vm1466_vm4, %vm1467_vm5 }
 0x2b9   :  { %v1443_v57 = vmul.f32 0.5, %v1442_v63  ;;  %v2249_v59 = vpop.f32.mrf.mxu0  ;;  %v5208_v17 = vadd.f32 1e-05, %v1065_v21  ;;  %v1697_v21 = vmul.f32 %v3673_v2, %v1439_v50 }
 0x2ba   :  { %v2250_v40 = vadd.f32 %v2249_v59, %v4100_v27  ;;  %v2383_v53 = vpop.f32.mrf.mxu1  ;;  %v1462_v59 = vmul.f32 %v5192_v18, %v1461_v3  ;;  %3061 = vrsqrt.f32 %v5203_v62  ;;  %vm1476_vm8 = vweird.f32 %v5203_v62 }
 0x2bb   :  { %v1444_v49 = vsub.f32 1.5, %v1443_v57  ;;  %v598_v16 = vpop.xlane.xlu0 %597  ;;  %3063 = vrsqrt.f32 %v5208_v17  ;;  %vm1486_vm10 = vweird.f32 %v5208_v17 }
 0x2bc   :  { %621 = vadd.xlane.f32.xlu1 %v620_v60  ;;  %v2384_v63 = vadd.f32 %v2383_v53, %v2250_v40  ;;  %v671_v11 = vmul.f32 %v3208_v33, %v598_v16  ;;  %v1463_v5 = vmul.f32 0.5, %v1462_v59  ;;  %v6033_v59 = vld [vmem:[#allocation15_spill] sm:$0xff] }
 0x2bd   :  { %v1445_v57 = vmul.f32 %v3056_v61, %v1444_v49  ;;  %v604_v43 = vpop.xlane.xlu1 %603 }
 0x2be   :  { %v5211_v45 = vpop.eup %3059  ;;  %v673_v37 = vmul.f32 %v3208_v33, %v604_v43  ;;  %2766 = vst [vmem:[%s5855_s5 + $0x140] sm:$0xff] %v2384_v63  ;;  %v5224_v42 = vsub.f32 %v4845_v4, %v671_v11  ;;  %v5227_v60 = vsub.f32 %v4850_v51, %v671_v11 }
 0x2bf   :  { %v1451_v13 = vmul.f32 %v5211_v45, %v5190_v32  ;;  %v2517_v49 = vpop.f32.mrf.mxu2  ;;  %v1449_v63 = vsel %vm1448_vm1, %v3056_v61, %v1445_v57  ;;  %vm1457_vm3 = vweird.f32 %v5211_v45  ;;  %v6038_v32 = vld [vmem:[#allocation17_spill] sm:$0xff] }
 0x2c0   :  { %6029 = vst [vmem:[#allocation6_spill] sm:$0xff] %v5224_v42  ;;  %v5231_v3 = vsub.f32 %v4865_v31, %v673_v37  ;;  %v5234_v40 = vsub.f32 %v4870_v54, %v673_v37  ;;  %v2518_v53 = vadd.f32 %v2517_v49, %v4124_v8  ;;  %v2651_v16 = vpop.f32.mrf.mxu3  ;;  %v990_v31 = vpop.xlane.xlu2 %989  ;;  %v862_v37 = vmul.f32 %v5224_v42, %v5224_v42  ;;  %vm5276_vm6 = vmor %vm1456_vm2, %vm1457_vm3 }
 0x2c1   :  { %6030 = vst [vmem:[#allocation4_spill] sm:$0xff] %v5227_v60  ;;  %v2251_v43 = vpop.f32.mrf.mxu0  ;;  %v1452_v4 = vmul.f32 %v5211_v45, %v1451_v13  ;;  %v863_v61 = vmul.f32 %v5227_v60, %v5227_v60  ;;  %v5247_v57 = vpop.eup %3061  ;;  %v1699_v42 = vmul.f32 %v3673_v2, %v1449_v63 }
 0x2c2   :  { %6031 = vst [vmem:[#allocation5_spill] sm:$0xff] %v5231_v3  ;;  %v2652_v15 = vadd.f32 %v2651_v16, %v2518_v53  ;;  %v2252_v51 = vadd.f32 %v2251_v43, %v4100_v27  ;;  %v2385_v11 = vpop.f32.mrf.mxu1  ;;  %v866_v50 = vmul.f32 %v5231_v3, %v5231_v3  ;;  %v867_v54 = vmul.f32 %v5234_v40, %v5234_v40  ;;  %v6034_v16 = vld [vmem:[#allocation14_spill] sm:$0xff]  ;;  %v5254_v3 = vpop.eup %3063 }
 0x2c3   :  { %6032 = vst [vmem:[#allocation7_spill] sm:$0xff] %v5234_v40  ;;  %v601_v44 = vpop.xlane.xlu0 %600  ;;  %v1453_v13 = vmul.f32 0.5, %v1452_v4  ;;  %v1796_v53 = vmul.f32 %v1696_v23, %v6033_v59  ;;  %v1797_v43 = vmul.f32 %v1697_v21, %v6034_v16  ;;  %v1698_v40 = vmul.f32 %v3663_v47, %v1449_v63  ;;  %v6037_v59 = vld [vmem:[#allocation16_spill] sm:$0xff] }
 0x2c4   :  { %2767 = vst [vmem:[%s5855_s5 + $0x148] sm:$0xff] %v2652_v15  ;;  %v2386_v49 = vadd.f32 %v2385_v11, %v2252_v51  ;;  %v1009_v30 = vadd.f32 %v867_v54, %v866_v50  ;;  %v1003_v23 = vadd.f32 %v863_v61, %v862_v37  ;;  %v1464_v21 = vsub.f32 1.5, %v1463_v5 }
 0x2c5   :  { %v607_v60 = vpop.xlane.xlu1 %606  ;;  %v1454_v4 = vsub.f32 1.5, %v1453_v13  ;;  %v1471_v51 = vmul.f32 %v5247_v57, %v5203_v62  ;;  %v1481_v50 = vmul.f32 %v5254_v3, %v5208_v17  ;;  %v1902_v37 = vadd.f32 %v3671_v48, %v1796_v53 }
 0x2c6   :  { %v674_v15 = vmul.f32 %v3208_v33, %v607_v60  ;;  %2768 = vst [vmem:[%s5855_s5 + $0x150] sm:$0xff] %v2386_v49  ;;  %1010 = vadd.xlane.f32.xlu0 %v1009_v30  ;;  %v672_v60 = vmul.f32 %v3208_v33, %v601_v44  ;;  %1004 = vadd.xlane.f32.xlu2 %v1003_v23  ;;  %vm1477_vm9 = vweird.f32 %v5247_v57  ;;  %vm1487_vm11 = vweird.f32 %v5254_v3 }
 0x2c7   :  { %v2519_v63 = vpop.f32.mrf.mxu2  ;;  %v1455_v11 = vmul.f32 %v5211_v45, %v1454_v4  ;;  %v1903_v61 = vadd.f32 %v3695_v26, %v1797_v43  ;;  %v1798_v16 = vmul.f32 %v1698_v40, %v6037_v59  ;;  %v1799_v4 = vmul.f32 %v1699_v42, %v6038_v32  ;;  %vm1488_vm12 = vmor %vm1486_vm10, %vm1487_vm11 }
 0x2c8   :  { %v2653_v54 = vpop.f32.mrf.mxu3  ;;  %v2520_v5 = vadd.f32 %v2519_v63, %v4124_v8  ;;  %v5284_v44 = vsub.f32 %v4960_v35, %v674_v15  ;;  %v5287_v49 = vsub.f32 %v4965_v56, %v674_v15  ;;  %v1465_v23 = vmul.f32 %v5192_v18, %v1464_v21  ;;  %v610_v25 = vpop.xlane.xlu2 %609  ;;  %vm1478_vm13 = vmor %vm1476_vm8, %vm1477_vm9 }
 0x2c9   :  { %v2254_v13 = vpop.f32.mrf.mxu0  ;;  %v1472_v1 = vmul.f32 %v5247_v57, %v1471_v51  ;;  %v1066_v63 = vmul.f32 %v990_v31, %v3208_v33  ;;  %v1459_v35 = vsel %vm5276_vm6, %v5211_v45, %v1455_v11  ;;  %v1482_v56 = vmul.f32 %v5254_v3, %v1481_v50 }
 0x2ca   :  { %v2654_v53 = vadd.f32 %v2653_v54, %v2520_v5  ;;  %v5303_v42 = vsub.f32 %v4937_v52, %v672_v60  ;;  %v1904_v40 = vadd.f32 %v3671_v48, %v1798_v16  ;;  %v1905_v15 = vadd.f32 %v3695_v26, %v1799_v4 }
 0x2cb   :  { %v993_v43 = vpop.xlane.xlu0 %992  ;;  %v2388_v31 = vpop.f32.mrf.mxu1  ;;  %v2255_v7 = vadd.f32 %v2254_v13, %v4100_v27  ;;  %v675_v21 = vmul.f32 %v3208_v33, %v610_v25  ;;  %v5314_v51 = vsub.f32 %v4942_v34, %v672_v60  ;;  %v868_v11 = vmul.f32 %v5284_v44, %v5284_v44 }
 0x2cc   :  { %2769 = vst [vmem:[%s5855_s5 + $0x158] sm:$0xff] %v2654_v53  ;;  %v1067_v45 = vmul.f32 %v993_v43, %v3208_v33  ;;  %v1972_v52 = vpack.c.bf16 %v1904_v40, %v1902_v37  ;;  %v869_v50 = vmul.f32 %v5287_v49, %v5287_v49  ;;  %v1469_v54 = vsel %vm1468_vm7, %v5192_v18, %v1465_v23 }
 0x2cd   :  { %v1973_v30 = vpack.c.bf16 %v1905_v15, %v1903_v61  ;;  %v2389_v5 = vadd.f32 %v2388_v31, %v2255_v7  ;;  %v1473_v13 = vmul.f32 0.5, %v1472_v1  ;;  %v1700_v25 = vmul.f32 %v3663_v47, %v1459_v35 }
 0x2ce   :  { %v5322_v16 = vadd.f32 1e-05, %v1066_v63  ;;  %2273 = vmatmul.bf16.gmra.mxu0 %v1972_v52  ;;  %2541 = vmatmul.bf16.gmra.mxu2 %v1972_v52  ;;  %v5325_v34 = vsub.f32 %v4993_v10, %v675_v21  ;;  %v1483_v60 = vmul.f32 0.5, %v1482_v56  ;;  %v5330_v18 = vadd.f32 1e-05, %v1067_v45 }
 0x2cf   :  { %v2522_v59 = vpop.f32.mrf.mxu2  ;;  %2407 = vmatmul.bf16.gmra.mxu1 %v1973_v30  ;;  %2675 = vmatmul.bf16.gmra.mxu3 %v1973_v30  ;;  %2770 = vst [vmem:[%s5855_s5 + $0x160] sm:$0xff] %v2389_v5  ;;  %v1012_v37 = vadd.f32 %v869_v50, %v868_v11  ;;  %v864_v1 = vmul.f32 %v5303_v42, %v5303_v42  ;;  %v1474_v45 = vsub.f32 1.5, %v1473_v13 }
 0x2d0   :  { %v5335_v32 = vsub.f32 %v4998_v9, %v675_v21  ;;  %v865_v10 = vmul.f32 %v5314_v51, %v5314_v51  ;;  %v2523_v4 = vadd.f32 %v2522_v59, %v4124_v8  ;;  %v1702_v53 = vmul.f32 %v3663_v47, %v1469_v54  ;;  %v613_v56 = vpop.xlane.xlu2 %612 }
 0x2d1   :  { %v2256_v61 = vpop.f32.mrf.mxu0  ;;  %v1701_v43 = vmul.f32 %v3673_v2, %v1459_v35  ;;  %3065 = vrsqrt.f32 %v5330_v18  ;;  %1013 = vadd.xlane.f32.xlu1 %v1012_v37  ;;  %v676_v7 = vmul.f32 %v3208_v33, %v613_v56  ;;  %v1703_v21 = vmul.f32 %v3673_v2, %v1469_v54  ;;  %v6039_v37 = vld [vmem:[#allocation8_spill] sm:$0xff] }
 0x2d2   :  { %v2656_v23 = vpop.f32.mrf.mxu3  ;;  %v2257_v63 = vadd.f32 %v2256_v61, %v4100_v27  ;;  %3067 = vrsqrt.f32 %v5322_v16  ;;  %v1006_v9 = vadd.f32 %v865_v10, %v864_v1  ;;  %v1484_v11 = vsub.f32 1.5, %v1483_v60 }
 0x2d3   :  { %v5344_v40 = vpop.xlane.xlu0 %995  ;;  %v2657_v31 = vadd.f32 %v2656_v23, %v2523_v4  ;;  %v2390_v15 = vpop.f32.mrf.mxu1  ;;  %v870_v35 = vmul.f32 %v5325_v34, %v5325_v34  ;;  %v871_v50 = vmul.f32 %v5335_v32, %v5335_v32  ;;  %v1800_v30 = vmul.f32 %v1700_v25, %v4769_v14 }
 0x2d4   :  { %v2391_v52 = vadd.f32 %v2390_v15, %v2257_v63  ;;  %1007 = vadd.xlane.f32.xlu2 %v1006_v9  ;;  %v5361_v54 = vsub.f32 %v5037_v28, %v676_v7  ;;  %v1801_v59 = vmul.f32 %v1701_v43, %v4780_v38  ;;  %v5366_v13 = vsub.f32 %v5042_v41, %v676_v7  ;;  %v6040_v28 = vld [vmem:[#allocation23_spill] sm:$0xff] }
 0x2d5   :  { %2771 = vst [vmem:[%s5855_s5 + $0x168] sm:$0xff] %v2657_v31  ;;  %v1802_v1 = vmul.f32 %v1702_v53, %v6039_v37  ;;  %v1803_v25 = vmul.f32 %v1703_v21, %v6040_v28  ;;  %v1475_v41 = vmul.f32 %v5247_v57, %v1474_v45  ;;  %v1485_v10 = vmul.f32 %v5254_v3, %v1484_v11 }
 0x2d6   :  { %2772 = vst [vmem:[%s5855_s5 + $0x170] sm:$0xff] %v2391_v52  ;;  %v1015_v4 = vadd.f32 %v871_v50, %v870_v35  ;;  %v1906_v63 = vadd.f32 %v3671_v48, %v1800_v30  ;;  %v1907_v56 = vadd.f32 %v3695_v26, %v1801_v59  ;;  %v872_v31 = vmul.f32 %v5361_v54, %v5361_v54 }
 0x2d7   :  { %v2524_v5 = vpop.f32.mrf.mxu2  ;;  %v5370_v14 = vpop.eup %3065  ;;  %v1908_v15 = vadd.f32 %v3671_v48, %v1802_v1  ;;  %v873_v52 = vmul.f32 %v5366_v13, %v5366_v13  ;;  %v1909_v17 = vadd.f32 %v3695_v26, %v1803_v25  ;;  %v1489_v62 = vsel %vm1488_vm12, %v5254_v3, %v1485_v10 }
 0x2d8   :  { %v2525_v60 = vadd.f32 %v2524_v5, %v4124_v8  ;;  %v5376_v61 = vpop.eup %3067  ;;  %v1501_v53 = vmul.f32 %v5370_v14, %v5330_v18  ;;  %v1479_v28 = vsel %vm1478_vm13, %v5247_v57, %v1475_v41  ;;  %v1706_v57 = vmul.f32 %v3663_v47, %v1489_v62 }
 0x2d9   :  { %v2259_v38 = vpop.f32.mrf.mxu0  ;;  %v1491_v11 = vmul.f32 %v5376_v61, %v5322_v16  ;;  %v1974_v35 = vpack.c.bf16 %v1908_v15, %v1906_v63  ;;  %v1018_v37 = vadd.f32 %v873_v52, %v872_v31  ;;  %v1705_v15 = vmul.f32 %v3673_v2, %v1479_v28 }
 0x2da   :  { %v2658_v23 = vpop.f32.mrf.mxu3  ;;  %v2260_v7 = vadd.f32 %v2259_v38, %v4100_v27  ;;  %v1502_v59 = vmul.f32 %v5370_v14, %v1501_v53  ;;  %vm1506_vm14 = vweird.f32 %v5330_v18  ;;  %vm1507_vm15 = vweird.f32 %v5370_v14 }
 0x2db   :  { %v2659_v43 = vadd.f32 %v2658_v23, %v2525_v60  ;;  %v616_v9 = vpop.xlane.xlu0 %615  ;;  %v2393_v21 = vpop.f32.mrf.mxu1  ;;  %v1975_v60 = vpack.c.bf16 %v1909_v17, %v1907_v56  ;;  %1019 = vadd.xlane.f32.xlu0 %v1018_v37  ;;  %v1704_v56 = vmul.f32 %v3663_v47, %v1479_v28  ;;  %vm1496_vm0 = vweird.f32 %v5322_v16  ;;  %vm1508_vm2 = vmor %vm1506_vm14, %vm1507_vm15 }
 0x2dc   :  { %v677_v45 = vmul.f32 %v3208_v33, %v616_v9  ;;  %1016 = vadd.xlane.f32.xlu2 %v1015_v4  ;;  %v2394_v50 = vadd.f32 %v2393_v21, %v2260_v7  ;;  %v1707_v4 = vmul.f32 %v3673_v2, %v1489_v62  ;;  %v1503_v23 = vmul.f32 0.5, %v1502_v59 }
 0x2dd   :  { %2773 = vst [vmem:[%s5855_s5 + $0x178] sm:$0xff] %v2659_v43  ;;  %v1804_v59 = vmul.f32 %v1704_v56, %v4784_v58  ;;  %vm1497_vm1 = vweird.f32 %v5376_v61 }
 0x2de   :  { %v5404_v30 = vsub.f32 %v5067_v24, %v677_v45  ;;  %v5407_v5 = vsub.f32 %v5072_v6, %v677_v45  ;;  %2278 = vmatmul.bf16.gmra.mxu0 %v1974_v35  ;;  %2546 = vmatmul.bf16.gmra.mxu2 %v1974_v35  ;;  %2774 = vst [vmem:[%s5855_s5 + $0x180] sm:$0xff] %v2394_v50  ;;  %v1504_v17 = vsub.f32 1.5, %v1503_v23  ;;  %vm1498_vm3 = vmor %vm1496_vm0, %vm1497_vm1 }
 0x2df   :  { %v2527_v1 = vpop.f32.mrf.mxu2  ;;  %v1492_v6 = vmul.f32 %v5376_v61, %v1491_v11  ;;  %2412 = vmatmul.bf16.gmra.mxu1 %v1975_v60  ;;  %2680 = vmatmul.bf16.gmra.mxu3 %v1975_v60  ;;  %v1806_v11 = vmul.f32 %v1706_v57, %v4805_v55  ;;  %v1807_v50 = vmul.f32 %v1707_v4, %v4808_v22 }
 0x2e0   :  { %v2528_v24 = vadd.f32 %v2527_v1, %v4124_v8  ;;  %v874_v25 = vmul.f32 %v5404_v30, %v5404_v30  ;;  %v875_v38 = vmul.f32 %v5407_v5, %v5407_v5  ;;  %v1805_v55 = vmul.f32 %v1705_v15, %v4790_v29 }
 0x2e1   :  { %v2261_v3 = vpop.f32.mrf.mxu0  ;;  %v1493_v7 = vmul.f32 0.5, %v1492_v6  ;;  %v1912_v1 = vadd.f32 %v3671_v48, %v1806_v11  ;;  %v1913_v18 = vadd.f32 %v3695_v26, %v1807_v50 }
 0x2e2   :  { %v2661_v41 = vpop.f32.mrf.mxu3  ;;  %v2262_v10 = vadd.f32 %v2261_v3, %v4100_v27  ;;  %v1021_v43 = vadd.f32 %v875_v38, %v874_v25  ;;  %v1910_v3 = vadd.f32 %v3671_v48, %v1804_v59  ;;  %v1911_v38 = vadd.f32 %v3695_v26, %v1805_v55 }
 0x2e3   :  { %v2662_v63 = vadd.f32 %v2661_v41, %v2528_v24  ;;  %v619_v53 = vpop.xlane.xlu0 %618  ;;  %v2395_v9 = vpop.f32.mrf.mxu1  ;;  %v1494_v60 = vsub.f32 1.5, %v1493_v7  ;;  %v1505_v24 = vmul.f32 %v5370_v14, %v1504_v17 }
 0x2e4   :  { %v678_v31 = vmul.f32 %v3208_v33, %v619_v53  ;;  %v2396_v21 = vadd.f32 %v2395_v9, %v2262_v10  ;;  %1022 = vadd.xlane.f32.xlu1 %v1021_v43  ;;  %v1976_v41 = vpack.c.bf16 %v1912_v1, %v1910_v3  ;;  %v1977_v4 = vpack.c.bf16 %v1913_v18, %v1911_v38 }
 0x2e5   :  { %2775 = vst [vmem:[%s5855_s5 + $0x188] sm:$0xff] %v2662_v63  ;;  %v1495_v25 = vmul.f32 %v5376_v61, %v1494_v60  ;;  %v1509_v10 = vsel %vm1508_vm2, %v5370_v14, %v1505_v24 }
 0x2e6   :  { %v5431_v45 = vsub.f32 %v5094_v19, %v678_v31  ;;  %v5434_v52 = vsub.f32 %v5099_v46, %v678_v31  ;;  %2776 = vst [vmem:[%s5855_s5 + $0x190] sm:$0xff] %v2396_v21  ;;  %v1710_v16 = vmul.f32 %v3663_v47, %v1509_v10  ;;  %v1711_v9 = vmul.f32 %v3673_v2, %v1509_v10 }
 0x2e7   :  { %v2529_v35 = vpop.f32.mrf.mxu2  ;;  %v1499_v53 = vsel %vm1498_vm3, %v5376_v61, %v1495_v25 }
 0x2e8   :  { %v2530_v62 = vadd.f32 %v2529_v35, %v4124_v8  ;;  %v876_v19 = vmul.f32 %v5431_v45, %v5431_v45  ;;  %v877_v46 = vmul.f32 %v5434_v52, %v5434_v52  ;;  %v1708_v15 = vmul.f32 %v3663_v47, %v1499_v53 }
 0x2e9   :  { %v2264_v37 = vpop.f32.mrf.mxu0  ;;  %v1709_v21 = vmul.f32 %v3673_v2, %v1499_v53  ;;  %v1810_v11 = vmul.f32 %v1710_v16, %v4968_v20  ;;  %v1811_v35 = vmul.f32 %v1711_v9, %v4971_v36 }
 0x2ea   :  { %v2663_v22 = vpop.f32.mrf.mxu3  ;;  %v2265_v58 = vadd.f32 %v2264_v37, %v4100_v27  ;;  %v1024_v28 = vadd.f32 %v877_v46, %v876_v19 }
 0x2eb   :  { %v2664_v6 = vadd.f32 %v2663_v22, %v2530_v62  ;;  %v2398_v29 = vpop.f32.mrf.mxu1  ;;  %v1808_v62 = vmul.f32 %v1708_v15, %v4900_v12  ;;  %v1809_v59 = vmul.f32 %v1709_v21, %v4907_v39  ;;  %v1916_v46 = vadd.f32 %v3671_v48, %v1810_v11  ;;  %v6041_v11 = vld [vmem:[#allocation12_spill] sm:$0xff] }
 0x2ec   :  { %1025 = vadd.xlane.f32.xlu2 %v1024_v28  ;;  %v2399_v57 = vadd.f32 %v2398_v29, %v2265_v58  ;;  %v1917_v55 = vadd.f32 %v3695_v26, %v1811_v35  ;;  %v1068_v12 = vmul.f32 %v5344_v40, %v3208_v33 }
 0x2ed   :  { %2777 = vst [vmem:[%s5855_s5 + $0x198] sm:$0xff] %v2664_v6  ;;  %v1914_v20 = vadd.f32 %v3671_v48, %v1808_v62  ;;  %v1915_v36 = vadd.f32 %v3695_v26, %v1809_v59 }
 0x2ee   :  { %2778 = vst [vmem:[%s5855_s5 + $0x1a0] sm:$0xff] %v2399_v57  ;;  %2283 = vmatmul.bf16.gmra.mxu0 %v1976_v41  ;;  %2551 = vmatmul.bf16.gmra.mxu2 %v1976_v41  ;;  %v1118_v39 = vadd.f32 1e-05, %v1068_v12 }
 0x2ef   :  { %v2532_v23 = vpop.f32.mrf.mxu2  ;;  %2417 = vmatmul.bf16.gmra.mxu1 %v1977_v4  ;;  %2685 = vmatmul.bf16.gmra.mxu3 %v1977_v4  ;;  %v1978_v37 = vpack.c.bf16 %v1916_v46, %v1914_v20  ;;  %v1979_v22 = vpack.c.bf16 %v1917_v55, %v1915_v36 }
 0x2f0   :  { %v2533_v63 = vadd.f32 %v2532_v23, %v4124_v8  ;;  %3069 = vrsqrt.f32 %v1118_v39  ;;  %vm1516_vm4 = vweird.f32 %v1118_v39 }
 0x2f1   :  { %v2266_v43 = vpop.f32.mrf.mxu0 }
 0x2f2   :  { %v2666_v56 = vpop.f32.mrf.mxu3  ;;  %v2267_v14 = vadd.f32 %v2266_v43, %v4100_v27 }
 0x2f3   :  { %v2667_v31 = vadd.f32 %v2666_v56, %v2533_v63  ;;  %v2400_v7 = vpop.f32.mrf.mxu1 }
 0x2f4   :  { %v2401_v61 = vadd.f32 %v2400_v7, %v2267_v14 }
 0x2f5   :  { %2779 = vst [vmem:[%s5855_s5 + $0x1a8] sm:$0xff] %v2667_v31 }
 0x2f6   :  { %2780 = vst [vmem:[%s5855_s5 + $0x1b0] sm:$0xff] %v2401_v61  ;;  %v3070_v1 = vpop.eup %3069 }
 0x2f7   :  { %v2534_v17 = vpop.f32.mrf.mxu2  ;;  %v1511_v58 = vmul.f32 %v3070_v1, %v1118_v39  ;;  %vm1517_vm5 = vweird.f32 %v3070_v1 }
 0x2f8   :  { %v2535_v50 = vadd.f32 %v2534_v17, %v4124_v8  ;;  %vm1518_vm6 = vmor %vm1516_vm4, %vm1517_vm5 }
 0x2f9   :  { %v1512_v28 = vmul.f32 %v3070_v1, %v1511_v58 }
 0x2fa   :  { %v2668_v19 = vpop.f32.mrf.mxu3 }
 0x2fb   :  { %v2669_v60 = vadd.f32 %v2668_v19, %v2535_v50  ;;  %v1513_v18 = vmul.f32 0.5, %v1512_v28  ;;  %v6042_v19 = vld [vmem:[#allocation2_spill] sm:$0xff] }
 0x2fd   :  { %2781 = vst [vmem:[%s5855_s5 + $0x1b8] sm:$0xff] %v2669_v60  ;;  %v1514_v29 = vsub.f32 1.5, %v1513_v18  ;;  %v6043_v60 = vld [vmem:[#allocation3_spill] sm:$0xff] }
 0x2fe   :  { %2288 = vmatmul.bf16.gmra.mxu0 %v1978_v37  ;;  %2556 = vmatmul.bf16.gmra.mxu2 %v1978_v37  ;;  %v6045_v18 = vld [vmem:[#allocation19_spill] sm:$0xff] }
 0x2ff   :  { %2422 = vmatmul.bf16.gmra.mxu1 %v1979_v22  ;;  %2690 = vmatmul.bf16.gmra.mxu3 %v1979_v22  ;;  %v1515_v25 = vmul.f32 %v3070_v1, %v1514_v29 }
 0x301   :  { %v1519_v4 = vsel %vm1518_vm6, %v3070_v1, %v1515_v25 }
 0x302   :  { %v1712_v56 = vmul.f32 %v3663_v47, %v1519_v4  ;;  %v1713_v14 = vmul.f32 %v3673_v2, %v1519_v4 }
 0x304   :  { %v1812_v46 = vmul.f32 %v1712_v56, %v6042_v19  ;;  %v1813_v55 = vmul.f32 %v1713_v14, %v6043_v60 }
 0x31f   :  { %v999_v24 = vpop.xlane.xlu1 %998 }
 0x320   :  { %v1069_v6 = vmul.f32 %v999_v24, %v3208_v33  ;;  %v6044_v24 = vld [vmem:[#allocation18_spill] sm:$0xff] }
 0x322   :  { %v1119_v3 = vadd.f32 1e-05, %v1069_v6 }
 0x324   :  { %3071 = vrsqrt.f32 %v1119_v3  ;;  %vm1526_vm8 = vweird.f32 %v1119_v3 }
 0x327   :  { %v1002_v38 = vpop.xlane.xlu1 %1001 }
 0x328   :  { %v1070_v40 = vmul.f32 %v1002_v38, %v3208_v33  ;;  %v1918_v38 = vadd.f32 %v3671_v48, %v1812_v46 }
 0x32a   :  { %v3072_v57 = vpop.eup %3071  ;;  %v5497_v10 = vadd.f32 1e-05, %v1070_v40  ;;  %v1919_v40 = vadd.f32 %v3695_v26, %v1813_v55 }
 0x32b   :  { %v1521_v41 = vmul.f32 %v3072_v57, %v1119_v3  ;;  %vm1527_vm7 = vweird.f32 %v3072_v57 }
 0x32c   :  { %3073 = vrsqrt.f32 %v5497_v10  ;;  %vm1528_vm9 = vmor %vm1526_vm8, %vm1527_vm7  ;;  %vm1536_vm11 = vweird.f32 %v5497_v10 }
 0x32d   :  { %v1522_v23 = vmul.f32 %v3072_v57, %v1521_v41 }
 0x32e   :  { %v2269_v63 = vpop.f32.mrf.mxu0 }
 0x32f   :  { %v1523_v53 = vmul.f32 0.5, %v1522_v23  ;;  %v2270_v43 = vadd.f32 %v2269_v63, %v4100_v27  ;;  %v2403_v16 = vpop.f32.mrf.mxu1  ;;  %v622_v31 = vpop.xlane.xlu1 %621 }
 0x330   :  { %v679_v7 = vmul.f32 %v3208_v33, %v622_v31 }
 0x331   :  { %v1524_v9 = vsub.f32 1.5, %v1523_v53  ;;  %v2404_v15 = vadd.f32 %v2403_v16, %v2270_v43 }
 0x332   :  { %v5508_v61 = vsub.f32 %v5185_v0, %v679_v7  ;;  %v5511_v17 = vsub.f32 %v6041_v11, %v679_v7  ;;  %v3074_v20 = vpop.eup %3073 }
 0x333   :  { %v1525_v21 = vmul.f32 %v3072_v57, %v1524_v9  ;;  %2782 = vst [vmem:[%s5855_s5 + $0x1c0] sm:$0xff] %v2404_v15  ;;  %v1531_v29 = vmul.f32 %v3074_v20, %v5497_v10  ;;  %vm1537_vm10 = vweird.f32 %v3074_v20 }
 0x334   :  { %v2537_v35 = vpop.f32.mrf.mxu2  ;;  %v878_v0 = vmul.f32 %v5508_v61, %v5508_v61  ;;  %v879_v12 = vmul.f32 %v5511_v17, %v5511_v17  ;;  %vm1538_vm12 = vmor %vm1536_vm11, %vm1537_vm10 }
 0x335   :  { %v1529_v50 = vsel %vm1528_vm9, %v3072_v57, %v1525_v21  ;;  %v2538_v62 = vadd.f32 %v2537_v35, %v4124_v8  ;;  %v2671_v59 = vpop.f32.mrf.mxu3  ;;  %v1532_v53 = vmul.f32 %v3074_v20, %v1531_v29 }
 0x336   :  { %v1714_v36 = vmul.f32 %v3663_v47, %v1529_v50  ;;  %v1715_v37 = vmul.f32 %v3673_v2, %v1529_v50  ;;  %v2271_v22 = vpop.f32.mrf.mxu0  ;;  %v1027_v28 = vadd.f32 %v879_v12, %v878_v0 }
 0x337   :  { %v2672_v39 = vadd.f32 %v2671_v59, %v2538_v62  ;;  %v2272_v1 = vadd.f32 %v2271_v22, %v4100_v27  ;;  %v2405_v58 = vpop.f32.mrf.mxu1  ;;  %v1533_v21 = vmul.f32 0.5, %v1532_v53 }
 0x338   :  { %v1814_v6 = vmul.f32 %v1714_v36, %v6044_v24  ;;  %v1815_v3 = vmul.f32 %v1715_v37, %v6045_v18  ;;  %1028 = vadd.xlane.f32.xlu0 %v1027_v28 }
 0x339   :  { %2783 = vst [vmem:[%s5855_s5 + $0x1c8] sm:$0xff] %v2672_v39  ;;  %v2406_v25 = vadd.f32 %v2405_v58, %v2272_v1  ;;  %v1011_v43 = vpop.xlane.xlu0 %1010  ;;  %v1005_v56 = vpop.xlane.xlu2 %1004  ;;  %v1534_v35 = vsub.f32 1.5, %v1533_v21  ;;  %v6048_v21 = vld [vmem:[#allocation6_spill] sm:$0xff] }
 0x33a   :  { %v1920_v57 = vadd.f32 %v3671_v48, %v1814_v6  ;;  %v1921_v41 = vadd.f32 %v3695_v26, %v1815_v3  ;;  %v1073_v14 = vmul.f32 %v1011_v43, %v3208_v33  ;;  %v1071_v31 = vmul.f32 %v1005_v56, %v3208_v33  ;;  %v6047_v56 = vld [vmem:[#allocation21_spill] sm:$0xff] }
 0x33b   :  { %2784 = vst [vmem:[%s5855_s5 + $0x1d0] sm:$0xff] %v2406_v25  ;;  %v1535_v59 = vmul.f32 %v3074_v20, %v1534_v35  ;;  %v6049_v35 = vld [vmem:[#allocation4_spill] sm:$0xff] }
 0x33c   :  { %v2539_v4 = vpop.f32.mrf.mxu2  ;;  %v1980_v23 = vpack.c.bf16 %v1920_v57, %v1918_v38  ;;  %v1981_v63 = vpack.c.bf16 %v1921_v41, %v1919_v40  ;;  %v5539_v7 = vadd.f32 1e-05, %v1073_v14  ;;  %v1121_v11 = vadd.f32 1e-05, %v1071_v31  ;;  %v6046_v40 = vld [vmem:[#allocation20_spill] sm:$0xff] }
 0x33d   :  { %v2540_v16 = vadd.f32 %v2539_v4, %v4124_v8  ;;  %v2673_v9 = vpop.f32.mrf.mxu3  ;;  %v1539_v0 = vsel %vm1538_vm12, %v3074_v20, %v1535_v59 }
 0x33e   :  { %2293 = vmatmul.bf16.gmra.mxu0 %v1980_v23  ;;  %2427 = vmatmul.bf16.gmra.mxu1 %v1981_v63  ;;  %3075 = vrsqrt.f32 %v5539_v7  ;;  %vm1546_vm13 = vweird.f32 %v1121_v11  ;;  %v1716_v28 = vmul.f32 %v3663_v47, %v1539_v0  ;;  %v1717_v3 = vmul.f32 %v3673_v2, %v1539_v0 }
 0x33f   :  { %v2674_v15 = vadd.f32 %v2673_v9, %v2540_v16  ;;  %2561 = vmatmul.bf16.gmra.mxu2 %v1980_v23  ;;  %2695 = vmatmul.bf16.gmra.mxu3 %v1981_v63  ;;  %3077 = vrsqrt.f32 %v1121_v11  ;;  %vm1566_vm0 = vweird.f32 %v5539_v7 }
 0x340   :  { %v1816_v41 = vmul.f32 %v1716_v28, %v6046_v40  ;;  %v1817_v14 = vmul.f32 %v1717_v3, %v6047_v56 }
 0x341   :  { %2785 = vst [vmem:[%s5855_s5 + $0x1d8] sm:$0xff] %v2674_v15 }
 0x344   :  { %v5545_v50 = vpop.eup %3075  ;;  %v1014_v46 = vpop.xlane.xlu1 %1013 }
 0x345   :  { %v3078_v62 = vpop.eup %3077  ;;  %v1561_v19 = vmul.f32 %v5545_v50, %v5539_v7  ;;  %v1074_v55 = vmul.f32 %v1014_v46, %v3208_v33  ;;  %vm1567_vm1 = vweird.f32 %v5545_v50 }
 0x346   :  { %v1541_v60 = vmul.f32 %v3078_v62, %v1121_v11  ;;  %vm1547_vm14 = vweird.f32 %v3078_v62  ;;  %vm1568_vm2 = vmor %vm1566_vm0, %vm1567_vm1 }
 0x347   :  { %v5551_v37 = vadd.f32 1e-05, %v1074_v55  ;;  %v1008_v22 = vpop.xlane.xlu2 %1007  ;;  %v1562_v12 = vmul.f32 %v5545_v50, %v1561_v19  ;;  %vm1548_vm15 = vmor %vm1546_vm13, %vm1547_vm14  ;;  %v1922_v55 = vadd.f32 %v3671_v48, %v1816_v41 }
 0x348   :  { %v1542_v36 = vmul.f32 %v3078_v62, %v1541_v60  ;;  %v1072_v39 = vmul.f32 %v1008_v22, %v3208_v33 }
 0x349   :  { %3079 = vrsqrt.f32 %v5551_v37  ;;  %v1563_v6 = vmul.f32 0.5, %v1562_v12  ;;  %vm1576_vm8 = vweird.f32 %v5551_v37 }
 0x34a   :  { %v1543_v1 = vmul.f32 0.5, %v1542_v36  ;;  %v5555_v58 = vadd.f32 1e-05, %v1072_v39 }
 0x34b   :  { %v2274_v10 = vpop.f32.mrf.mxu0  ;;  %v1564_v63 = vsub.f32 1.5, %v1563_v6  ;;  %v1923_v6 = vadd.f32 %v3695_v26, %v1817_v14 }
 0x34c   :  { %v1544_v24 = vsub.f32 1.5, %v1543_v1  ;;  %3081 = vrsqrt.f32 %v5555_v58  ;;  %v2275_v20 = vadd.f32 %v2274_v10, %v4100_v27  ;;  %v2408_v18 = vpop.f32.mrf.mxu1  ;;  %vm1556_vm3 = vweird.f32 %v5555_v58 }
 0x34d   :  { %v1565_v36 = vmul.f32 %v5545_v50, %v1564_v63 }
 0x34e   :  { %v1545_v29 = vmul.f32 %v3078_v62, %v1544_v24  ;;  %v2409_v25 = vadd.f32 %v2408_v18, %v2275_v20  ;;  %v1020_v60 = vpop.xlane.xlu0 %1019 }
 0x34f   :  { %v1017_v57 = vpop.xlane.xlu2 %1016  ;;  %v5568_v53 = vpop.eup %3079  ;;  %v1076_v28 = vmul.f32 %v1020_v60, %v3208_v33 }
 0x350   :  { %v1549_v38 = vsel %vm1548_vm15, %v3078_v62, %v1545_v29  ;;  %2786 = vst [vmem:[%s5855_s5 + $0x1e0] sm:$0xff] %v2409_v25  ;;  %v1075_v43 = vmul.f32 %v1017_v57, %v3208_v33  ;;  %v1571_v22 = vmul.f32 %v5568_v53, %v5551_v37  ;;  %v1569_v25 = vsel %vm1568_vm2, %v5545_v50, %v1565_v36 }
 0x351   :  { %v1718_v4 = vmul.f32 %v3663_v47, %v1549_v38  ;;  %v1719_v23 = vmul.f32 %v3673_v2, %v1549_v38  ;;  %v2542_v16 = vpop.f32.mrf.mxu2  ;;  %v5604_v41 = vadd.f32 1e-05, %v1076_v28  ;;  %vm1577_vm9 = vweird.f32 %v5568_v53 }
 0x352   :  { %v3082_v9 = vpop.eup %3081  ;;  %v2543_v31 = vadd.f32 %v2542_v16, %v4124_v8  ;;  %v2676_v15 = vpop.f32.mrf.mxu3  ;;  %v5578_v19 = vadd.f32 1e-05, %v1075_v43  ;;  %v1572_v57 = vmul.f32 %v5568_v53, %v1571_v22  ;;  %vm1578_vm11 = vmor %vm1576_vm8, %vm1577_vm9 }
 0x353   :  { %v1818_v11 = vmul.f32 %v1718_v4, %v6048_v21  ;;  %v1819_v62 = vmul.f32 %v1719_v23, %v6049_v35  ;;  %v1551_v59 = vmul.f32 %v3082_v9, %v5555_v58  ;;  %v2276_v46 = vpop.f32.mrf.mxu0  ;;  %vm1557_vm4 = vweird.f32 %v3082_v9 }
 0x354   :  { %v2677_v0 = vadd.f32 %v2676_v15, %v2543_v31  ;;  %v2277_v12 = vadd.f32 %v2276_v46, %v4100_v27  ;;  %v2410_v39 = vpop.f32.mrf.mxu1  ;;  %3083 = vrsqrt.f32 %v5578_v19  ;;  %vm5610_vm5 = vmor %vm1556_vm3, %vm1557_vm4  ;;  %v1722_v31 = vmul.f32 %v3663_v47, %v1569_v25 }
 0x355   :  { %v1552_v1 = vmul.f32 %v3082_v9, %v1551_v59  ;;  %v1924_v24 = vadd.f32 %v3671_v48, %v1818_v11  ;;  %v1925_v20 = vadd.f32 %v3695_v26, %v1819_v62  ;;  %v1723_v35 = vmul.f32 %v3673_v2, %v1569_v25 }
 0x356   :  { %2787 = vst [vmem:[%s5855_s5 + $0x1e8] sm:$0xff] %v2677_v0  ;;  %v2411_v10 = vadd.f32 %v2410_v39, %v2277_v12  ;;  %v1573_v62 = vmul.f32 0.5, %v1572_v57  ;;  %vm1586_vm6 = vweird.f32 %v5578_v19  ;;  %v6052_v39 = vld [vmem:[#allocation5_spill] sm:$0xff]  ;;  %vm1596_vm14 = vweird.f32 %v5604_v41 }
 0x357   :  { %v1023_v7 = vpop.xlane.xlu1 %1022  ;;  %v1553_v18 = vmul.f32 0.5, %v1552_v1  ;;  %v1982_v3 = vpack.c.bf16 %v1924_v24, %v1922_v55  ;;  %v1983_v38 = vpack.c.bf16 %v1925_v20, %v1923_v6  ;;  %v1822_v1 = vmul.f32 %v1722_v31, %v6052_v39  ;;  %v6053_v24 = vld [vmem:[#allocation7_spill] sm:$0xff] }
 0x358   :  { %v1077_v29 = vmul.f32 %v1023_v7, %v3208_v33  ;;  %2788 = vst [vmem:[%s5855_s5 + $0x1f0] sm:$0xff] %v2411_v10  ;;  %v1823_v10 = vmul.f32 %v1723_v35, %v6053_v24  ;;  %v1574_v6 = vsub.f32 1.5, %v1573_v62 }
 0x359   :  { %v1554_v40 = vsub.f32 1.5, %v1553_v18  ;;  %v2544_v4 = vpop.f32.mrf.mxu2  ;;  %2298 = vmatmul.bf16.gmra.mxu0 %v1982_v3  ;;  %2566 = vmatmul.bf16.gmra.mxu2 %v1982_v3 }
 0x35a   :  { %v5606_v23 = vadd.f32 1e-05, %v1077_v29  ;;  %v2545_v50 = vadd.f32 %v2544_v4, %v4124_v8  ;;  %v2678_v43 = vpop.f32.mrf.mxu3  ;;  %2432 = vmatmul.bf16.gmra.mxu1 %v1983_v38  ;;  %2700 = vmatmul.bf16.gmra.mxu3 %v1983_v38  ;;  %v3084_v16 = vpop.eup %3083  ;;  %v1928_v4 = vadd.f32 %v3671_v48, %v1822_v1 }
 0x35b   :  { %v1555_v56 = vmul.f32 %v3082_v9, %v1554_v40  ;;  %v2279_v14 = vpop.f32.mrf.mxu0  ;;  %v1581_v15 = vmul.f32 %v3084_v16, %v5578_v19  ;;  %vm1587_vm7 = vweird.f32 %v3084_v16 }
 0x35c   :  { %3085 = vrsqrt.f32 %v5606_v23  ;;  %v2679_v21 = vadd.f32 %v2678_v43, %v2545_v50  ;;  %v2280_v58 = vadd.f32 %v2279_v14, %v4100_v27  ;;  %v2413_v11 = vpop.f32.mrf.mxu1  ;;  %vm1588_vm10 = vmor %vm1586_vm6, %vm1587_vm7  ;;  %v1575_v50 = vmul.f32 %v5568_v53, %v1574_v6 }
 0x35d   :  { %v1559_v59 = vsel %vm5610_vm5, %v3082_v9, %v1555_v56  ;;  %3087 = vrsqrt.f32 %v5604_v41  ;;  %v1582_v55 = vmul.f32 %v3084_v16, %v1581_v15  ;;  %v1929_v14 = vadd.f32 %v3695_v26, %v1823_v10 }
 0x35e   :  { %v1720_v46 = vmul.f32 %v3663_v47, %v1559_v59  ;;  %v1721_v60 = vmul.f32 %v3673_v2, %v1559_v59  ;;  %2789 = vst [vmem:[%s5855_s5 + $0x1f8] sm:$0xff] %v2679_v21  ;;  %v2414_v36 = vadd.f32 %v2413_v11, %v2280_v58  ;;  %v1579_v11 = vsel %vm1578_vm11, %v5568_v53, %v1575_v50 }
 0x35f   :  { %v1583_v22 = vmul.f32 0.5, %v1582_v55  ;;  %v1725_v53 = vmul.f32 %v3673_v2, %v1579_v11  ;;  %vm1606_vm12 = vweird.f32 %v5606_v23 }
 0x360   :  { %2790 = vst [vmem:[%s5855_s5 + $0x200] sm:$0xff] %v2414_v36  ;;  %v1820_v0 = vmul.f32 %v1720_v46, %v5303_v42  ;;  %v1821_v28 = vmul.f32 %v1721_v60, %v5314_v51 }
 0x361   :  { %v2547_v12 = vpop.f32.mrf.mxu2  ;;  %v1584_v20 = vsub.f32 1.5, %v1583_v22  ;;  %v1724_v22 = vmul.f32 %v3663_v47, %v1579_v11 }
 0x362   :  { %v5632_v9 = vpop.eup %3085  ;;  %v2548_v7 = vadd.f32 %v2547_v12, %v4124_v8  ;;  %v2681_v18 = vpop.f32.mrf.mxu3  ;;  %v1926_v29 = vadd.f32 %v3671_v48, %v1820_v0  ;;  %v1927_v63 = vadd.f32 %v3695_v26, %v1821_v28 }
 0x363   :  { %v5639_v3 = vpop.eup %3087  ;;  %v2281_v42 = vpop.f32.mrf.mxu0  ;;  %v1585_v25 = vmul.f32 %v3084_v16, %v1584_v20  ;;  %v1601_v51 = vmul.f32 %v5632_v9, %v5606_v23  ;;  %v1824_v6 = vmul.f32 %v1724_v22, %v5284_v44  ;;  %vm1607_vm13 = vweird.f32 %v5632_v9 }
 0x364   :  { %v2682_v38 = vadd.f32 %v2681_v18, %v2548_v7  ;;  %v2282_v57 = vadd.f32 %v2281_v42, %v4100_v27  ;;  %v2415_v40 = vpop.f32.mrf.mxu1  ;;  %v1591_v43 = vmul.f32 %v5639_v3, %v5604_v41  ;;  %v1984_v19 = vpack.c.bf16 %v1928_v4, %v1926_v29  ;;  %vm1608_vm0 = vmor %vm1606_vm12, %vm1607_vm13 }
 0x365   :  { %v1589_v31 = vsel %vm1588_vm10, %v3084_v16, %v1585_v25  ;;  %v1602_v15 = vmul.f32 %v5632_v9, %v1601_v51  ;;  %v1985_v21 = vpack.c.bf16 %v1929_v14, %v1927_v63  ;;  %vm1597_vm15 = vweird.f32 %v5639_v3 }
 0x366   :  { %2791 = vst [vmem:[%s5855_s5 + $0x208] sm:$0xff] %v2682_v38  ;;  %v2416_v56 = vadd.f32 %v2415_v40, %v2282_v57  ;;  %v1592_v35 = vmul.f32 %v5639_v3, %v1591_v43  ;;  %v1726_v37 = vmul.f32 %v3663_v47, %v1589_v31  ;;  %v1727_v46 = vmul.f32 %v3673_v2, %v1589_v31  ;;  %vm1598_vm1 = vmor %vm1596_vm14, %vm1597_vm15 }
 0x367   :  { %v1603_v60 = vmul.f32 0.5, %v1602_v15 }
 0x368   :  { %2792 = vst [vmem:[%s5855_s5 + $0x210] sm:$0xff] %v2416_v56  ;;  %v1593_v12 = vmul.f32 0.5, %v1592_v35  ;;  %v1826_v1 = vmul.f32 %v1726_v37, %v5325_v34  ;;  %v1827_v24 = vmul.f32 %v1727_v46, %v5335_v32  ;;  %v1825_v34 = vmul.f32 %v1725_v53, %v5287_v49 }
 0x369   :  { %v2549_v58 = vpop.f32.mrf.mxu2  ;;  %2303 = vmatmul.bf16.gmra.mxu0 %v1984_v19  ;;  %2571 = vmatmul.bf16.gmra.mxu2 %v1984_v19  ;;  %v1604_v28 = vsub.f32 1.5, %v1603_v60  ;;  %v1930_v49 = vadd.f32 %v3671_v48, %v1824_v6 }
 0x36a   :  { %v2683_v62 = vpop.f32.mrf.mxu3  ;;  %2437 = vmatmul.bf16.gmra.mxu1 %v1985_v21  ;;  %v2550_v16 = vadd.f32 %v2549_v58, %v4124_v8  ;;  %2705 = vmatmul.bf16.gmra.mxu3 %v1985_v21  ;;  %v1594_v20 = vsub.f32 1.5, %v1593_v12  ;;  %v1932_v32 = vadd.f32 %v3671_v48, %v1826_v1  ;;  %v1933_v38 = vadd.f32 %v3695_v26, %v1827_v24 }
 0x36b   :  { %v2284_v59 = vpop.f32.mrf.mxu0  ;;  %v1605_v29 = vmul.f32 %v5632_v9, %v1604_v28  ;;  %v1931_v4 = vadd.f32 %v3695_v26, %v1825_v34 }
 0x36c   :  { %v2285_v55 = vadd.f32 %v2284_v59, %v4100_v27  ;;  %v2418_v36 = vpop.f32.mrf.mxu1  ;;  %v2684_v0 = vadd.f32 %v2683_v62, %v2550_v16  ;;  %v1595_v57 = vmul.f32 %v5639_v3, %v1594_v20  ;;  %v1986_v63 = vpack.c.bf16 %v1932_v32, %v1930_v49  ;;  %v1026_v20 = vpop.xlane.xlu2 %1025 }
 0x36d   :  { %v1609_v50 = vsel %vm1608_vm0, %v5632_v9, %v1605_v29  ;;  %v1987_v23 = vpack.c.bf16 %v1933_v38, %v1931_v4 }
 0x36e   :  { %v2419_v39 = vadd.f32 %v2418_v36, %v2285_v55  ;;  %2793 = vst [vmem:[%s5855_s5 + $0x218] sm:$0xff] %v2684_v0  ;;  %v1599_v56 = vsel %vm1598_vm1, %v5639_v3, %v1595_v57  ;;  %v1730_v41 = vmul.f32 %v3663_v47, %v1609_v50  ;;  %v1731_v9 = vmul.f32 %v3673_v2, %v1609_v50 }
 0x36f   :  { %v1728_v11 = vmul.f32 %v3663_v47, %v1599_v56  ;;  %v1729_v35 = vmul.f32 %v3673_v2, %v1599_v56 }
 0x370   :  { %2794 = vst [vmem:[%s5855_s5 + $0x220] sm:$0xff] %v2419_v39  ;;  %v1830_v62 = vmul.f32 %v1730_v41, %v5404_v30  ;;  %v1831_v37 = vmul.f32 %v1731_v9, %v5407_v5 }
 0x371   :  { %v2552_v10 = vpop.f32.mrf.mxu2  ;;  %v1828_v59 = vmul.f32 %v1728_v11, %v5361_v54  ;;  %v1829_v55 = vmul.f32 %v1729_v35, %v5366_v13 }
 0x372   :  { %v2553_v7 = vadd.f32 %v2552_v10, %v4124_v8  ;;  %v2686_v18 = vpop.f32.mrf.mxu3  ;;  %v1936_v22 = vadd.f32 %v3671_v48, %v1830_v62  ;;  %v1937_v53 = vadd.f32 %v3695_v26, %v1831_v37 }
 0x373   :  { %v2286_v42 = vpop.f32.mrf.mxu0  ;;  %v1934_v39 = vadd.f32 %v3671_v48, %v1828_v59  ;;  %v1935_v5 = vadd.f32 %v3695_v26, %v1829_v55 }
 0x374   :  { %v2687_v25 = vadd.f32 %v2686_v18, %v2553_v7  ;;  %v2287_v44 = vadd.f32 %v2286_v42, %v4100_v27  ;;  %v2420_v51 = vpop.f32.mrf.mxu1  ;;  %v1078_v7 = vmul.f32 %v1026_v20, %v3208_v33 }
 0x375   :  { %v1988_v1 = vpack.c.bf16 %v1936_v22, %v1934_v39  ;;  %v1989_v13 = vpack.c.bf16 %v1937_v53, %v1935_v5 }
 0x376   :  { %2795 = vst [vmem:[%s5855_s5 + $0x228] sm:$0xff] %v2687_v25  ;;  %v2421_v40 = vadd.f32 %v2420_v51, %v2287_v44  ;;  %v1128_v18 = vadd.f32 1e-05, %v1078_v7 }
 0x378   :  { %2796 = vst [vmem:[%s5855_s5 + $0x230] sm:$0xff] %v2421_v40  ;;  %3089 = vrsqrt.f32 %v1128_v18  ;;  %vm1616_vm2 = vweird.f32 %v1128_v18 }
 0x379   :  { %v2554_v43 = vpop.f32.mrf.mxu2  ;;  %2308 = vmatmul.bf16.gmra.mxu0 %v1986_v63  ;;  %2576 = vmatmul.bf16.gmra.mxu2 %v1986_v63 }
 0x37a   :  { %v2555_v14 = vadd.f32 %v2554_v43, %v4124_v8  ;;  %v2688_v19 = vpop.f32.mrf.mxu3  ;;  %2442 = vmatmul.bf16.gmra.mxu1 %v1987_v23  ;;  %2710 = vmatmul.bf16.gmra.mxu3 %v1987_v23 }
 0x37b   :  { %v2289_v31 = vpop.f32.mrf.mxu0 }
 0x37c   :  { %v2689_v15 = vadd.f32 %v2688_v19, %v2555_v14  ;;  %v2290_v21 = vadd.f32 %v2289_v31, %v4100_v27  ;;  %v2423_v58 = vpop.f32.mrf.mxu1 }
 0x37e   :  { %2797 = vst [vmem:[%s5855_s5 + $0x238] sm:$0xff] %v2689_v15  ;;  %v2424_v3 = vadd.f32 %v2423_v58, %v2290_v21  ;;  %v3090_v34 = vpop.eup %3089 }
 0x37f   :  { %v1611_v42 = vmul.f32 %v3090_v34, %v1128_v18  ;;  %vm1617_vm3 = vweird.f32 %v3090_v34 }
 0x380   :  { %2798 = vst [vmem:[%s5855_s5 + $0x240] sm:$0xff] %v2424_v3  ;;  %vm1618_vm4 = vmor %vm1616_vm2, %vm1617_vm3 }
 0x381   :  { %v2557_v16 = vpop.f32.mrf.mxu2  ;;  %v1612_v32 = vmul.f32 %v3090_v34, %v1611_v42 }
 0x382   :  { %v2558_v46 = vadd.f32 %v2557_v16, %v4124_v8  ;;  %v2691_v60 = vpop.f32.mrf.mxu3 }
 0x383   :  { %v2291_v36 = vpop.f32.mrf.mxu0  ;;  %v1613_v44 = vmul.f32 0.5, %v1612_v32 }
 0x384   :  { %v2692_v0 = vadd.f32 %v2691_v60, %v2558_v46  ;;  %v2292_v30 = vadd.f32 %v2291_v36, %v4100_v27  ;;  %v2425_v12 = vpop.f32.mrf.mxu1 }
 0x385   :  { %v1614_v38 = vsub.f32 1.5, %v1613_v44 }
 0x386   :  { %2799 = vst [vmem:[%s5855_s5 + $0x248] sm:$0xff] %v2692_v0  ;;  %v2426_v54 = vadd.f32 %v2425_v12, %v2292_v30 }
 0x387   :  { %v1615_v57 = vmul.f32 %v3090_v34, %v1614_v38 }
 0x388   :  { %2800 = vst [vmem:[%s5855_s5 + $0x250] sm:$0xff] %v2426_v54 }
 0x389   :  { %v2559_v28 = vpop.f32.mrf.mxu2  ;;  %2313 = vmatmul.bf16.gmra.mxu0 %v1988_v1  ;;  %2581 = vmatmul.bf16.gmra.mxu2 %v1988_v1  ;;  %v1619_v23 = vsel %vm1618_vm4, %v3090_v34, %v1615_v57 }
 0x38a   :  { %v2560_v24 = vadd.f32 %v2559_v28, %v4124_v8  ;;  %2447 = vmatmul.bf16.gmra.mxu1 %v1989_v13  ;;  %v2693_v10 = vpop.f32.mrf.mxu3  ;;  %2715 = vmatmul.bf16.gmra.mxu3 %v1989_v13  ;;  %v1733_v41 = vmul.f32 %v3673_v2, %v1619_v23 }
 0x38c   :  { %v2694_v6 = vadd.f32 %v2693_v10, %v2560_v24  ;;  %v1833_v16 = vmul.f32 %v1733_v41, %v5434_v52 }
 0x38e   :  { %2801 = vst [vmem:[%s5855_s5 + $0x258] sm:$0xff] %v2694_v6 }
 0x3ab   :  { %v1029_v29 = vpop.xlane.xlu0 %1028 }
 0x3ac   :  { %v1079_v25 = vmul.f32 %v1029_v29, %v3208_v33  ;;  %v1732_v33 = vmul.f32 %v3663_v47, %v1619_v23 }
 0x3ae   :  { %v1129_v51 = vadd.f32 1e-05, %v1079_v25  ;;  %v1832_v35 = vmul.f32 %v1732_v33, %v5431_v45  ;;  %v1939_v45 = vadd.f32 %v3695_v26, %v1833_v16 }
 0x3b0   :  { %3091 = vrsqrt.f32 %v1129_v51  ;;  %vm1626_vm6 = vweird.f32 %v1129_v51 }
 0x3b6   :  { %v3092_v49 = vpop.eup %3091 }
 0x3b7   :  { %v1621_v40 = vmul.f32 %v3092_v49, %v1129_v51  ;;  %vm1627_vm5 = vweird.f32 %v3092_v49 }
 0x3b8   :  { %vm1628_vm7 = vmor %vm1626_vm6, %vm1627_vm5 }
 0x3b9   :  { %v1622_v4 = vmul.f32 %v3092_v49, %v1621_v40 }
 0x3bb   :  { %v2294_v63 = vpop.f32.mrf.mxu0  ;;  %v2428_v50 = vpop.f32.mrf.mxu1  ;;  %v1623_v56 = vmul.f32 0.5, %v1622_v4 }
 0x3bc   :  { %v2295_v43 = vadd.f32 %v2294_v63, %v4100_v27 }
 0x3bd   :  { %v1624_v19 = vsub.f32 1.5, %v1623_v56 }
 0x3be   :  { %v2429_v14 = vadd.f32 %v2428_v50, %v2295_v43 }
 0x3bf   :  { %v1625_v31 = vmul.f32 %v3092_v49, %v1624_v19 }
 0x3c0   :  { %2802 = vst [vmem:[%s5855_s5 + $0x260] sm:$0xff] %v2429_v14 }
 0x3c1   :  { %v1629_v21 = vsel %vm1628_vm7, %v3092_v49, %v1625_v31 }
 0x3c2   :  { %v2562_v9 = vpop.f32.mrf.mxu2  ;;  %v2696_v15 = vpop.f32.mrf.mxu3  ;;  %v1734_v3 = vmul.f32 %v3663_v47, %v1629_v21  ;;  %v1735_v62 = vmul.f32 %v3673_v2, %v1629_v21  ;;  %v1938_v47 = vadd.f32 %v3671_v48, %v1832_v35 }
 0x3c3   :  { %v2563_v58 = vadd.f32 %v2562_v9, %v4124_v8  ;;  %v2296_v11 = vpop.f32.mrf.mxu0  ;;  %v2430_v46 = vpop.f32.mrf.mxu1 }
 0x3c4   :  { %v2297_v37 = vadd.f32 %v2296_v11, %v4100_v27  ;;  %v1834_v55 = vmul.f32 %v1734_v3, %v5508_v61  ;;  %v1835_v36 = vmul.f32 %v1735_v62, %v5511_v17 }
 0x3c5   :  { %v2697_v59 = vadd.f32 %v2696_v15, %v2563_v58 }
 0x3c6   :  { %v2431_v60 = vadd.f32 %v2430_v46, %v2297_v37  ;;  %v1940_v2 = vadd.f32 %v3671_v48, %v1834_v55  ;;  %v1941_v52 = vadd.f32 %v3695_v26, %v1835_v36 }
 0x3c7   :  { %2803 = vst [vmem:[%s5855_s5 + $0x268] sm:$0xff] %v2697_v59 }
 0x3c8   :  { %2804 = vst [vmem:[%s5855_s5 + $0x270] sm:$0xff] %v2431_v60  ;;  %v1990_v61 = vpack.c.bf16 %v1940_v2, %v1938_v47  ;;  %v1991_v0 = vpack.c.bf16 %v1941_v52, %v1939_v45 }
 0x3ca   :  { %v2564_v22 = vpop.f32.mrf.mxu2  ;;  %v2698_v30 = vpop.f32.mrf.mxu3  ;;  %2318 = vmatmul.bf16.gmra.mxu0 %v1990_v61  ;;  %2452 = vmatmul.bf16.gmra.mxu1 %v1991_v0 }
 0x3cb   :  { %v2565_v17 = vadd.f32 %v2564_v22, %v4124_v8  ;;  %2586 = vmatmul.bf16.gmra.mxu2 %v1990_v61  ;;  %2720 = vmatmul.bf16.gmra.mxu3 %v1991_v0 }
 0x3cd   :  { %v2699_v53 = vadd.f32 %v2698_v30, %v2565_v17 }
 0x3cf   :  { %2805 = vst [vmem:[%s5855_s5 + $0x278] sm:$0xff] %v2699_v53 }
 0x3d6   :  { %v2299_v48 = vpop.f32.mrf.mxu0 }
 0x3d7   :  { %v2300_v12 = vadd.f32 %v2299_v48, %v4100_v27  ;;  %v2433_v39 = vpop.f32.mrf.mxu1 }
 0x3d9   :  { %v2434_v26 = vadd.f32 %v2433_v39, %v2300_v12 }
 0x3db   :  { %2806 = vst [vmem:[%s5855_s5 + $0x280] sm:$0xff] %v2434_v26 }
 0x3dc   :  { %v2567_v54 = vpop.f32.mrf.mxu2 }
 0x3dd   :  { %v2568_v5 = vadd.f32 %v2567_v54, %v4124_v8  ;;  %v2701_v1 = vpop.f32.mrf.mxu3 }
 0x3de   :  { %v2301_v13 = vpop.f32.mrf.mxu0 }
 0x3df   :  { %v2702_v28 = vadd.f32 %v2701_v1, %v2568_v5  ;;  %v2302_v24 = vadd.f32 %v2301_v13, %v4100_v27  ;;  %v2435_v10 = vpop.f32.mrf.mxu1 }
 0x3e1   :  { %2807 = vst [vmem:[%s5855_s5 + $0x288] sm:$0xff] %v2702_v28  ;;  %v2436_v6 = vadd.f32 %v2435_v10, %v2302_v24 }
 0x3e3   :  { %2808 = vst [vmem:[%s5855_s5 + $0x290] sm:$0xff] %v2436_v6 }
 0x3e4   :  { %v2569_v20 = vpop.f32.mrf.mxu2 }
 0x3e5   :  { %v2570_v7 = vadd.f32 %v2569_v20, %v4124_v8  ;;  %v2703_v18 = vpop.f32.mrf.mxu3 }
 0x3e6   :  { %v2304_v34 = vpop.f32.mrf.mxu0 }
 0x3e7   :  { %v2704_v42 = vadd.f32 %v2703_v18, %v2570_v7  ;;  %v2305_v32 = vadd.f32 %v2304_v34, %v4100_v27  ;;  %v2438_v29 = vpop.f32.mrf.mxu1 }
 0x3e9   :  { %2809 = vst [vmem:[%s5855_s5 + $0x298] sm:$0xff] %v2704_v42  ;;  %v2439_v25 = vadd.f32 %v2438_v29, %v2305_v32 }
 0x3eb   :  { %2810 = vst [vmem:[%s5855_s5 + $0x2a0] sm:$0xff] %v2439_v25 }
 0x3ec   :  { %v2572_v44 = vpop.f32.mrf.mxu2 }
 0x3ed   :  { %v2573_v51 = vadd.f32 %v2572_v44, %v4124_v8  ;;  %v2706_v38 = vpop.f32.mrf.mxu3 }
 0x3ee   :  { %v2306_v49 = vpop.f32.mrf.mxu0 }
 0x3ef   :  { %v2707_v57 = vadd.f32 %v2706_v38, %v2573_v51  ;;  %v2307_v40 = vadd.f32 %v2306_v49, %v4100_v27  ;;  %v2440_v4 = vpop.f32.mrf.mxu1 }
 0x3f1   :  { %2811 = vst [vmem:[%s5855_s5 + $0x2a8] sm:$0xff] %v2707_v57  ;;  %v2441_v63 = vadd.f32 %v2440_v4, %v2307_v40 }
 0x3f3   :  { %2812 = vst [vmem:[%s5855_s5 + $0x2b0] sm:$0xff] %v2441_v63 }
 0x3f4   :  { %v2574_v50 = vpop.f32.mrf.mxu2 }
 0x3f5   :  { %v2575_v23 = vadd.f32 %v2574_v50, %v4124_v8  ;;  %v2708_v43 = vpop.f32.mrf.mxu3 }
 0x3f6   :  { %v2309_v56 = vpop.f32.mrf.mxu0 }
 0x3f7   :  { %v2709_v14 = vadd.f32 %v2708_v43, %v2575_v23  ;;  %v2310_v33 = vadd.f32 %v2309_v56, %v4100_v27  ;;  %v2443_v19 = vpop.f32.mrf.mxu1 }
 0x3f9   :  { %2813 = vst [vmem:[%s5855_s5 + $0x2b8] sm:$0xff] %v2709_v14  ;;  %v2444_v41 = vadd.f32 %v2443_v19, %v2310_v33 }
 0x3fb   :  { %2814 = vst [vmem:[%s5855_s5 + $0x2c0] sm:$0xff] %v2444_v41 }
 0x3fc   :  { %v2577_v31 = vpop.f32.mrf.mxu2 }
 0x3fd   :  { %v2578_v9 = vadd.f32 %v2577_v31, %v4124_v8  ;;  %v2711_v15 = vpop.f32.mrf.mxu3 }
 0x3fe   :  { %v2311_v21 = vpop.f32.mrf.mxu0 }
 0x3ff   :  { %v2712_v58 = vadd.f32 %v2711_v15, %v2578_v9  ;;  %v2312_v11 = vadd.f32 %v2311_v21, %v4100_v27  ;;  %v2445_v35 = vpop.f32.mrf.mxu1 }
 0x401   :  { %2815 = vst [vmem:[%s5855_s5 + $0x2c8] sm:$0xff] %v2712_v58  ;;  %v2446_v3 = vadd.f32 %v2445_v35, %v2312_v11 }
 0x403   :  { %2816 = vst [vmem:[%s5855_s5 + $0x2d0] sm:$0xff] %v2446_v3 }
 0x404   :  { %v2579_v62 = vpop.f32.mrf.mxu2 }
 0x405   :  { %v2580_v37 = vadd.f32 %v2579_v62, %v4124_v8  ;;  %v2713_v16 = vpop.f32.mrf.mxu3 }
 0x406   :  { %v2314_v59 = vpop.f32.mrf.mxu0 }
 0x407   :  { %v2714_v46 = vadd.f32 %v2713_v16, %v2580_v37  ;;  %v2315_v60 = vadd.f32 %v2314_v59, %v4100_v27  ;;  %v2448_v55 = vpop.f32.mrf.mxu1 }
 0x409   :  { %2817 = vst [vmem:[%s5855_s5 + $0x2d8] sm:$0xff] %v2714_v46  ;;  %v2449_v36 = vadd.f32 %v2448_v55, %v2315_v60 }
 0x40b   :  { %2818 = vst [vmem:[%s5855_s5 + $0x2e0] sm:$0xff] %v2449_v36 }
 0x40c   :  { %v2582_v47 = vpop.f32.mrf.mxu2 }
 0x40d   :  { %v2583_v2 = vadd.f32 %v2582_v47, %v4124_v8  ;;  %v2716_v45 = vpop.f32.mrf.mxu3 }
 0x40e   :  { %v2316_v52 = vpop.f32.mrf.mxu0 }
 0x40f   :  { %v2717_v22 = vadd.f32 %v2716_v45, %v2583_v2  ;;  %v2317_v61 = vadd.f32 %v2316_v52, %v4100_v27  ;;  %v2450_v0 = vpop.f32.mrf.mxu1 }
 0x411   :  { %2819 = vst [vmem:[%s5855_s5 + $0x2e8] sm:$0xff] %v2717_v22  ;;  %v2451_v17 = vadd.f32 %v2450_v0, %v2317_v61 }
 0x413   :  { %2820 = vst [vmem:[%s5855_s5 + $0x2f0] sm:$0xff] %v2451_v17 }
 0x414   :  { %v2584_v30 = vpop.f32.mrf.mxu2 }
 0x415   :  { %v2585_v53 = vadd.f32 %v2584_v30, %v4124_v8  ;;  %v2718_v48 = vpop.f32.mrf.mxu3 }
 0x417   :  { %v2719_v12 = vadd.f32 %v2718_v48, %v2585_v53 }
 0x419   :  { %2821 = vst [vmem:[%s5855_s5 + $0x2f8] sm:$0xff] %v2719_v12 }
 0x447   :  { %v2319_v39 = vpop.f32.mrf.mxu0  ;;  %v2453_v26 = vpop.f32.mrf.mxu1 }
 0x448   :  { %v2320_v54 = vadd.f32 %v2319_v39, %v4100_v27 }
 0x44a   :  { %v2454_v5 = vadd.f32 %v2453_v26, %v2320_v54 }
 0x44c   :  { %2822 = vst [vmem:[%s5855_s5 + $0x300] sm:$0xff] %v2454_v5 }
 0x44e   :  { %v2587_v1 = vpop.f32.mrf.mxu2  ;;  %v2721_v13 = vpop.f32.mrf.mxu3 }
 0x44f   :  { %v2588_v28 = vadd.f32 %v2587_v1, %v4124_v8  ;;  %v2321_v24 = vpop.f32.mrf.mxu0  ;;  %v2455_v20 = vpop.f32.mrf.mxu1 }
 0x450   :  { %v2322_v10 = vadd.f32 %v2321_v24, %v4100_v27 }
 0x451   :  { %v2722_v6 = vadd.f32 %v2721_v13, %v2588_v28 }
 0x452   :  { %v2456_v7 = vadd.f32 %v2455_v20, %v2322_v10 }
 0x453   :  { %2823 = vst [vmem:[%s5855_s5 + $0x308] sm:$0xff] %v2722_v6 }
 0x454   :  { %2824 = vst [vmem:[%s5855_s5 + $0x310] sm:$0xff] %v2456_v7 }
 0x456   :  { %v2589_v18 = vpop.f32.mrf.mxu2  ;;  %v2723_v42 = vpop.f32.mrf.mxu3 }
 0x457   :  { %v2590_v34 = vadd.f32 %v2589_v18, %v4124_v8 }
 0x459   :  { %v2724_v32 = vadd.f32 %v2723_v42, %v2590_v34 }
 0x45b   :  { %2825 = vst [vmem:[%s5855_s5 + $0x318] sm:$0xff] %v2724_v32 }

</bundles_post_ra>
